<compile_context>
chip_gen: v5e
topology: v5e:2x2
jax: 0.10.0
libtpu: 0.0.40
codegen_flags: <defaults>
</compile_context>

<pallas_src>
import functools

import jax
import jax.numpy as jnp
from jax.experimental import pallas as pl
from jax.experimental.pallas import tpu as pltpu

NUM_GROUPS = 8
EPS = 1e-5


def _elu(a):
    # ELU(alpha=1).  exp(min(a,0))-1 keeps the exp argument non-positive.
    return jnp.where(a > 0, a, jnp.exp(jnp.minimum(a, 0.0)) - 1.0)


# ----------------------------------------------------------------------------
# Fused DownBlock kernel: one batch element per grid step, everything in VMEM.
# ----------------------------------------------------------------------------
def _down_block_kernel(xpad_ref, mask_l_ref, mask_r_ref,
                       w1_ref, b1_ref, g1_ref, bt1_ref,
                       w3x_ref, w3h_ref, b3_ref, g3_ref, bt3_ref,
                       w2x_ref, w2h1_ref, w2h3_ref, b2_ref,
                       oh_ref, oht_ref,
                       o_ref,
                       padh_ref,
                       *, H, W, pad_rows):
    # xpad_ref : (1, pad + H*W + pad, Cin) flattened image, zero rows top/bottom
    #            (padding produced in the wrapper, DMA'd straight into VMEM)
    # mask_*   : (H*W, 1)  row masks for the dx = -1 / +1 taps (W-edge wrap)
    # w1_ref   : (9, Cin, Ch) conv_1 taps ; w3x/w3h : conv_3 taps split by input
    # w2*_ref  : (C, Co)   1x1 conv weights split by input (x / h1 / h3)
    # oh_ref   : (Ch, G) one-hot channel->group ; oht_ref : (G, Ch)
    # o_ref    : (1, H*W, Co)
    # padh_ref : VMEM scratch, zero-padded flattened h1
    HW = H * W
    off0 = pad_rows                       # interior start row (8-aligned)
    Ch = w1_ref.shape[2]

    mask_l = mask_l_ref[...]
    mask_r = mask_r_ref[...]

    # Refresh only the zero border bands of the h1 scratch (the interior is
    # fully overwritten below).  Done every step so correctness never depends
    # on scratch state when the batch grid axis is sharded across TensorCores.
    padh_ref[0:off0, :] = jnp.zeros((off0, Ch), jnp.float32)
    padh_ref[off0 + HW:off0 + HW + pad_rows, :] = jnp.zeros(
        (pad_rows, Ch), jnp.float32)

    def x_base(ky):                        # 8-aligned whole-image slice, dy=ky-1
        s = off0 + (ky - 1) * W
        return xpad_ref[0, s:s + HW, :]

    def h_base(ky):
        s = off0 + (ky - 1) * W
        return padh_ref[s:s + HW, :]

    def conv3x3(inputs, b_ref):
        # inputs: list of (base_loader, w_ref (9, Cx, Ch)).
        # Only 3 aligned loads per input; 9 matmuls per input accumulate into
        # 3 per-dx accumulators.  The +-1 column shift is applied once per dx
        # to the accumulated result (roll commutes with the row-wise matmul);
        # the W-edge / wrap rows are zeroed by one mask multiply per dx group.
        accs = [jnp.zeros((HW, Ch), jnp.float32) for _ in range(3)]
        for loader, w_ref in inputs:
            for ky in range(3):
                base = loader(ky)                       # one aligned vld pass
                for dxi in range(3):                    # kx = dxi, dx = dxi-1
                    accs[dxi] = accs[dxi] + jnp.dot(
                        base, w_ref[ky * 3 + dxi],
                        preferred_element_type=jnp.float32)
        left = pltpu.roll(accs[0], 1, axis=0) * mask_l          # dx = -1
        right = pltpu.roll(accs[2], HW - 1, axis=0) * mask_r    # dx = +1
        return accs[1] + left + right + b_ref[...]

    def group_norm(act, g_ref, b_ref):
        c = act.shape[1]
        g = oh_ref.shape[1]
        n_elem = float(HW * (c // g))
        sum_c = jnp.sum(act, axis=0, keepdims=True)             # (1, C)
        sumsq_c = jnp.sum(act * act, axis=0, keepdims=True)     # (1, C)
        gmean = jnp.dot(sum_c, oh_ref[...],
                        preferred_element_type=jnp.float32) / n_elem
        gmsq = jnp.dot(sumsq_c, oh_ref[...],
                       preferred_element_type=jnp.float32) / n_elem
        # One-pass variance in f32 with a >=0 clamp; for strict parity with
        # PyTorch under large-magnitude activations use a two-pass variance.
        gvar = jnp.maximum(gmsq - gmean * gmean, 0.0)
        mean_c = jnp.dot(gmean, oht_ref[...],
                         preferred_element_type=jnp.float32)    # (1, C)
        var_c = jnp.dot(gvar, oht_ref[...],
                        preferred_element_type=jnp.float32)     # (1, C)
        scale = jax.lax.rsqrt(var_c + EPS) * g_ref[...]
        shift = b_ref[...] - mean_c * scale
        return act * scale + shift                              # single pass

    # ---- conv_1: 3x3 + ELU + GN (reads the pre-padded x block directly) ----
    h1 = group_norm(_elu(conv3x3([(x_base, w1_ref)], b1_ref)), g1_ref, bt1_ref)

    # ---- conv_3 on concat([x, h1]) via split weights ------------------------
    padh_ref[off0:off0 + HW, :] = h1        # interior store (borders stay 0)
    h3 = group_norm(
        _elu(conv3x3([(x_base, w3x_ref), (h_base, w3h_ref)], b3_ref)),
        g3_ref, bt3_ref)

    # ---- conv_2 (1x1) on concat([x, h1, h3]) via split weights --------------
    x = xpad_ref[0, off0:off0 + HW, :]
    out = (jnp.dot(x, w2x_ref[...], preferred_element_type=jnp.float32)
           + jnp.dot(h1, w2h1_ref[...], preferred_element_type=jnp.float32)
           + jnp.dot(h3, w2h3_ref[...], preferred_element_type=jnp.float32)
           + b2_ref[...])
    o_ref[0, :, :] = out.astype(o_ref.dtype)                    # single store


# ----------------------------------------------------------------------------
# Wrapper
# ----------------------------------------------------------------------------
def _full_spec(a):
    idx = (0,) * a.ndim
    return pl.BlockSpec(a.shape, lambda n, _idx=idx: _idx)


@functools.partial(jax.jit, static_argnames=("do_pool",))
def down_block_forward(x_nchw, params, do_pool=True):
    x_nchw = x_nchw.astype(jnp.float32)
    N, Cin, H0, W0 = x_nchw.shape
    Ch = params["w1"].shape[3]
    Co = params["w2"].shape[1]
    assert Ch % NUM_GROUPS == 0, "h_size must be divisible by num_groups"

    if do_pool:
        assert H0 % 2 == 0 and W0 % 2 == 0, "spatial dims must be even to pool"
        H, W = H0 // 2, W0 // 2
        # AvgPool2x2 done here: XLA fuses the mean into the NCHW->(N,HW,C)
        # relayout, so the kernel's per-step input DMA is 4x smaller.
        xp = x_nchw.reshape(N, Cin, H, 2, W, 2).mean(axis=(3, 5))
    else:
        H, W = H0, W0
        xp = x_nchw
    HW = H * W
    pad_rows = ((W + 1 + 7) // 8) * 8       # 8-aligned interior offset >= W+1

    # Flatten spatial dims to rows and zero-pad top/bottom here so the kernel
    # needs no x scratch, no interior store and no border zeroing for x; the
    # H-edge conv taps simply read the DMA'd zero rows.
    x_flat = jnp.transpose(xp, (0, 2, 3, 1)).reshape(N, HW, Cin)
    xpad = jnp.pad(x_flat, ((0, 0), (pad_rows, pad_rows), (0, 0)))

    # Fold the channel concats into split weights (free wrapper-side slicing).
    # NOTE: weights here are HWIO / (Cin_total, Co); real PyTorch Conv2d
    # weights (OIHW) must be permuted at the load boundary.
    w1t = params["w1"].reshape(9, Cin, Ch)
    w3 = params["w3"]                                   # (3, 3, Cin+Ch, Ch)
    w3xt = w3[:, :, :Cin, :].reshape(9, Cin, Ch)
    w3ht = w3[:, :, Cin:, :].reshape(9, Ch, Ch)
    w2 = params["w2"]                                   # (Cin+2*Ch, Co)
    w2x, w2h1, w2h3 = w2[:Cin], w2[Cin:Cin + Ch], w2[Cin + Ch:]

    b1 = params["b1"].reshape(1, Ch)
    g1 = params["g1"].reshape(1, Ch)
    bt1 = params["bt1"].reshape(1, Ch)
    b3 = params["b3"].reshape(1, Ch)
    g3 = params["g3"].reshape(1, Ch)
    bt3 = params["bt3"].reshape(1, Ch)
    b2 = params["b2"].reshape(1, Co)

    onehot = (jnp.arange(Ch)[:, None] // (Ch // NUM_GROUPS)
              == jnp.arange(NUM_GROUPS)[None, :]).astype(jnp.float32)
    onehot_t = jnp.transpose(onehot)

    # W-edge masks for the dx = -1 / +1 taps (also kill the roll wrap rows).
    wcol = jnp.arange(HW) % W
    mask_l = (wcol >= 1).astype(jnp.float32).reshape(HW, 1)
    mask_r = (wcol <= W - 2).astype(jnp.float32).reshape(HW, 1)

    kernel = functools.partial(_down_block_kernel, H=H, W=W, pad_rows=pad_rows)

    args = (xpad, mask_l, mask_r,
            w1t, b1, g1, bt1,
            w3xt, w3ht, b3, g3, bt3,
            w2x, w2h1, w2h3, b2,
            onehot, onehot_t)

    in_specs = [pl.BlockSpec((1, HW + 2 * pad_rows, Cin), lambda n: (n, 0, 0))]
    in_specs += [_full_spec(a) for a in args[1:]]

    # For large H,W,C (v7x: 64 MiB VMEM, 32 MiB default scoped limit) or small
    # N, add a spatial row-tile "parallel" grid axis with a 1-row halo and set
    # vmem_limit_bytes; unnecessary at these shapes (whole image ~10s of KiB).
    out_flat = pl.pallas_call(
        kernel,
        out_shape=jax.ShapeDtypeStruct((N, HW, Co), jnp.float32),
        grid=(N,),
        in_specs=in_specs,
        out_specs=pl.BlockSpec((1, HW, Co), lambda n: (n, 0, 0)),
        scratch_shapes=[
            pltpu.VMEM((HW + 2 * pad_rows, Ch), jnp.float32),
        ],
        compiler_params=pltpu.CompilerParams(
            dimension_semantics=("parallel",)),   # batch over TensorCores
    )(*args)

    # (N, H*W, Co) -> NCHW  (tiny XLA transpose; a lane-dense (N,Co,HW) kernel
    # output would remove it for deployments with HW>=128 and Co>=128).
    return jnp.transpose(out_flat.reshape(N, H, W, Co), (0, 3, 1, 2))


def init_down_block_params(key, in_size, h_size, out_size):
    """Deterministic parameter init matching the module's __init__ shapes."""
    def conv_init(k, kh, kw, cin, cout):
        k1, k2 = jax.random.split(k)
        bound = 1.0 / jnp.sqrt(cin * kh * kw)
        w = jax.random.uniform(k1, (kh, kw, cin, cout), jnp.float32,
                               -bound, bound)
        b = jax.random.uniform(k2, (cout,), jnp.float32, -bound, bound)
        return w, b

    k1, k2, k3 = jax.random.split(key, 3)
    c1 = in_size
    c3 = in_size + h_size
    c2 = in_size + 2 * h_size
    w1, b1 = conv_init(k1, 3, 3, c1, h_size)
    w3, b3 = conv_init(k2, 3, 3, c3, h_size)
    w2_full, b2 = conv_init(k3, 1, 1, c2, out_size)
    return {
        "w1": w1, "b1": b1,
        "g1": jnp.ones((h_size,), jnp.float32),
        "bt1": jnp.zeros((h_size,), jnp.float32),
        "w3": w3, "b3": b3,
        "g3": jnp.ones((h_size,), jnp.float32),
        "bt3": jnp.zeros((h_size,), jnp.float32),
        "w2": w2_full.reshape(c2, out_size), "b2": b2,
    }


if __name__ == "__main__":
    batch, in_size, h_size, out_size, spatial = 2, 4, 16, 8, 16

    key = jax.random.PRNGKey(0)
    kx, kp = jax.random.split(key)
    x = jax.random.normal(kx, (batch, in_size, spatial, spatial), jnp.float32)
    params = init_down_block_params(kp, in_size, h_size, out_size)

    out = down_block_forward(x, params, do_pool=True)
    out = jax.block_until_ready(out)

    assert out.shape == (batch, out_size, spatial // 2, spatial // 2), out.shape
    assert bool(jnp.all(jnp.isfinite(out)))
    print("KERNEL_OK")
</pallas_src>

<mosaic_0001>
module attributes {stable_mosaic.version = 11 : i64} {
  func.func @_down_block_kernel(%arg0: i32, %arg1: memref<1x96x4xf32, #tpu.memory_space<vmem>>, %arg2: memref<64x1xf32, #tpu.memory_space<vmem>>, %arg3: memref<64x1xf32, #tpu.memory_space<vmem>>, %arg4: memref<9x4x16xf32, #tpu.memory_space<vmem>>, %arg5: memref<1x16xf32, #tpu.memory_space<vmem>>, %arg6: memref<1x16xf32, #tpu.memory_space<vmem>>, %arg7: memref<1x16xf32, #tpu.memory_space<vmem>>, %arg8: memref<9x4x16xf32, #tpu.memory_space<vmem>>, %arg9: memref<9x16x16xf32, #tpu.memory_space<vmem>>, %arg10: memref<1x16xf32, #tpu.memory_space<vmem>>, %arg11: memref<1x16xf32, #tpu.memory_space<vmem>>, %arg12: memref<1x16xf32, #tpu.memory_space<vmem>>, %arg13: memref<4x8xf32, #tpu.memory_space<vmem>>, %arg14: memref<16x8xf32, #tpu.memory_space<vmem>>, %arg15: memref<16x8xf32, #tpu.memory_space<vmem>>, %arg16: memref<1x8xf32, #tpu.memory_space<vmem>>, %arg17: memref<16x8xf32, #tpu.memory_space<vmem>>, %arg18: memref<8x16xf32, #tpu.memory_space<vmem>>, %arg19: memref<1x64x8xf32, #tpu.memory_space<vmem>>, %arg20: memref<96x16xf32, #tpu.memory_space<vmem>>) attributes {dimension_semantics = [#tpu.dimension_semantics<parallel>], iteration_bounds = array<i64: 2>, scalar_prefetch = 0 : i64, scratch_operands = 1 : i64, tpu.core_type = #tpu.core_type<tc>, window_params = [{transform_indices = @transform_0, window_bounds = array<i64: 1, 96, 4>}, {pipeline_mode = #tpu.pipeline_mode<synchronous>, transform_indices = @transform_1, window_bounds = array<i64: 64, 1>}, {pipeline_mode = #tpu.pipeline_mode<synchronous>, transform_indices = @transform_2, window_bounds = array<i64: 64, 1>}, {pipeline_mode = #tpu.pipeline_mode<synchronous>, transform_indices = @transform_3, window_bounds = array<i64: 9, 4, 16>}, {pipeline_mode = #tpu.pipeline_mode<synchronous>, transform_indices = @transform_4, window_bounds = array<i64: 1, 16>}, {pipeline_mode = #tpu.pipeline_mode<synchronous>, transform_indices = @transform_5, window_bounds = array<i64: 1, 16>}, {pipeline_mode = #tpu.pipeline_mode<synchronous>, transform_indices = @transform_6, window_bounds = array<i64: 1, 16>}, {pipeline_mode = #tpu.pipeline_mode<synchronous>, transform_indices = @transform_7, window_bounds = array<i64: 9, 4, 16>}, {pipeline_mode = #tpu.pipeline_mode<synchronous>, transform_indices = @transform_8, window_bounds = array<i64: 9, 16, 16>}, {pipeline_mode = #tpu.pipeline_mode<synchronous>, transform_indices = @transform_9, window_bounds = array<i64: 1, 16>}, {pipeline_mode = #tpu.pipeline_mode<synchronous>, transform_indices = @transform_10, window_bounds = array<i64: 1, 16>}, {pipeline_mode = #tpu.pipeline_mode<synchronous>, transform_indices = @transform_11, window_bounds = array<i64: 1, 16>}, {pipeline_mode = #tpu.pipeline_mode<synchronous>, transform_indices = @transform_12, window_bounds = array<i64: 4, 8>}, {pipeline_mode = #tpu.pipeline_mode<synchronous>, transform_indices = @transform_13, window_bounds = array<i64: 16, 8>}, {pipeline_mode = #tpu.pipeline_mode<synchronous>, transform_indices = @transform_14, window_bounds = array<i64: 16, 8>}, {pipeline_mode = #tpu.pipeline_mode<synchronous>, transform_indices = @transform_15, window_bounds = array<i64: 1, 8>}, {pipeline_mode = #tpu.pipeline_mode<synchronous>, transform_indices = @transform_16, window_bounds = array<i64: 16, 8>}, {pipeline_mode = #tpu.pipeline_mode<synchronous>, transform_indices = @transform_17, window_bounds = array<i64: 8, 16>}, {transform_indices = @transform_18, window_bounds = array<i64: 1, 64, 8>}]} {
    %c0 = arith.constant 0 : index
    %c0_0 = arith.constant 0 : index
    %0 = vector.load %arg2[%c0, %c0_0] : memref<64x1xf32, #tpu.memory_space<vmem>>, vector<64x1xf32>
    %c0_1 = arith.constant 0 : index
    %c0_2 = arith.constant 0 : index
    %1 = vector.load %arg3[%c0_1, %c0_2] : memref<64x1xf32, #tpu.memory_space<vmem>>, vector<64x1xf32>
    %cst = arith.constant 0.000000e+00 : f32
    %2 = vector.broadcast %cst : f32 to vector<16x16xf32>
    %c0_3 = arith.constant 0 : index
    %c0_4 = arith.constant 0 : index
    %3 = vector.load %arg20[%c0_3, %c0_4] : memref<96x16xf32, #tpu.memory_space<vmem>>, vector<16x16xf32>
    tpu.vector_store %arg20[%c0_3, %c0_4], %2 {strides = array<i32>} : memref<96x16xf32, #tpu.memory_space<vmem>>, vector<16x16xf32>,
    %cst_5 = arith.constant 0.000000e+00 : f32
    %4 = vector.broadcast %cst_5 : f32 to vector<16x16xf32>
    %c80 = arith.constant 80 : index
    %c0_6 = arith.constant 0 : index
    %5 = vector.load %arg20[%c80, %c0_6] : memref<96x16xf32, #tpu.memory_space<vmem>>, vector<16x16xf32>
    tpu.vector_store %arg20[%c80, %c0_6], %4 {strides = array<i32>} : memref<96x16xf32, #tpu.memory_space<vmem>>, vector<16x16xf32>,
    %cst_7 = arith.constant 0.000000e+00 : f32
    %6 = vector.broadcast %cst_7 : f32 to vector<64x16xf32>
    %cst_8 = arith.constant 0.000000e+00 : f32
    %7 = vector.broadcast %cst_8 : f32 to vector<64x16xf32>
    %cst_9 = arith.constant 0.000000e+00 : f32
    %8 = vector.broadcast %cst_9 : f32 to vector<64x16xf32>
    %c0_10 = arith.constant 0 : index
    %c8 = arith.constant 8 : index
    %c0_11 = arith.constant 0 : index
    %9 = vector.load %arg1[%c0_10, %c8, %c0_11] : memref<1x96x4xf32, #tpu.memory_space<vmem>>, vector<1x64x4xf32>
    %10 = vector.shape_cast %9 : vector<1x64x4xf32> to vector<64x4xf32>
    %c0_12 = arith.constant 0 : index
    %c0_13 = arith.constant 0 : index
    %c0_14 = arith.constant 0 : index
    %11 = vector.load %arg4[%c0_12, %c0_13, %c0_14] : memref<9x4x16xf32, #tpu.memory_space<vmem>>, vector<1x4x16xf32>
    %12 = vector.shape_cast %11 : vector<1x4x16xf32> to vector<4x16xf32>
    %cst_15 = arith.constant dense<0.000000e+00> : vector<64x16xf32>
    %13 = tpu.matmul %10, %12, %cst_15 {dimension_numbers = #tpu.dot_dimension_numbers<[1], [0], [0], [1], [0, 0, 1, 1], [], []>} : vector<64x4xf32>, vector<4x16xf32>, vector<64x16xf32> -> vector<64x16xf32>
    %14 = arith.addf %6, %13 : vector<64x16xf32>
    %c1 = arith.constant 1 : index
    %c0_16 = arith.constant 0 : index
    %c0_17 = arith.constant 0 : index
    %15 = vector.load %arg4[%c1, %c0_16, %c0_17] : memref<9x4x16xf32, #tpu.memory_space<vmem>>, vector<1x4x16xf32>
    %16 = vector.shape_cast %15 : vector<1x4x16xf32> to vector<4x16xf32>
    %cst_18 = arith.constant dense<0.000000e+00> : vector<64x16xf32>
    %17 = tpu.matmul %10, %16, %cst_18 {dimension_numbers = #tpu.dot_dimension_numbers<[1], [0], [0], [1], [0, 0, 1, 1], [], []>} : vector<64x4xf32>, vector<4x16xf32>, vector<64x16xf32> -> vector<64x16xf32>
    %18 = arith.addf %7, %17 : vector<64x16xf32>
    %c2 = arith.constant 2 : index
    %c0_19 = arith.constant 0 : index
    %c0_20 = arith.constant 0 : index
    %19 = vector.load %arg4[%c2, %c0_19, %c0_20] : memref<9x4x16xf32, #tpu.memory_space<vmem>>, vector<1x4x16xf32>
    %20 = vector.shape_cast %19 : vector<1x4x16xf32> to vector<4x16xf32>
    %cst_21 = arith.constant dense<0.000000e+00> : vector<64x16xf32>
    %21 = tpu.matmul %10, %20, %cst_21 {dimension_numbers = #tpu.dot_dimension_numbers<[1], [0], [0], [1], [0, 0, 1, 1], [], []>} : vector<64x4xf32>, vector<4x16xf32>, vector<64x16xf32> -> vector<64x16xf32>
    %22 = arith.addf %8, %21 : vector<64x16xf32>
    %c0_22 = arith.constant 0 : index
    %c16 = arith.constant 16 : index
    %c0_23 = arith.constant 0 : index
    %23 = vector.load %arg1[%c0_22, %c16, %c0_23] : memref<1x96x4xf32, #tpu.memory_space<vmem>>, vector<1x64x4xf32>
    %24 = vector.shape_cast %23 : vector<1x64x4xf32> to vector<64x4xf32>
    %c3 = arith.constant 3 : index
    %c0_24 = arith.constant 0 : index
    %c0_25 = arith.constant 0 : index
    %25 = vector.load %arg4[%c3, %c0_24, %c0_25] : memref<9x4x16xf32, #tpu.memory_space<vmem>>, vector<1x4x16xf32>
    %26 = vector.shape_cast %25 : vector<1x4x16xf32> to vector<4x16xf32>
    %cst_26 = arith.constant dense<0.000000e+00> : vector<64x16xf32>
    %27 = tpu.matmul %24, %26, %cst_26 {dimension_numbers = #tpu.dot_dimension_numbers<[1], [0], [0], [1], [0, 0, 1, 1], [], []>} : vector<64x4xf32>, vector<4x16xf32>, vector<64x16xf32> -> vector<64x16xf32>
    %28 = arith.addf %14, %27 : vector<64x16xf32>
    %c4 = arith.constant 4 : index
    %c0_27 = arith.constant 0 : index
    %c0_28 = arith.constant 0 : index
    %29 = vector.load %arg4[%c4, %c0_27, %c0_28] : memref<9x4x16xf32, #tpu.memory_space<vmem>>, vector<1x4x16xf32>
    %30 = vector.shape_cast %29 : vector<1x4x16xf32> to vector<4x16xf32>
    %cst_29 = arith.constant dense<0.000000e+00> : vector<64x16xf32>
    %31 = tpu.matmul %24, %30, %cst_29 {dimension_numbers = #tpu.dot_dimension_numbers<[1], [0], [0], [1], [0, 0, 1, 1], [], []>} : vector<64x4xf32>, vector<4x16xf32>, vector<64x16xf32> -> vector<64x16xf32>
    %32 = arith.addf %18, %31 : vector<64x16xf32>
    %c5 = arith.constant 5 : index
    %c0_30 = arith.constant 0 : index
    %c0_31 = arith.constant 0 : index
    %33 = vector.load %arg4[%c5, %c0_30, %c0_31] : memref<9x4x16xf32, #tpu.memory_space<vmem>>, vector<1x4x16xf32>
    %34 = vector.shape_cast %33 : vector<1x4x16xf32> to vector<4x16xf32>
    %cst_32 = arith.constant dense<0.000000e+00> : vector<64x16xf32>
    %35 = tpu.matmul %24, %34, %cst_32 {dimension_numbers = #tpu.dot_dimension_numbers<[1], [0], [0], [1], [0, 0, 1, 1], [], []>} : vector<64x4xf32>, vector<4x16xf32>, vector<64x16xf32> -> vector<64x16xf32>
    %36 = arith.addf %22, %35 : vector<64x16xf32>
    %c0_33 = arith.constant 0 : index
    %c24 = arith.constant 24 : index
    %c0_34 = arith.constant 0 : index
    %37 = vector.load %arg1[%c0_33, %c24, %c0_34] : memref<1x96x4xf32, #tpu.memory_space<vmem>>, vector<1x64x4xf32>
    %38 = vector.shape_cast %37 : vector<1x64x4xf32> to vector<64x4xf32>
    %c6 = arith.constant 6 : index
    %c0_35 = arith.constant 0 : index
    %c0_36 = arith.constant 0 : index
    %39 = vector.load %arg4[%c6, %c0_35, %c0_36] : memref<9x4x16xf32, #tpu.memory_space<vmem>>, vector<1x4x16xf32>
    %40 = vector.shape_cast %39 : vector<1x4x16xf32> to vector<4x16xf32>
    %cst_37 = arith.constant dense<0.000000e+00> : vector<64x16xf32>
    %41 = tpu.matmul %38, %40, %cst_37 {dimension_numbers = #tpu.dot_dimension_numbers<[1], [0], [0], [1], [0, 0, 1, 1], [], []>} : vector<64x4xf32>, vector<4x16xf32>, vector<64x16xf32> -> vector<64x16xf32>
    %42 = arith.addf %28, %41 : vector<64x16xf32>
    %c7 = arith.constant 7 : index
    %c0_38 = arith.constant 0 : index
    %c0_39 = arith.constant 0 : index
    %43 = vector.load %arg4[%c7, %c0_38, %c0_39] : memref<9x4x16xf32, #tpu.memory_space<vmem>>, vector<1x4x16xf32>
    %44 = vector.shape_cast %43 : vector<1x4x16xf32> to vector<4x16xf32>
    %cst_40 = arith.constant dense<0.000000e+00> : vector<64x16xf32>
    %45 = tpu.matmul %38, %44, %cst_40 {dimension_numbers = #tpu.dot_dimension_numbers<[1], [0], [0], [1], [0, 0, 1, 1], [], []>} : vector<64x4xf32>, vector<4x16xf32>, vector<64x16xf32> -> vector<64x16xf32>
    %46 = arith.addf %32, %45 : vector<64x16xf32>
    %c8_41 = arith.constant 8 : index
    %c0_42 = arith.constant 0 : index
    %c0_43 = arith.constant 0 : index
    %47 = vector.load %arg4[%c8_41, %c0_42, %c0_43] : memref<9x4x16xf32, #tpu.memory_space<vmem>>, vector<1x4x16xf32>
    %48 = vector.shape_cast %47 : vector<1x4x16xf32> to vector<4x16xf32>
    %cst_44 = arith.constant dense<0.000000e+00> : vector<64x16xf32>
    %49 = tpu.matmul %38, %48, %cst_44 {dimension_numbers = #tpu.dot_dimension_numbers<[1], [0], [0], [1], [0, 0, 1, 1], [], []>} : vector<64x4xf32>, vector<4x16xf32>, vector<64x16xf32> -> vector<64x16xf32>
    %50 = arith.addf %36, %49 : vector<64x16xf32>
    %c1_i32 = arith.constant 1 : i32
    %51 = tpu.dynamic_rotate %42 by %c1_i32 dim 0 : vector<64x16xf32>, i32 -> vector<64x16xf32>
    %52 = vector.broadcast %0 : vector<64x1xf32> to vector<64x16xf32>
    %53 = arith.mulf %51, %52 : vector<64x16xf32>
    %c63_i32 = arith.constant 63 : i32
    %54 = tpu.dynamic_rotate %50 by %c63_i32 dim 0 : vector<64x16xf32>, i32 -> vector<64x16xf32>
    %55 = vector.broadcast %1 : vector<64x1xf32> to vector<64x16xf32>
    %56 = arith.mulf %54, %55 : vector<64x16xf32>
    %57 = arith.addf %46, %53 : vector<64x16xf32>
    %58 = arith.addf %57, %56 : vector<64x16xf32>
    %c0_45 = arith.constant 0 : index
    %c0_46 = arith.constant 0 : index
    %59 = vector.load %arg5[%c0_45, %c0_46] : memref<1x16xf32, #tpu.memory_space<vmem>>, vector<1x16xf32>
    %60 = vector.broadcast %59 : vector<1x16xf32> to vector<64x16xf32>
    %61 = arith.addf %58, %60 : vector<64x16xf32>
    %cst_47 = arith.constant 0.000000e+00 : f32
    %62 = vector.broadcast %cst_47 : f32 to vector<64x16xf32>
    %63 = arith.cmpf ogt, %61, %62 : vector<64x16xf32>
    %cst_48 = arith.constant 0.000000e+00 : f32
    %64 = vector.broadcast %cst_48 : f32 to vector<64x16xf32>
    %65 = arith.minimumf %61, %64 : vector<64x16xf32>
    %66 = math.exp %65 : vector<64x16xf32>
    %cst_49 = arith.constant 1.000000e+00 : f32
    %67 = vector.broadcast %cst_49 : f32 to vector<64x16xf32>
    %68 = arith.subf %66, %67 : vector<64x16xf32>
    %69 = arith.select %63, %61, %68 : vector<64x16xi1>, vector<64x16xf32>
    %cst_50 = arith.constant dense<0.000000e+00> : vector<16xf32>
    %70 = vector.multi_reduction <add>, %69, %cst_50 [0] : vector<64x16xf32> to vector<16xf32>
    %71 = vector.shape_cast %70 : vector<16xf32> to vector<1x16xf32>
    %72 = arith.mulf %69, %69 : vector<64x16xf32>
    %cst_51 = arith.constant dense<0.000000e+00> : vector<16xf32>
    %73 = vector.multi_reduction <add>, %72, %cst_51 [0] : vector<64x16xf32> to vector<16xf32>
    %74 = vector.shape_cast %73 : vector<16xf32> to vector<1x16xf32>
    %c0_52 = arith.constant 0 : index
    %c0_53 = arith.constant 0 : index
    %75 = vector.load %arg17[%c0_52, %c0_53] : memref<16x8xf32, #tpu.memory_space<vmem>>, vector<16x8xf32>
    %cst_54 = arith.constant dense<0.000000e+00> : vector<1x8xf32>
    %76 = tpu.matmul %71, %75, %cst_54 {dimension_numbers = #tpu.dot_dimension_numbers<[1], [0], [0], [1], [0, 0, 1, 1], [], []>} : vector<1x16xf32>, vector<16x8xf32>, vector<1x8xf32> -> vector<1x8xf32>
    %cst_55 = arith.constant 1.280000e+02 : f32
    %77 = vector.broadcast %cst_55 : f32 to vector<1x8xf32>
    %78 = arith.divf %76, %77 : vector<1x8xf32>
    %c0_56 = arith.constant 0 : index
    %c0_57 = arith.constant 0 : index
    %79 = vector.load %arg17[%c0_56, %c0_57] : memref<16x8xf32, #tpu.memory_space<vmem>>, vector<16x8xf32>
    %cst_58 = arith.constant dense<0.000000e+00> : vector<1x8xf32>
    %80 = tpu.matmul %74, %79, %cst_58 {dimension_numbers = #tpu.dot_dimension_numbers<[1], [0], [0], [1], [0, 0, 1, 1], [], []>} : vector<1x16xf32>, vector<16x8xf32>, vector<1x8xf32> -> vector<1x8xf32>
    %cst_59 = arith.constant 1.280000e+02 : f32
    %81 = vector.broadcast %cst_59 : f32 to vector<1x8xf32>
    %82 = arith.divf %80, %81 : vector<1x8xf32>
    %83 = arith.mulf %78, %78 : vector<1x8xf32>
    %84 = arith.subf %82, %83 : vector<1x8xf32>
    %cst_60 = arith.constant 0.000000e+00 : f32
    %85 = vector.broadcast %cst_60 : f32 to vector<1x8xf32>
    %86 = arith.maximumf %84, %85 : vector<1x8xf32>
    %c0_61 = arith.constant 0 : index
    %c0_62 = arith.constant 0 : index
    %87 = vector.load %arg18[%c0_61, %c0_62] : memref<8x16xf32, #tpu.memory_space<vmem>>, vector<8x16xf32>
    %cst_63 = arith.constant dense<0.000000e+00> : vector<1x16xf32>
    %88 = tpu.matmul %78, %87, %cst_63 {dimension_numbers = #tpu.dot_dimension_numbers<[1], [0], [0], [1], [0, 0, 1, 1], [], []>} : vector<1x8xf32>, vector<8x16xf32>, vector<1x16xf32> -> vector<1x16xf32>
    %c0_64 = arith.constant 0 : index
    %c0_65 = arith.constant 0 : index
    %89 = vector.load %arg18[%c0_64, %c0_65] : memref<8x16xf32, #tpu.memory_space<vmem>>, vector<8x16xf32>
    %cst_66 = arith.constant dense<0.000000e+00> : vector<1x16xf32>
    %90 = tpu.matmul %86, %89, %cst_66 {dimension_numbers = #tpu.dot_dimension_numbers<[1], [0], [0], [1], [0, 0, 1, 1], [], []>} : vector<1x8xf32>, vector<8x16xf32>, vector<1x16xf32> -> vector<1x16xf32>
    %cst_67 = arith.constant 9.99999974E-6 : f32
    %91 = vector.broadcast %cst_67 : f32 to vector<1x16xf32>
    %92 = arith.addf %90, %91 : vector<1x16xf32>
    %93 = math.rsqrt %92 : vector<1x16xf32>
    %c0_68 = arith.constant 0 : index
    %c0_69 = arith.constant 0 : index
    %94 = vector.load %arg6[%c0_68, %c0_69] : memref<1x16xf32, #tpu.memory_space<vmem>>, vector<1x16xf32>
    %95 = arith.mulf %93, %94 : vector<1x16xf32>
    %c0_70 = arith.constant 0 : index
    %c0_71 = arith.constant 0 : index
    %96 = vector.load %arg7[%c0_70, %c0_71] : memref<1x16xf32, #tpu.memory_space<vmem>>, vector<1x16xf32>
    %97 = arith.mulf %88, %95 : vector<1x16xf32>
    %98 = arith.subf %96, %97 : vector<1x16xf32>
    %99 = vector.broadcast %95 : vector<1x16xf32> to vector<64x16xf32>
    %100 = arith.mulf %69, %99 : vector<64x16xf32>
    %101 = vector.broadcast %98 : vector<1x16xf32> to vector<64x16xf32>
    %102 = arith.addf %100, %101 : vector<64x16xf32>
    %c16_72 = arith.constant 16 : index
    %c0_73 = arith.constant 0 : index
    %103 = vector.load %arg20[%c16_72, %c0_73] : memref<96x16xf32, #tpu.memory_space<vmem>>, vector<64x16xf32>
    tpu.vector_store %arg20[%c16_72, %c0_73], %102 {strides = array<i32>} : memref<96x16xf32, #tpu.memory_space<vmem>>, vector<64x16xf32>,
    %cst_74 = arith.constant 0.000000e+00 : f32
    %104 = vector.broadcast %cst_74 : f32 to vector<64x16xf32>
    %cst_75 = arith.constant 0.000000e+00 : f32
    %105 = vector.broadcast %cst_75 : f32 to vector<64x16xf32>
    %cst_76 = arith.constant 0.000000e+00 : f32
    %106 = vector.broadcast %cst_76 : f32 to vector<64x16xf32>
    %c0_77 = arith.constant 0 : index
    %c8_78 = arith.constant 8 : index
    %c0_79 = arith.constant 0 : index
    %107 = vector.load %arg1[%c0_77, %c8_78, %c0_79] : memref<1x96x4xf32, #tpu.memory_space<vmem>>, vector<1x64x4xf32>
    %108 = vector.shape_cast %107 : vector<1x64x4xf32> to vector<64x4xf32>
    %c0_80 = arith.constant 0 : index
    %c0_81 = arith.constant 0 : index
    %c0_82 = arith.constant 0 : index
    %109 = vector.load %arg8[%c0_80, %c0_81, %c0_82] : memref<9x4x16xf32, #tpu.memory_space<vmem>>, vector<1x4x16xf32>
    %110 = vector.shape_cast %109 : vector<1x4x16xf32> to vector<4x16xf32>
    %cst_83 = arith.constant dense<0.000000e+00> : vector<64x16xf32>
    %111 = tpu.matmul %108, %110, %cst_83 {dimension_numbers = #tpu.dot_dimension_numbers<[1], [0], [0], [1], [0, 0, 1, 1], [], []>} : vector<64x4xf32>, vector<4x16xf32>, vector<64x16xf32> -> vector<64x16xf32>
    %112 = arith.addf %104, %111 : vector<64x16xf32>
    %c1_84 = arith.constant 1 : index
    %c0_85 = arith.constant 0 : index
    %c0_86 = arith.constant 0 : index
    %113 = vector.load %arg8[%c1_84, %c0_85, %c0_86] : memref<9x4x16xf32, #tpu.memory_space<vmem>>, vector<1x4x16xf32>
    %114 = vector.shape_cast %113 : vector<1x4x16xf32> to vector<4x16xf32>
    %cst_87 = arith.constant dense<0.000000e+00> : vector<64x16xf32>
    %115 = tpu.matmul %108, %114, %cst_87 {dimension_numbers = #tpu.dot_dimension_numbers<[1], [0], [0], [1], [0, 0, 1, 1], [], []>} : vector<64x4xf32>, vector<4x16xf32>, vector<64x16xf32> -> vector<64x16xf32>
    %116 = arith.addf %105, %115 : vector<64x16xf32>
    %c2_88 = arith.constant 2 : index
    %c0_89 = arith.constant 0 : index
    %c0_90 = arith.constant 0 : index
    %117 = vector.load %arg8[%c2_88, %c0_89, %c0_90] : memref<9x4x16xf32, #tpu.memory_space<vmem>>, vector<1x4x16xf32>
    %118 = vector.shape_cast %117 : vector<1x4x16xf32> to vector<4x16xf32>
    %cst_91 = arith.constant dense<0.000000e+00> : vector<64x16xf32>
    %119 = tpu.matmul %108, %118, %cst_91 {dimension_numbers = #tpu.dot_dimension_numbers<[1], [0], [0], [1], [0, 0, 1, 1], [], []>} : vector<64x4xf32>, vector<4x16xf32>, vector<64x16xf32> -> vector<64x16xf32>
    %120 = arith.addf %106, %119 : vector<64x16xf32>
    %c0_92 = arith.constant 0 : index
    %c16_93 = arith.constant 16 : index
    %c0_94 = arith.constant 0 : index
    %121 = vector.load %arg1[%c0_92, %c16_93, %c0_94] : memref<1x96x4xf32, #tpu.memory_space<vmem>>, vector<1x64x4xf32>
    %122 = vector.shape_cast %121 : vector<1x64x4xf32> to vector<64x4xf32>
    %c3_95 = arith.constant 3 : index
    %c0_96 = arith.constant 0 : index
    %c0_97 = arith.constant 0 : index
    %123 = vector.load %arg8[%c3_95, %c0_96, %c0_97] : memref<9x4x16xf32, #tpu.memory_space<vmem>>, vector<1x4x16xf32>
    %124 = vector.shape_cast %123 : vector<1x4x16xf32> to vector<4x16xf32>
    %cst_98 = arith.constant dense<0.000000e+00> : vector<64x16xf32>
    %125 = tpu.matmul %122, %124, %cst_98 {dimension_numbers = #tpu.dot_dimension_numbers<[1], [0], [0], [1], [0, 0, 1, 1], [], []>} : vector<64x4xf32>, vector<4x16xf32>, vector<64x16xf32> -> vector<64x16xf32>
    %126 = arith.addf %112, %125 : vector<64x16xf32>
    %c4_99 = arith.constant 4 : index
    %c0_100 = arith.constant 0 : index
    %c0_101 = arith.constant 0 : index
    %127 = vector.load %arg8[%c4_99, %c0_100, %c0_101] : memref<9x4x16xf32, #tpu.memory_space<vmem>>, vector<1x4x16xf32>
    %128 = vector.shape_cast %127 : vector<1x4x16xf32> to vector<4x16xf32>
    %cst_102 = arith.constant dense<0.000000e+00> : vector<64x16xf32>
    %129 = tpu.matmul %122, %128, %cst_102 {dimension_numbers = #tpu.dot_dimension_numbers<[1], [0], [0], [1], [0, 0, 1, 1], [], []>} : vector<64x4xf32>, vector<4x16xf32>, vector<64x16xf32> -> vector<64x16xf32>
    %130 = arith.addf %116, %129 : vector<64x16xf32>
    %c5_103 = arith.constant 5 : index
    %c0_104 = arith.constant 0 : index
    %c0_105 = arith.constant 0 : index
    %131 = vector.load %arg8[%c5_103, %c0_104, %c0_105] : memref<9x4x16xf32, #tpu.memory_space<vmem>>, vector<1x4x16xf32>
    %132 = vector.shape_cast %131 : vector<1x4x16xf32> to vector<4x16xf32>
    %cst_106 = arith.constant dense<0.000000e+00> : vector<64x16xf32>
    %133 = tpu.matmul %122, %132, %cst_106 {dimension_numbers = #tpu.dot_dimension_numbers<[1], [0], [0], [1], [0, 0, 1, 1], [], []>} : vector<64x4xf32>, vector<4x16xf32>, vector<64x16xf32> -> vector<64x16xf32>
    %134 = arith.addf %120, %133 : vector<64x16xf32>
    %c0_107 = arith.constant 0 : index
    %c24_108 = arith.constant 24 : index
    %c0_109 = arith.constant 0 : index
    %135 = vector.load %arg1[%c0_107, %c24_108, %c0_109] : memref<1x96x4xf32, #tpu.memory_space<vmem>>, vector<1x64x4xf32>
    %136 = vector.shape_cast %135 : vector<1x64x4xf32> to vector<64x4xf32>
    %c6_110 = arith.constant 6 : index
    %c0_111 = arith.constant 0 : index
    %c0_112 = arith.constant 0 : index
    %137 = vector.load %arg8[%c6_110, %c0_111, %c0_112] : memref<9x4x16xf32, #tpu.memory_space<vmem>>, vector<1x4x16xf32>
    %138 = vector.shape_cast %137 : vector<1x4x16xf32> to vector<4x16xf32>
    %cst_113 = arith.constant dense<0.000000e+00> : vector<64x16xf32>
    %139 = tpu.matmul %136, %138, %cst_113 {dimension_numbers = #tpu.dot_dimension_numbers<[1], [0], [0], [1], [0, 0, 1, 1], [], []>} : vector<64x4xf32>, vector<4x16xf32>, vector<64x16xf32> -> vector<64x16xf32>
    %140 = arith.addf %126, %139 : vector<64x16xf32>
    %c7_114 = arith.constant 7 : index
    %c0_115 = arith.constant 0 : index
    %c0_116 = arith.constant 0 : index
    %141 = vector.load %arg8[%c7_114, %c0_115, %c0_116] : memref<9x4x16xf32, #tpu.memory_space<vmem>>, vector<1x4x16xf32>
    %142 = vector.shape_cast %141 : vector<1x4x16xf32> to vector<4x16xf32>
    %cst_117 = arith.constant dense<0.000000e+00> : vector<64x16xf32>
    %143 = tpu.matmul %136, %142, %cst_117 {dimension_numbers = #tpu.dot_dimension_numbers<[1], [0], [0], [1], [0, 0, 1, 1], [], []>} : vector<64x4xf32>, vector<4x16xf32>, vector<64x16xf32> -> vector<64x16xf32>
    %144 = arith.addf %130, %143 : vector<64x16xf32>
    %c8_118 = arith.constant 8 : index
    %c0_119 = arith.constant 0 : index
    %c0_120 = arith.constant 0 : index
    %145 = vector.load %arg8[%c8_118, %c0_119, %c0_120] : memref<9x4x16xf32, #tpu.memory_space<vmem>>, vector<1x4x16xf32>
    %146 = vector.shape_cast %145 : vector<1x4x16xf32> to vector<4x16xf32>
    %cst_121 = arith.constant dense<0.000000e+00> : vector<64x16xf32>
    %147 = tpu.matmul %136, %146, %cst_121 {dimension_numbers = #tpu.dot_dimension_numbers<[1], [0], [0], [1], [0, 0, 1, 1], [], []>} : vector<64x4xf32>, vector<4x16xf32>, vector<64x16xf32> -> vector<64x16xf32>
    %148 = arith.addf %134, %147 : vector<64x16xf32>
    %c8_122 = arith.constant 8 : index
    %c0_123 = arith.constant 0 : index
    %149 = vector.load %arg20[%c8_122, %c0_123] : memref<96x16xf32, #tpu.memory_space<vmem>>, vector<64x16xf32>
    %c0_124 = arith.constant 0 : index
    %c0_125 = arith.constant 0 : index
    %c0_126 = arith.constant 0 : index
    %150 = vector.load %arg9[%c0_124, %c0_125, %c0_126] : memref<9x16x16xf32, #tpu.memory_space<vmem>>, vector<1x16x16xf32>
    %151 = vector.shape_cast %150 : vector<1x16x16xf32> to vector<16x16xf32>
    %cst_127 = arith.constant dense<0.000000e+00> : vector<64x16xf32>
    %152 = tpu.matmul %149, %151, %cst_127 {dimension_numbers = #tpu.dot_dimension_numbers<[1], [0], [0], [1], [0, 0, 1, 1], [], []>} : vector<64x16xf32>, vector<16x16xf32>, vector<64x16xf32> -> vector<64x16xf32>
    %153 = arith.addf %140, %152 : vector<64x16xf32>
    %c1_128 = arith.constant 1 : index
    %c0_129 = arith.constant 0 : index
    %c0_130 = arith.constant 0 : index
    %154 = vector.load %arg9[%c1_128, %c0_129, %c0_130] : memref<9x16x16xf32, #tpu.memory_space<vmem>>, vector<1x16x16xf32>
    %155 = vector.shape_cast %154 : vector<1x16x16xf32> to vector<16x16xf32>
    %cst_131 = arith.constant dense<0.000000e+00> : vector<64x16xf32>
    %156 = tpu.matmul %149, %155, %cst_131 {dimension_numbers = #tpu.dot_dimension_numbers<[1], [0], [0], [1], [0, 0, 1, 1], [], []>} : vector<64x16xf32>, vector<16x16xf32>, vector<64x16xf32> -> vector<64x16xf32>
    %157 = arith.addf %144, %156 : vector<64x16xf32>
    %c2_132 = arith.constant 2 : index
    %c0_133 = arith.constant 0 : index
    %c0_134 = arith.constant 0 : index
    %158 = vector.load %arg9[%c2_132, %c0_133, %c0_134] : memref<9x16x16xf32, #tpu.memory_space<vmem>>, vector<1x16x16xf32>
    %159 = vector.shape_cast %158 : vector<1x16x16xf32> to vector<16x16xf32>
    %cst_135 = arith.constant dense<0.000000e+00> : vector<64x16xf32>
    %160 = tpu.matmul %149, %159, %cst_135 {dimension_numbers = #tpu.dot_dimension_numbers<[1], [0], [0], [1], [0, 0, 1, 1], [], []>} : vector<64x16xf32>, vector<16x16xf32>, vector<64x16xf32> -> vector<64x16xf32>
    %161 = arith.addf %148, %160 : vector<64x16xf32>
    %c16_136 = arith.constant 16 : index
    %c0_137 = arith.constant 0 : index
    %162 = vector.load %arg20[%c16_136, %c0_137] : memref<96x16xf32, #tpu.memory_space<vmem>>, vector<64x16xf32>
    %c3_138 = arith.constant 3 : index
    %c0_139 = arith.constant 0 : index
    %c0_140 = arith.constant 0 : index
    %163 = vector.load %arg9[%c3_138, %c0_139, %c0_140] : memref<9x16x16xf32, #tpu.memory_space<vmem>>, vector<1x16x16xf32>
    %164 = vector.shape_cast %163 : vector<1x16x16xf32> to vector<16x16xf32>
    %cst_141 = arith.constant dense<0.000000e+00> : vector<64x16xf32>
    %165 = tpu.matmul %162, %164, %cst_141 {dimension_numbers = #tpu.dot_dimension_numbers<[1], [0], [0], [1], [0, 0, 1, 1], [], []>} : vector<64x16xf32>, vector<16x16xf32>, vector<64x16xf32> -> vector<64x16xf32>
    %166 = arith.addf %153, %165 : vector<64x16xf32>
    %c4_142 = arith.constant 4 : index
    %c0_143 = arith.constant 0 : index
    %c0_144 = arith.constant 0 : index
    %167 = vector.load %arg9[%c4_142, %c0_143, %c0_144] : memref<9x16x16xf32, #tpu.memory_space<vmem>>, vector<1x16x16xf32>
    %168 = vector.shape_cast %167 : vector<1x16x16xf32> to vector<16x16xf32>
    %cst_145 = arith.constant dense<0.000000e+00> : vector<64x16xf32>
    %169 = tpu.matmul %162, %168, %cst_145 {dimension_numbers = #tpu.dot_dimension_numbers<[1], [0], [0], [1], [0, 0, 1, 1], [], []>} : vector<64x16xf32>, vector<16x16xf32>, vector<64x16xf32> -> vector<64x16xf32>
    %170 = arith.addf %157, %169 : vector<64x16xf32>
    %c5_146 = arith.constant 5 : index
    %c0_147 = arith.constant 0 : index
    %c0_148 = arith.constant 0 : index
    %171 = vector.load %arg9[%c5_146, %c0_147, %c0_148] : memref<9x16x16xf32, #tpu.memory_space<vmem>>, vector<1x16x16xf32>
    %172 = vector.shape_cast %171 : vector<1x16x16xf32> to vector<16x16xf32>
    %cst_149 = arith.constant dense<0.000000e+00> : vector<64x16xf32>
    %173 = tpu.matmul %162, %172, %cst_149 {dimension_numbers = #tpu.dot_dimension_numbers<[1], [0], [0], [1], [0, 0, 1, 1], [], []>} : vector<64x16xf32>, vector<16x16xf32>, vector<64x16xf32> -> vector<64x16xf32>
    %174 = arith.addf %161, %173 : vector<64x16xf32>
    %c24_150 = arith.constant 24 : index
    %c0_151 = arith.constant 0 : index
    %175 = vector.load %arg20[%c24_150, %c0_151] : memref<96x16xf32, #tpu.memory_space<vmem>>, vector<64x16xf32>
    %c6_152 = arith.constant 6 : index
    %c0_153 = arith.constant 0 : index
    %c0_154 = arith.constant 0 : index
    %176 = vector.load %arg9[%c6_152, %c0_153, %c0_154] : memref<9x16x16xf32, #tpu.memory_space<vmem>>, vector<1x16x16xf32>
    %177 = vector.shape_cast %176 : vector<1x16x16xf32> to vector<16x16xf32>
    %cst_155 = arith.constant dense<0.000000e+00> : vector<64x16xf32>
    %178 = tpu.matmul %175, %177, %cst_155 {dimension_numbers = #tpu.dot_dimension_numbers<[1], [0], [0], [1], [0, 0, 1, 1], [], []>} : vector<64x16xf32>, vector<16x16xf32>, vector<64x16xf32> -> vector<64x16xf32>
    %179 = arith.addf %166, %178 : vector<64x16xf32>
    %c7_156 = arith.constant 7 : index
    %c0_157 = arith.constant 0 : index
    %c0_158 = arith.constant 0 : index
    %180 = vector.load %arg9[%c7_156, %c0_157, %c0_158] : memref<9x16x16xf32, #tpu.memory_space<vmem>>, vector<1x16x16xf32>
    %181 = vector.shape_cast %180 : vector<1x16x16xf32> to vector<16x16xf32>
    %cst_159 = arith.constant dense<0.000000e+00> : vector<64x16xf32>
    %182 = tpu.matmul %175, %181, %cst_159 {dimension_numbers = #tpu.dot_dimension_numbers<[1], [0], [0], [1], [0, 0, 1, 1], [], []>} : vector<64x16xf32>, vector<16x16xf32>, vector<64x16xf32> -> vector<64x16xf32>
    %183 = arith.addf %170, %182 : vector<64x16xf32>
    %c8_160 = arith.constant 8 : index
    %c0_161 = arith.constant 0 : index
    %c0_162 = arith.constant 0 : index
    %184 = vector.load %arg9[%c8_160, %c0_161, %c0_162] : memref<9x16x16xf32, #tpu.memory_space<vmem>>, vector<1x16x16xf32>
    %185 = vector.shape_cast %184 : vector<1x16x16xf32> to vector<16x16xf32>
    %cst_163 = arith.constant dense<0.000000e+00> : vector<64x16xf32>
    %186 = tpu.matmul %175, %185, %cst_163 {dimension_numbers = #tpu.dot_dimension_numbers<[1], [0], [0], [1], [0, 0, 1, 1], [], []>} : vector<64x16xf32>, vector<16x16xf32>, vector<64x16xf32> -> vector<64x16xf32>
    %187 = arith.addf %174, %186 : vector<64x16xf32>
    %c1_i32_164 = arith.constant 1 : i32
    %188 = tpu.dynamic_rotate %179 by %c1_i32_164 dim 0 : vector<64x16xf32>, i32 -> vector<64x16xf32>
    %189 = vector.broadcast %0 : vector<64x1xf32> to vector<64x16xf32>
    %190 = arith.mulf %188, %189 : vector<64x16xf32>
    %c63_i32_165 = arith.constant 63 : i32
    %191 = tpu.dynamic_rotate %187 by %c63_i32_165 dim 0 : vector<64x16xf32>, i32 -> vector<64x16xf32>
    %192 = vector.broadcast %1 : vector<64x1xf32> to vector<64x16xf32>
    %193 = arith.mulf %191, %192 : vector<64x16xf32>
    %194 = arith.addf %183, %190 : vector<64x16xf32>
    %195 = arith.addf %194, %193 : vector<64x16xf32>
    %c0_166 = arith.constant 0 : index
    %c0_167 = arith.constant 0 : index
    %196 = vector.load %arg10[%c0_166, %c0_167] : memref<1x16xf32, #tpu.memory_space<vmem>>, vector<1x16xf32>
    %197 = vector.broadcast %196 : vector<1x16xf32> to vector<64x16xf32>
    %198 = arith.addf %195, %197 : vector<64x16xf32>
    %cst_168 = arith.constant 0.000000e+00 : f32
    %199 = vector.broadcast %cst_168 : f32 to vector<64x16xf32>
    %200 = arith.cmpf ogt, %198, %199 : vector<64x16xf32>
    %cst_169 = arith.constant 0.000000e+00 : f32
    %201 = vector.broadcast %cst_169 : f32 to vector<64x16xf32>
    %202 = arith.minimumf %198, %201 : vector<64x16xf32>
    %203 = math.exp %202 : vector<64x16xf32>
    %cst_170 = arith.constant 1.000000e+00 : f32
    %204 = vector.broadcast %cst_170 : f32 to vector<64x16xf32>
    %205 = arith.subf %203, %204 : vector<64x16xf32>
    %206 = arith.select %200, %198, %205 : vector<64x16xi1>, vector<64x16xf32>
    %cst_171 = arith.constant dense<0.000000e+00> : vector<16xf32>
    %207 = vector.multi_reduction <add>, %206, %cst_171 [0] : vector<64x16xf32> to vector<16xf32>
    %208 = vector.shape_cast %207 : vector<16xf32> to vector<1x16xf32>
    %209 = arith.mulf %206, %206 : vector<64x16xf32>
    %cst_172 = arith.constant dense<0.000000e+00> : vector<16xf32>
    %210 = vector.multi_reduction <add>, %209, %cst_172 [0] : vector<64x16xf32> to vector<16xf32>
    %211 = vector.shape_cast %210 : vector<16xf32> to vector<1x16xf32>
    %c0_173 = arith.constant 0 : index
    %c0_174 = arith.constant 0 : index
    %212 = vector.load %arg17[%c0_173, %c0_174] : memref<16x8xf32, #tpu.memory_space<vmem>>, vector<16x8xf32>
    %cst_175 = arith.constant dense<0.000000e+00> : vector<1x8xf32>
    %213 = tpu.matmul %208, %212, %cst_175 {dimension_numbers = #tpu.dot_dimension_numbers<[1], [0], [0], [1], [0, 0, 1, 1], [], []>} : vector<1x16xf32>, vector<16x8xf32>, vector<1x8xf32> -> vector<1x8xf32>
    %cst_176 = arith.constant 1.280000e+02 : f32
    %214 = vector.broadcast %cst_176 : f32 to vector<1x8xf32>
    %215 = arith.divf %213, %214 : vector<1x8xf32>
    %c0_177 = arith.constant 0 : index
    %c0_178 = arith.constant 0 : index
    %216 = vector.load %arg17[%c0_177, %c0_178] : memref<16x8xf32, #tpu.memory_space<vmem>>, vector<16x8xf32>
    %cst_179 = arith.constant dense<0.000000e+00> : vector<1x8xf32>
    %217 = tpu.matmul %211, %216, %cst_179 {dimension_numbers = #tpu.dot_dimension_numbers<[1], [0], [0], [1], [0, 0, 1, 1], [], []>} : vector<1x16xf32>, vector<16x8xf32>, vector<1x8xf32> -> vector<1x8xf32>
    %cst_180 = arith.constant 1.280000e+02 : f32
    %218 = vector.broadcast %cst_180 : f32 to vector<1x8xf32>
    %219 = arith.divf %217, %218 : vector<1x8xf32>
    %220 = arith.mulf %215, %215 : vector<1x8xf32>
    %221 = arith.subf %219, %220 : vector<1x8xf32>
    %cst_181 = arith.constant 0.000000e+00 : f32
    %222 = vector.broadcast %cst_181 : f32 to vector<1x8xf32>
    %223 = arith.maximumf %221, %222 : vector<1x8xf32>
    %c0_182 = arith.constant 0 : index
    %c0_183 = arith.constant 0 : index
    %224 = vector.load %arg18[%c0_182, %c0_183] : memref<8x16xf32, #tpu.memory_space<vmem>>, vector<8x16xf32>
    %cst_184 = arith.constant dense<0.000000e+00> : vector<1x16xf32>
    %225 = tpu.matmul %215, %224, %cst_184 {dimension_numbers = #tpu.dot_dimension_numbers<[1], [0], [0], [1], [0, 0, 1, 1], [], []>} : vector<1x8xf32>, vector<8x16xf32>, vector<1x16xf32> -> vector<1x16xf32>
    %c0_185 = arith.constant 0 : index
    %c0_186 = arith.constant 0 : index
    %226 = vector.load %arg18[%c0_185, %c0_186] : memref<8x16xf32, #tpu.memory_space<vmem>>, vector<8x16xf32>
    %cst_187 = arith.constant dense<0.000000e+00> : vector<1x16xf32>
    %227 = tpu.matmul %223, %226, %cst_187 {dimension_numbers = #tpu.dot_dimension_numbers<[1], [0], [0], [1], [0, 0, 1, 1], [], []>} : vector<1x8xf32>, vector<8x16xf32>, vector<1x16xf32> -> vector<1x16xf32>
    %cst_188 = arith.constant 9.99999974E-6 : f32
    %228 = vector.broadcast %cst_188 : f32 to vector<1x16xf32>
    %229 = arith.addf %227, %228 : vector<1x16xf32>
    %230 = math.rsqrt %229 : vector<1x16xf32>
    %c0_189 = arith.constant 0 : index
    %c0_190 = arith.constant 0 : index
    %231 = vector.load %arg11[%c0_189, %c0_190] : memref<1x16xf32, #tpu.memory_space<vmem>>, vector<1x16xf32>
    %232 = arith.mulf %230, %231 : vector<1x16xf32>
    %c0_191 = arith.constant 0 : index
    %c0_192 = arith.constant 0 : index
    %233 = vector.load %arg12[%c0_191, %c0_192] : memref<1x16xf32, #tpu.memory_space<vmem>>, vector<1x16xf32>
    %234 = arith.mulf %225, %232 : vector<1x16xf32>
    %235 = arith.subf %233, %234 : vector<1x16xf32>
    %236 = vector.broadcast %232 : vector<1x16xf32> to vector<64x16xf32>
    %237 = arith.mulf %206, %236 : vector<64x16xf32>
    %238 = vector.broadcast %235 : vector<1x16xf32> to vector<64x16xf32>
    %239 = arith.addf %237, %238 : vector<64x16xf32>
    %c0_193 = arith.constant 0 : index
    %c16_194 = arith.constant 16 : index
    %c0_195 = arith.constant 0 : index
    %240 = vector.load %arg1[%c0_193, %c16_194, %c0_195] : memref<1x96x4xf32, #tpu.memory_space<vmem>>, vector<1x64x4xf32>
    %241 = vector.shape_cast %240 : vector<1x64x4xf32> to vector<64x4xf32>
    %c0_196 = arith.constant 0 : index
    %c0_197 = arith.constant 0 : index
    %242 = vector.load %arg13[%c0_196, %c0_197] : memref<4x8xf32, #tpu.memory_space<vmem>>, vector<4x8xf32>
    %cst_198 = arith.constant dense<0.000000e+00> : vector<64x8xf32>
    %243 = tpu.matmul %241, %242, %cst_198 {dimension_numbers = #tpu.dot_dimension_numbers<[1], [0], [0], [1], [0, 0, 1, 1], [], []>} : vector<64x4xf32>, vector<4x8xf32>, vector<64x8xf32> -> vector<64x8xf32>
    %c0_199 = arith.constant 0 : index
    %c0_200 = arith.constant 0 : index
    %244 = vector.load %arg14[%c0_199, %c0_200] : memref<16x8xf32, #tpu.memory_space<vmem>>, vector<16x8xf32>
    %cst_201 = arith.constant dense<0.000000e+00> : vector<64x8xf32>
    %245 = tpu.matmul %102, %244, %cst_201 {dimension_numbers = #tpu.dot_dimension_numbers<[1], [0], [0], [1], [0, 0, 1, 1], [], []>} : vector<64x16xf32>, vector<16x8xf32>, vector<64x8xf32> -> vector<64x8xf32>
    %246 = arith.addf %243, %245 : vector<64x8xf32>
    %c0_202 = arith.constant 0 : index
    %c0_203 = arith.constant 0 : index
    %247 = vector.load %arg15[%c0_202, %c0_203] : memref<16x8xf32, #tpu.memory_space<vmem>>, vector<16x8xf32>
    %cst_204 = arith.constant dense<0.000000e+00> : vector<64x8xf32>
    %248 = tpu.matmul %239, %247, %cst_204 {dimension_numbers = #tpu.dot_dimension_numbers<[1], [0], [0], [1], [0, 0, 1, 1], [], []>} : vector<64x16xf32>, vector<16x8xf32>, vector<64x8xf32> -> vector<64x8xf32>
    %249 = arith.addf %246, %248 : vector<64x8xf32>
    %c0_205 = arith.constant 0 : index
    %c0_206 = arith.constant 0 : index
    %250 = vector.load %arg16[%c0_205, %c0_206] : memref<1x8xf32, #tpu.memory_space<vmem>>, vector<1x8xf32>
    %251 = vector.broadcast %250 : vector<1x8xf32> to vector<64x8xf32>
    %252 = arith.addf %249, %251 : vector<64x8xf32>
    %c0_207 = arith.constant 0 : index
    %c0_208 = arith.constant 0 : index
    %c0_209 = arith.constant 0 : index
    %253 = vector.load %arg19[%c0_207, %c0_208, %c0_209] : memref<1x64x8xf32, #tpu.memory_space<vmem>>, vector<1x64x8xf32>
    %254 = vector.shape_cast %253 : vector<1x64x8xf32> to vector<64x8xf32>
    %255 = vector.shape_cast %252 : vector<64x8xf32> to vector<1x64x8xf32>
    tpu.vector_store %arg19[%c0_207, %c0_208, %c0_209], %255 {strides = array<i32>} : memref<1x64x8xf32, #tpu.memory_space<vmem>>, vector<1x64x8xf32>,
    return
  }
  func.func @transform_0(%arg0: i32) -> (i32, i32, i32) {
    %c0_i32 = arith.constant 0 : i32
    %c0_i32_0 = arith.constant 0 : i32
    %c0_i32_1 = arith.constant 0 : i32
    return %arg0, %c0_i32, %c0_i32_0 : i32, i32, i32
  }
  func.func @transform_1(%arg0: i32) -> (i32, i32) {
    %c0_i32 = arith.constant 0 : i32
    %c0_i32_0 = arith.constant 0 : i32
    %c0_i32_1 = arith.constant 0 : i32
    return %c0_i32, %c0_i32_0 : i32, i32
  }
  func.func @transform_2(%arg0: i32) -> (i32, i32) {
    %c0_i32 = arith.constant 0 : i32
    %c0_i32_0 = arith.constant 0 : i32
    %c0_i32_1 = arith.constant 0 : i32
    return %c0_i32, %c0_i32_0 : i32, i32
  }
  func.func @transform_3(%arg0: i32) -> (i32, i32, i32) {
    %c0_i32 = arith.constant 0 : i32
    %c0_i32_0 = arith.constant 0 : i32
    %c0_i32_1 = arith.constant 0 : i32
    %c0_i32_2 = arith.constant 0 : i32
    return %c0_i32, %c0_i32_0, %c0_i32_1 : i32, i32, i32
  }
  func.func @transform_4(%arg0: i32) -> (i32, i32) {
    %c0_i32 = arith.constant 0 : i32
    %c0_i32_0 = arith.constant 0 : i32
    %c0_i32_1 = arith.constant 0 : i32
    return %c0_i32, %c0_i32_0 : i32, i32
  }
  func.func @transform_5(%arg0: i32) -> (i32, i32) {
    %c0_i32 = arith.constant 0 : i32
    %c0_i32_0 = arith.constant 0 : i32
    %c0_i32_1 = arith.constant 0 : i32
    return %c0_i32, %c0_i32_0 : i32, i32
  }
  func.func @transform_6(%arg0: i32) -> (i32, i32) {
    %c0_i32 = arith.constant 0 : i32
    %c0_i32_0 = arith.constant 0 : i32
    %c0_i32_1 = arith.constant 0 : i32
    return %c0_i32, %c0_i32_0 : i32, i32
  }
  func.func @transform_7(%arg0: i32) -> (i32, i32, i32) {
    %c0_i32 = arith.constant 0 : i32
    %c0_i32_0 = arith.constant 0 : i32
    %c0_i32_1 = arith.constant 0 : i32
    %c0_i32_2 = arith.constant 0 : i32
    return %c0_i32, %c0_i32_0, %c0_i32_1 : i32, i32, i32
  }
  func.func @transform_8(%arg0: i32) -> (i32, i32, i32) {
    %c0_i32 = arith.constant 0 : i32
    %c0_i32_0 = arith.constant 0 : i32
    %c0_i32_1 = arith.constant 0 : i32
    %c0_i32_2 = arith.constant 0 : i32
    return %c0_i32, %c0_i32_0, %c0_i32_1 : i32, i32, i32
  }
  func.func @transform_9(%arg0: i32) -> (i32, i32) {
    %c0_i32 = arith.constant 0 : i32
    %c0_i32_0 = arith.constant 0 : i32
    %c0_i32_1 = arith.constant 0 : i32
    return %c0_i32, %c0_i32_0 : i32, i32
  }
  func.func @transform_10(%arg0: i32) -> (i32, i32) {
    %c0_i32 = arith.constant 0 : i32
    %c0_i32_0 = arith.constant 0 : i32
    %c0_i32_1 = arith.constant 0 : i32
    return %c0_i32, %c0_i32_0 : i32, i32
  }
  func.func @transform_11(%arg0: i32) -> (i32, i32) {
    %c0_i32 = arith.constant 0 : i32
    %c0_i32_0 = arith.constant 0 : i32
    %c0_i32_1 = arith.constant 0 : i32
    return %c0_i32, %c0_i32_0 : i32, i32
  }
  func.func @transform_12(%arg0: i32) -> (i32, i32) {
    %c0_i32 = arith.constant 0 : i32
    %c0_i32_0 = arith.constant 0 : i32
    %c0_i32_1 = arith.constant 0 : i32
    return %c0_i32, %c0_i32_0 : i32, i32
  }
  func.func @transform_13(%arg0: i32) -> (i32, i32) {
    %c0_i32 = arith.constant 0 : i32
    %c0_i32_0 = arith.constant 0 : i32
    %c0_i32_1 = arith.constant 0 : i32
    return %c0_i32, %c0_i32_0 : i32, i32
  }
  func.func @transform_14(%arg0: i32) -> (i32, i32) {
    %c0_i32 = arith.constant 0 : i32
    %c0_i32_0 = arith.constant 0 : i32
    %c0_i32_1 = arith.constant 0 : i32
    return %c0_i32, %c0_i32_0 : i32, i32
  }
  func.func @transform_15(%arg0: i32) -> (i32, i32) {
    %c0_i32 = arith.constant 0 : i32
    %c0_i32_0 = arith.constant 0 : i32
    %c0_i32_1 = arith.constant 0 : i32
    return %c0_i32, %c0_i32_0 : i32, i32
  }
  func.func @transform_16(%arg0: i32) -> (i32, i32) {
    %c0_i32 = arith.constant 0 : i32
    %c0_i32_0 = arith.constant 0 : i32
    %c0_i32_1 = arith.constant 0 : i32
    return %c0_i32, %c0_i32_0 : i32, i32
  }
  func.func @transform_17(%arg0: i32) -> (i32, i32) {
    %c0_i32 = arith.constant 0 : i32
    %c0_i32_0 = arith.constant 0 : i32
    %c0_i32_1 = arith.constant 0 : i32
    return %c0_i32, %c0_i32_0 : i32, i32
  }
  func.func @transform_18(%arg0: i32) -> (i32, i32, i32) {
    %c0_i32 = arith.constant 0 : i32
    %c0_i32_0 = arith.constant 0 : i32
    %c0_i32_1 = arith.constant 0 : i32
    return %arg0, %c0_i32, %c0_i32_0 : i32, i32, i32
  }
}

</mosaic_0001>

<bundles_post_ra>
// kernel: down_block_forward.1
= control target key start
LH: loop header
LB: loop body
LE: loop exit
PB: predicated region body
PF: predicated region fallthrough
CT: control target
= control target key end

     0   :  { %s3660_s27 = smov 0   ;;  %s5226_s0 = inlined_call_operand.vmem [shape: f32[2,96,4], index: 0, kind: input, shape index: {}]   ;;  %s5227_s1 = inlined_call_operand.vmem [shape: f32[64,1], index: 1, kind: input, shape index: {}]   ;;  %s5228_s2 = inlined_call_operand.vmem [shape: f32[64,1], index: 2, kind: input, shape index: {}]   ;;  %s5229_s3 = inlined_call_operand.vmem [shape: f32[9,4,16], index: 3, kind: input, shape index: {}]   ;;  %s5230_s4 = inlined_call_operand.vmem [shape: f32[1,16], index: 4, kind: input, shape index: {}]   ;;  %s5231_s5 = inlined_call_operand.vmem [shape: f32[1,16], index: 5, kind: input, shape index: {}]   ;;  %s5232_s6 = inlined_call_operand.vmem [shape: f32[1,16], index: 6, kind: input, shape index: {}]   ;;  %s5233_s7 = inlined_call_operand.vmem [shape: f32[9,4,16], index: 7, kind: input, shape index: {}]   ;;  %s5234_s8 = inlined_call_operand.vmem [shape: f32[9,16,16], index: 8, kind: input, shape index: {}]   ;;  %s5235_s9 = inlined_call_operand.vmem [shape: f32[1,16], index: 9, kind: input, shape index: {}]   ;;  %s5236_s10 = inlined_call_operand.vmem [shape: f32[1,16], index: 10, kind: input, shape index: {}]   ;;  %s5237_s11 = inlined_call_operand.vmem [shape: f32[1,16], index: 11, kind: input, shape index: {}]   ;;  %s5238_s12 = inlined_call_operand.vmem [shape: f32[4,8], index: 12, kind: input, shape index: {}]   ;;  %s5239_s13 = inlined_call_operand.vmem [shape: f32[16,8], index: 13, kind: input, shape index: {}]   ;;  %s5240_s14 = inlined_call_operand.vmem [shape: f32[16,8], index: 14, kind: input, shape index: {}]   ;;  %s5241_s15 = inlined_call_operand.vmem [shape: f32[1,8], index: 15, kind: input, shape index: {}]   ;;  %s5242_s16 = inlined_call_operand.vmem [shape: f32[16,8], index: 16, kind: input, shape index: {}]   ;;  %s5243_s17 = inlined_call_operand.vmem [shape: f32[8,16], index: 17, kind: input, shape index: {}]   ;;  %s5244_s18 = inlined_call_operand.vmem [shape: f32[2,64,8], index: 18, kind: output, shape index: {}]  }
   0x1   :  { %5289 = sst [smem:[#allocation60_spill]] %s5226_s0 }
   0x2   :  { %5290 = sst [smem:[#allocation61_spill]] %s5227_s1 }
   0x3   :  { %5291 = sst [smem:[#allocation62_spill]] %s5228_s2 }
   0x4 LB: > { %s3152_s28 = sadd.s32 4294967295, %s3560_s27   ;;  %p3156_p0 = scmp.ge.s32.totalorder %s3560_s27, 1  ;;  %s3560_s27 = sphi %s3660_s27, %s28_s27  }
   0x5   : > { %p512_p1 = scmp.lt.s32.totalorder %s3560_s27, 3 }
   0x7   : > { %p513_p2 = pnand %p3156_p0, %p512_p1 }
   0x9   : > { %516 = sbr.rel (%p513_p2) target bundleno = 1506 (0x5e2), region = 92 }
   0xe   : > { %v3162_v0 = vld [vmem:[%s5229_s3 + $0xc] sm:$0xf]  ;;  %vm638_vm0 = vcmask 1043456   ;;  %v605_v1 = vld [vmem:[%s5229_s3] sm:$0xf]  ;;  %p566_p3 = scmp.lt.s32.totalorder %s3152_s28, 1 }
   0xf   : > { %3163 = vmatpush.msk.msra.mxu0 %vm638_vm0, %v3162_v0  ;;  %3478 = vmatpush.msk.msra.mxu3 %vm638_vm0, %v3162_v0  ;;  %v3181_v2 = vld [vmem:[%s5229_s3 + $0x10] sm:$0xf]  ;;  %v3200_v3 = vld [vmem:[%s5229_s3 + $0x14] sm:$0xf]  ;;  %vm613_vm1 = vcmask 31744   ;;  %s5292_s25 = sld [smem:[#allocation60_spill]] }
  0x10   : > { %3172 = vmatpush.msk.msra.mxu1 %vm638_vm0, %v605_v1  ;;  %3182 = vmatpush.msk.msra.mxu2 %vm638_vm0, %v3181_v2  ;;  %s5449_s28 = smov (!%p566_p3, %s3152_s28), 1  ;;  %v3160_v4 = vld [vmem:[%s5229_s3 + $0x4] sm:$0xf]  ;;  %v3219_v8 = vld [vmem:[%s5229_s3 + $0x18] sm:$0xf]  ;;  %s5301_s29 = sld [smem:[#allocation61_spill]] }
  0x11   : > { %3201 = vmatpush.msk.msrb.mxu0 %vm638_vm0, %v3200_v3  ;;  %3479 = vmatpush.msk.msrb.mxu3 %vm638_vm0, %v3181_v2  ;;  %s3480_s2 = smul.u32 96, %s5449_s28  ;;  %v3161_v11 = vld [vmem:[%s5229_s3 + $0x8] sm:$0xf]  ;;  %v3229_v14 = vld [vmem:[%s5229_s3 + $0x1c] sm:$0xf]  ;;  %v3562_v18 = vmov 0  }
  0x12   : > { %3220 = vmatpush.msk.msrb.mxu2 %vm638_vm0, %v3219_v8  ;;  %3210 = vmatpush.msk.msrb.mxu1 %vm638_vm0, %v3161_v11  ;;  %v3239_v15 = vld [vmem:[%s5229_s3 + $0x20] sm:$0xf]  ;;  %s5303_s22 = sld [smem:[#allocation62_spill]]  ;;  %vm592_vm5 = vcmask 130048   ;;  %vm1423_vm14 = vcmask 64512   ;;  %s3477_s23 = sshll.u32 %s5449_s28, 6 }
  0x13   : > { %3492 = vset.pattern.permute.xlu0 %v3562_v18  ;;  %3493 = vset.pattern.permute.xlu1 %v3562_v18 }
  0x14   : > { %3494 = vset.pattern.permute.xlu2 %v3562_v18 }
  0x15   : > { %s3692_s26 = scalar_lea.vmem %s5292_s25, %s3480_s2 }
  0x16   : > { %v3698_v5 = vld [vmem:[%s3692_s26 + $0x10] sm:$0xff]  ;;  %v3701_v6 = vld [vmem:[%s3692_s26 + $0x40] sm:$0xff]  ;;  %v3704_v7 = vld [vmem:[%s3692_s26 + $0x8] sm:$0xff] }
  0x17   : > { %5293 = vst [vmem:[#allocation3_spill] sm:$0xff] %v3698_v5  ;;  %3164 = vmatmul.msk.f32.vlgmr.msra.gmra.mxu0 %vm613_vm1, %v3698_v5  ;;  %3170 = vmatmul.msk.f32.vlgmr.msra.gmra.mxu3 %vm613_vm1, %v3701_v6  ;;  %v3720_v9 = vld [vmem:[%s3692_s26 + $0x18] sm:$0xff]  ;;  %v3723_v10 = vld [vmem:[%s3692_s26 + $0x48] sm:$0xff]  ;;  %v3738_v12 = vld [vmem:[%s3692_s26 + $0x20] sm:$0xff] }
  0x18   : > { %5294 = vst [vmem:[#allocation4_spill] sm:$0xff] %v3701_v6  ;;  %3173 = vmatmul.msk.f32.vlgmr.msra.gmra.mxu1 %vm613_vm1, %v3704_v7  ;;  %3183 = vmatmul.msk.f32.vlgmr.msra.gmra.mxu2 %vm613_vm1, %v3698_v5  ;;  %v3741_v13 = vld [vmem:[%s3692_s26 + $0x38] sm:$0xff]  ;;  %v3760_v16 = vld [vmem:[%s3692_s26 + $0x28] sm:$0xff]  ;;  %v576_v17 = vld [vmem:[%s5301_s29] sm:$0xff] }
  0x19   : > { %5295 = vst [vmem:[#allocation5_spill] sm:$0xff] %v3704_v7  ;;  %3191 = vmatpush.msk.msra.mxu3 %vm638_vm0, %v3160_v4  ;;  %3240 = vmatpush.msk.msra.mxu0 %vm638_vm0, %v3239_v15  ;;  %v3774_v19 = vld [vmem:[%s3692_s26 + $0x30] sm:$0xff]  ;;  %v577_v20 = vld [vmem:[%s5301_s29 + $0x8] sm:$0xff]  ;;  %v584_v22 = vld [vmem:[%s5303_s22] sm:$0xff] }
  0x1a   : > { %5296 = vst [vmem:[#allocation6_spill] sm:$0xff] %v3720_v9  ;;  %1125 = vperm.xlu0 %3492, %v576_v17   ;;  %v578_v21 = vld [vmem:[%s5301_s29 + $0x10] sm:$0xff]  ;;  %v580_v23 = vld [vmem:[%s5301_s29 + $0x20] sm:$0xff]  ;;  %v585_v25 = vld [vmem:[%s5303_s22 + $0x8] sm:$0xff] }
  0x1b   : > { %5297 = vst [vmem:[#allocation7_spill] sm:$0xff] %v3723_v10  ;;  %1135 = vperm.xlu1 %3493, %v578_v21   ;;  %v586_v24 = vld [vmem:[%s5303_s22 + $0x10] sm:$0xff]  ;;  %v581_v26 = vld [vmem:[%s5301_s29 + $0x28] sm:$0xff]  ;;  %1195 = vperm.xlu2 %3494, %v585_v25   ;;  %v579_v27 = vld [vmem:[%s5301_s29 + $0x18] sm:$0xff] }
  0x1c   : > { %5298 = vst [vmem:[#allocation8_spill] sm:$0xff] %v3738_v12  ;;  %v588_v28 = vld [vmem:[%s5303_s22 + $0x20] sm:$0xff]  ;;  %v583_v29 = vld [vmem:[%s5301_s29 + $0x38] sm:$0xff]  ;;  %v3871_v30 = vld [vmem:[%s3692_s26 + $0x50] sm:$0xff] }
  0x1d   : > { %5299 = vst [vmem:[#allocation9_spill] sm:$0xff] %v3741_v13  ;;  %v587_v31 = vld [vmem:[%s5303_s22 + $0x18] sm:$0xff]  ;;  %v582_v32 = vld [vmem:[%s5301_s29 + $0x30] sm:$0xff]  ;;  %v589_v33 = vld [vmem:[%s5303_s22 + $0x28] sm:$0xff] }
  0x1e   : > { %5300 = vst [vmem:[#allocation10_spill] sm:$0xff] %v3760_v16  ;;  %v591_v34 = vld [vmem:[%s5303_s22 + $0x38] sm:$0xff]  ;;  %v590_v42 = vld [vmem:[%s5303_s22 + $0x30] sm:$0xff] }
  0x1f   : > { %3165 = vmatmul.msk.f32.gmra.mxu0 %vm613_vm1, %v3720_v9  ;;  %3171 = vmatmul.msk.f32.gmra.mxu3 %vm613_vm1, %v3723_v10  ;;  %5302 = vst [vmem:[#allocation11_spill] sm:$0xff] %v3774_v19 }
  0x20   : > { %3174 = vmatmul.msk.f32.gmra.mxu1 %vm613_vm1, %v3698_v5  ;;  %3184 = vmatmul.msk.f32.gmra.mxu2 %vm613_vm1, %v3720_v9  ;;  %5304 = vst [vmem:[#allocation12_spill] sm:$0xff] %v3871_v30 }
  0x22   : > { %1130 = vperm.xlu0 %3492, %v577_v20  }
  0x23   : > { %1190 = vperm.xlu1 %3493, %v584_v22   ;;  %1140 = vperm.xlu2 %3494, %v579_v27  }
  0x27   : > { %3166 = vmatmul.msk.f32.gmra.mxu0 %vm613_vm1, %v3738_v12  ;;  %3188 = vmatmul.msk.f32.vlgmr.msrb.gmra.mxu3 %vm613_vm1, %v3741_v13 }
  0x28   : > { %3175 = vmatmul.msk.f32.gmra.mxu1 %vm613_vm1, %v3720_v9  ;;  %3185 = vmatmul.msk.f32.gmra.mxu2 %vm613_vm1, %v3738_v12 }
  0x29   : > { %3230 = vmatpush.msk.msrb.mxu3 %vm638_vm0, %v3229_v14 }
  0x2a   : > { %1200 = vperm.xlu0 %3492, %v586_v24  }
  0x2b   : > { %1145 = vperm.xlu1 %3493, %v580_v23   ;;  %1205 = vperm.xlu2 %3494, %v587_v31  }
  0x2f   : > { %3167 = vmatmul.msk.f32.gmra.mxu0 %vm613_vm1, %v3760_v16  ;;  %3189 = vmatmul.msk.f32.gmra.mxu3 %vm613_vm1, %v3701_v6 }
  0x30   : > { %3176 = vmatmul.msk.f32.gmra.mxu1 %vm613_vm1, %v3738_v12  ;;  %3186 = vmatmul.msk.f32.gmra.mxu2 %vm613_vm1, %v3760_v16 }
  0x32   : > { %1150 = vperm.xlu0 %3492, %v581_v26  }
  0x33   : > { %1210 = vperm.xlu1 %3493, %v588_v28   ;;  %1155 = vperm.xlu2 %3494, %v582_v32  }
  0x37   : > { %3168 = vmatmul.msk.f32.gmra.mxu0 %vm613_vm1, %v3774_v19  ;;  %3190 = vmatmul.msk.f32.gmra.mxu3 %vm613_vm1, %v3723_v10 }
  0x38   : > { %3177 = vmatmul.msk.f32.gmra.mxu1 %vm613_vm1, %v3760_v16  ;;  %3187 = vmatmul.msk.f32.gmra.mxu2 %vm613_vm1, %v3774_v19 }
  0x3a   : > { %1215 = vperm.xlu0 %3492, %v589_v33  }
  0x3b   : > { %1160 = vperm.xlu1 %3493, %v583_v29   ;;  %1220 = vperm.xlu2 %3494, %v590_v42  }
  0x3f   : > { %3169 = vmatmul.msk.f32.gmra.mxu0 %vm613_vm1, %v3741_v13  ;;  %3192 = vmatmul.msk.f32.vlgmr.msra.gmra.mxu3 %vm613_vm1, %v3704_v7 }
  0x40   : > { %3178 = vmatmul.msk.f32.gmra.mxu1 %vm613_vm1, %v3774_v19  ;;  %3221 = vmatmul.msk.f32.vlgmr.msrb.gmra.mxu2 %vm613_vm1, %v3720_v9 }
  0x42   : > { %1225 = vperm.xlu0 %3492, %v591_v34  }
  0x47   : > { %3193 = vmatmul.msk.f32.gmra.mxu3 %vm613_vm1, %v3698_v5  ;;  %3202 = vmatmul.msk.f32.vlgmr.msrb.gmra.mxu0 %vm613_vm1, %v3698_v5 }
  0x48   : > { %3179 = vmatmul.msk.f32.gmra.mxu1 %vm613_vm1, %v3741_v13  ;;  %3222 = vmatmul.msk.f32.gmra.mxu2 %vm613_vm1, %v3738_v12 }
  0x4f   : > { %3194 = vmatmul.msk.f32.gmra.mxu3 %vm613_vm1, %v3720_v9  ;;  %3203 = vmatmul.msk.f32.gmra.mxu0 %vm613_vm1, %v3720_v9 }
  0x50   : > { %3180 = vmatmul.msk.f32.gmra.mxu1 %vm613_vm1, %v3701_v6  ;;  %3223 = vmatmul.msk.f32.gmra.mxu2 %vm613_vm1, %v3760_v16 }
  0x57   : > { %3195 = vmatmul.msk.f32.gmra.mxu3 %vm613_vm1, %v3738_v12  ;;  %3204 = vmatmul.msk.f32.gmra.mxu0 %vm613_vm1, %v3738_v12 }
  0x58   : > { %3211 = vmatmul.msk.f32.vlgmr.msrb.gmra.mxu1 %vm613_vm1, %v3704_v7  ;;  %3224 = vmatmul.msk.f32.gmra.mxu2 %vm613_vm1, %v3774_v19 }
  0x5f   : > { %3196 = vmatmul.msk.f32.gmra.mxu3 %vm613_vm1, %v3760_v16  ;;  %3205 = vmatmul.msk.f32.gmra.mxu0 %vm613_vm1, %v3760_v16 }
  0x60   : > { %3212 = vmatmul.msk.f32.gmra.mxu1 %vm613_vm1, %v3698_v5  ;;  %3225 = vmatmul.msk.f32.gmra.mxu2 %vm613_vm1, %v3741_v13 }
  0x67   : > { %3197 = vmatmul.msk.f32.gmra.mxu3 %vm613_vm1, %v3774_v19  ;;  %3206 = vmatmul.msk.f32.gmra.mxu0 %vm613_vm1, %v3774_v19 }
  0x68   : > { %3213 = vmatmul.msk.f32.gmra.mxu1 %vm613_vm1, %v3720_v9  ;;  %3226 = vmatmul.msk.f32.gmra.mxu2 %vm613_vm1, %v3701_v6 }
  0x6f   : > { %3198 = vmatmul.msk.f32.gmra.mxu3 %vm613_vm1, %v3741_v13  ;;  %3207 = vmatmul.msk.f32.gmra.mxu0 %vm613_vm1, %v3741_v13 }
  0x70   : > { %3214 = vmatmul.msk.f32.gmra.mxu1 %vm613_vm1, %v3738_v12  ;;  %3227 = vmatmul.msk.f32.gmra.mxu2 %vm613_vm1, %v3723_v10 }
  0x77   : > { %3199 = vmatmul.msk.f32.gmra.mxu3 %vm613_vm1, %v3701_v6  ;;  %3208 = vmatmul.msk.f32.gmra.mxu0 %vm613_vm1, %v3701_v6 }
  0x78   : > { %3215 = vmatmul.msk.f32.gmra.mxu1 %vm613_vm1, %v3760_v16  ;;  %3228 = vmatmul.msk.f32.gmra.mxu2 %vm613_vm1, %v3871_v30 }
  0x7f   : > { %3209 = vmatmul.msk.f32.gmra.mxu0 %vm613_vm1, %v3723_v10  ;;  %3231 = vmatmul.msk.f32.vlgmr.msrb.gmra.mxu3 %vm613_vm1, %v3720_v9 }
  0x80   : > { %3216 = vmatmul.msk.f32.gmra.mxu1 %vm613_vm1, %v3774_v19 }
  0x87   : > { %3232 = vmatmul.msk.f32.gmra.mxu3 %vm613_vm1, %v3738_v12  ;;  %3241 = vmatmul.msk.f32.vlgmr.msra.gmra.mxu0 %vm613_vm1, %v3720_v9 }
  0x88   : > { %3217 = vmatmul.msk.f32.gmra.mxu1 %vm613_vm1, %v3741_v13 }
  0x8f   : > { %3233 = vmatmul.msk.f32.gmra.mxu3 %vm613_vm1, %v3760_v16  ;;  %3242 = vmatmul.msk.f32.gmra.mxu0 %vm613_vm1, %v3738_v12  ;;  %v4011_v12 = vpop.permute.xlu1 %1135 }
  0x90   : > { %3218 = vmatmul.msk.f32.gmra.mxu1 %vm613_vm1, %v3701_v6 }
  0x94   : > { %v3911_v35 = vpop.f32.mrf.mxu0 }
  0x95   : > { %v3927_v39 = vpop.f32.mrf.mxu1 }
  0x96   : > { %v707_v9 = vadd.f32 %v3927_v39, %v3911_v35 }
  0x97   : > { %3234 = vmatmul.msk.f32.gmra.mxu3 %vm613_vm1, %v3774_v19  ;;  %3243 = vmatmul.msk.f32.gmra.mxu0 %vm613_vm1, %v3760_v16 }
  0x9a   : > { %v3917_v36 = vpop.f32.mrf.mxu3 }
  0x9b   : > { %v3921_v38 = vpop.f32.mrf.mxu2 }
  0x9c   : > { %v3919_v37 = vpop.f32.mrf.mxu0 }
  0x9d   : > { %v709_v45 = vpop.f32.mrf.mxu1 }
  0x9e   : > { %v710_v16 = vadd.f32 %v709_v45, %v3919_v37 }
  0x9f   : > { %3235 = vmatmul.msk.f32.gmra.mxu3 %vm613_vm1, %v3741_v13  ;;  %3244 = vmatmul.msk.f32.gmra.mxu0 %vm613_vm1, %v3774_v19 }
  0xa2   : > { %v3929_v40 = vpop.f32.mrf.mxu3 }
  0xa3   : > { %v3940_v43 = vpop.f32.mrf.mxu2 }
  0xa4   : > { %v3931_v41 = vpop.f32.mrf.mxu0 }
  0xa5   : > { %v712_v50 = vpop.f32.mrf.mxu1 }
  0xa7   : > { %3236 = vmatmul.msk.f32.gmra.mxu3 %vm613_vm1, %v3701_v6  ;;  %3245 = vmatmul.msk.f32.gmra.mxu0 %vm613_vm1, %v3741_v13  ;;  %v1112_v13 = vlaneseq }
  0xaa   : > { %v3942_v44 = vpop.f32.mrf.mxu3 }
  0xab   : > { %5305 = vst [vmem:[#allocation13_spill] sm:$0xff] %v3942_v44  ;;  %v3950_v47 = vpop.f32.mrf.mxu2 }
  0xac   : > { %v3944_v46 = vpop.f32.mrf.mxu0 }
  0xad   : > { %v715_v54 = vpop.f32.mrf.mxu1 }
  0xae   : > { %v716_v35 = vadd.f32 %v715_v54, %v3944_v46 }
  0xaf   : > { %3237 = vmatmul.msk.f32.gmra.mxu3 %vm613_vm1, %v3723_v10  ;;  %3246 = vmatmul.msk.f32.gmra.mxu0 %vm613_vm1, %v3701_v6  ;;  %v4008_v6 = vpop.permute.xlu0 %1125 }
  0xb0   : > { %5314 = vst [vmem:[#allocation22_spill] sm:$0xff] %v4008_v6 }
  0xb2   : > { %v3952_v48 = vpop.f32.mrf.mxu3 }
  0xb3   : > { %5306 = vst [vmem:[#allocation14_spill] sm:$0xff] %v3952_v48  ;;  %v3962_v52 = vpop.f32.mrf.mxu2 }
  0xb4   : > { %v3954_v49 = vpop.f32.mrf.mxu0 }
  0xb5   : > { %v3972_v58 = vpop.f32.mrf.mxu1 }
  0xb7   : > { %3238 = vmatmul.msk.f32.gmra.mxu3 %vm613_vm1, %v3871_v30  ;;  %3247 = vmatmul.msk.f32.gmra.mxu0 %vm613_vm1, %v3723_v10 }
  0xba   : > { %v3960_v51 = vpop.f32.mrf.mxu3 }
  0xbb   : > { %5307 = vst [vmem:[#allocation15_spill] sm:$0xff] %v3960_v51  ;;  %v3970_v57 = vpop.f32.mrf.mxu2 }
  0xbc   : > { %v3964_v53 = vpop.f32.mrf.mxu0 }
  0xbd   : > { %v3978_v63 = vpop.f32.mrf.mxu1 }
  0xbf   : > { %3248 = vmatmul.msk.f32.gmra.mxu0 %vm613_vm1, %v3871_v30 }
  0xc2   : > { %v3968_v55 = vpop.f32.mrf.mxu3 }
  0xc3   : > { %v964_v61 = vpop.f32.mrf.mxu2 }
  0xc4   : > { %v842_v56 = vpop.f32.mrf.mxu0  ;;  %v988_v48 = vadd.f32 %v964_v61, %v707_v9  ;;  %v719_v61 = vadd.f32 %v3972_v58, %v3954_v49 }
  0xc5   : > { %v3982_v4 = vpop.f32.mrf.mxu1 }
  0xca   : > { %v3974_v59 = vpop.f32.mrf.mxu3 }
  0xcb   : > { %v967_v1 = vpop.f32.mrf.mxu2 }
  0xcc   : > { %v845_v60 = vpop.f32.mrf.mxu0 }
  0xcd   : > { %v727_v15 = vpop.f32.mrf.mxu1 }
  0xce   : > { %v728_v51 = vadd.f32 %v727_v15, %v3929_v40 }
  0xd2   : > { %v3976_v62 = vpop.f32.mrf.mxu3 }
  0xd3   : > { %v970_v11 = vpop.f32.mrf.mxu2  ;;  %v803_v58 = vadd.f32 %v3976_v62, %v3950_v47 }
  0xd4   : > { %v848_v0 = vpop.f32.mrf.mxu0 }
  0xd5   : > { %v886_v21 = vpop.f32.mrf.mxu1 }
  0xd6   : > { %v887_v37 = vadd.f32 %v886_v21, %v842_v56 }
  0xda   : > { %v3980_v2 = vpop.f32.mrf.mxu3 }
  0xdb   : > { %v973_v20 = vpop.f32.mrf.mxu2 }
  0xdc   : > { %v851_v3 = vpop.f32.mrf.mxu0 }
  0xdd   : > { %v889_v26 = vpop.f32.mrf.mxu1 }
  0xe2   : > { %v3984_v8 = vpop.f32.mrf.mxu3 }
  0xe3   : > { %v3996_v24 = vpop.f32.mrf.mxu2 }
  0xe4   : > { %v3986_v14 = vpop.f32.mrf.mxu0 }
  0xe5   : > { %v892_v32 = vpop.f32.mrf.mxu1 }
  0xe6   : > { %v893_v5 = vadd.f32 %v892_v32, %v848_v0 }
  0xea   : > { %v3988_v17 = vpop.f32.mrf.mxu3 }
  0xeb   : > { %5308 = vst [vmem:[#allocation16_spill] sm:$0xff] %v3988_v17  ;;  %v4002_v28 = vpop.f32.mrf.mxu2  ;;  %v713_v17 = vadd.f32 %v712_v50, %v3931_v41  ;;  %v800_v50 = vadd.f32 %v3974_v59, %v3940_v43 }
  0xec   : > { %v3990_v18 = vpop.f32.mrf.mxu0 }
  0xed   : > { %v895_v30 = vpop.f32.mrf.mxu1 }
  0xee   : > { %v896_v40 = vadd.f32 %v895_v30, %v851_v3 }
  0xf2   : > { %v3992_v22 = vpop.f32.mrf.mxu3 }
  0xf3   : > { %5309 = vst [vmem:[#allocation17_spill] sm:$0xff] %v3992_v22  ;;  %v4004_v34 = vpop.f32.mrf.mxu2  ;;  %v890_v22 = vadd.f32 %v889_v26, %v845_v60  ;;  %v1104_v60 = vrot.slane %v988_v48, 7 }
  0xf4   : > { %v3994_v23 = vpop.f32.mrf.mxu0  ;;  %5313 = vst [vmem:[#allocation21_spill] sm:$0xff] %v4004_v34  ;;  %v4018_v34 = vshrl.u32 %v1112_v13, 7  ;;  %v4027_v13 = vpop.permute.xlu0 %1130 }
  0xf5   : > { %5310 = vst [vmem:[#allocation18_spill] sm:$0xff] %v3994_v23  ;;  %v898_v39 = vpop.f32.mrf.mxu1 }
  0xf6   : > { %vm1114_vm2 = vcmp.lt.s32.totalorder %v4018_v34, 1  ;;  %vm1179_vm3 = vcmp.lt.s32.totalorder %v4018_v34, 7 }
  0xfa   : > { %v3998_v25 = vpop.f32.mrf.mxu3 }
  0xfb   : > { %5311 = vst [vmem:[#allocation19_spill] sm:$0xff] %v3998_v25  ;;  %v985_v7 = vpop.f32.mrf.mxu2  ;;  %v989_v25 = vadd.f32 %v967_v1, %v710_v16  ;;  %v990_v1 = vadd.f32 %v970_v11, %v713_v17 }
  0xfc   : > { %v4000_v27 = vpop.f32.mrf.mxu0  ;;  %v4021_v45 = vadd.f32 %v985_v7, %v728_v51  ;;  %v4037_v51 = vpop.permute.xlu1 %1190 }
  0xfd   : > { %5312 = vst [vmem:[#allocation20_spill] sm:$0xff] %v4000_v27  ;;  %v4016_v27 = vpop.permute.xlu2 %1195  ;;  %v1105_v16 = vrot.slane %v989_v25, 7  ;;  %v1106_v48 = vrot.slane %v990_v1, 7  ;;  %v901_v32 = vpop.f32.mrf.mxu1 }
  0xfe   : > { %5315 = vst [vmem:[#allocation23_spill] sm:$0xff] %v4016_v27  ;;  %v1111_v7 = vrot.slane %v4021_v45, 7 }
  0xff   : > { %v1121_v30 = vsel %vm1114_vm2, %v1104_v60, %v1105_v16  ;;  %5316 = vst [vmem:[#allocation24_spill] sm:$0xff] %v4037_v51 }
 0x100   : > { %v1122_v11 = vsel %vm1114_vm2, %v1111_v7, %v1104_v60 }
 0x101   : > { %v1163_v47 = vmul.f32 %v4008_v6, %v1122_v11  ;;  %v902_v11 = vadd.f32 %v901_v32, %v3990_v18 }
 0x102   : > { %v1018_v29 = vpop.f32.mrf.mxu3 }
 0x104   : > { %v1072_v31 = vpop.f32.mrf.mxu0 }
 0x105   : > { %v4024_v15 = vadd.f32 %v1072_v31, %v887_v37  ;;  %v4047_v3 = vpop.permute.xlu2 %1140  ;;  %v806_v31 = vadd.f32 %v3980_v2, %v3962_v52  ;;  %v4077_v37 = vpop.permute.xlu0 %1200 }
 0x106   : > { %5317 = vst [vmem:[#allocation25_spill] sm:$0xff] %v4077_v37 }
 0x107   : > { %v1171_v54 = vrot.slane %v4024_v15, 1 }
 0x10a   : > { %v1021_v33 = vpop.f32.mrf.mxu3 }
 0x10b   : > { %v1043_v17 = vadd.f32 %v1021_v33, %v800_v50 }
 0x10c   : > { %v1075_v42 = vpop.f32.mrf.mxu0 }
 0x10d   : > { %v1097_v44 = vadd.f32 %v1075_v42, %v890_v22  ;;  %v1120_v22 = vsel %vm1114_vm2, %v1105_v16, %v1106_v48 }
 0x10e   : > { %v1165_v16 = vmul.f32 %v4011_v12, %v1120_v22  ;;  %v4111_v22 = vpop.permute.xlu0 %1150 }
 0x10f   : > { %v1172_v41 = vrot.slane %v1097_v44, 1  ;;  %v797_v44 = vadd.f32 %v3968_v55, %v3921_v38  ;;  %v1363_v38 = vld [vmem:[%s5242_s16 + $0x8] sm:$0xff]  ;;  %v1164_v55 = vmul.f32 %v4027_v13, %v1121_v30  ;;  %5319 = vst [vmem:[#allocation27_spill] sm:$0xff] %v4111_v22 }
 0x110   : > { %1412 = vmatpush.msra.mxu2 %v1363_v38  ;;  %1381 = vmatpush.msra.mxu1 %v1363_v38 }
 0x111   : > { %v1186_v49 = vsel %vm1179_vm3, %v1171_v54, %v1172_v41 }
 0x112   : > { %v4006_v10 = vpop.f32.mrf.mxu3  ;;  %v1228_v62 = vmul.f32 %v4037_v51, %v1186_v49 }
 0x114   : > { %v1078_v19 = vpop.f32.mrf.mxu0 }
 0x115   : > { %v1098_v23 = vadd.f32 %v1078_v19, %v893_v5  ;;  %v4029_v19 = vadd.f32 %v973_v20, %v716_v35  ;;  %v1042_v20 = vadd.f32 %v1018_v29, %v797_v44  ;;  %v1044_v29 = vadd.f32 %v4006_v10, %v803_v58  ;;  %v904_v58 = vpop.f32.mrf.mxu1 }
 0x116   : > { %v1237_v35 = vadd.f32 %v1164_v55, %v1043_v17 }
 0x117   : > { %v1173_v9 = vrot.slane %v1098_v23, 1  ;;  %v1107_v59 = vrot.slane %v4029_v19, 7  ;;  %v899_v23 = vadd.f32 %v898_v39, %v3986_v14  ;;  %v992_v14 = vadd.f32 %v3996_v24, %v719_v61 }
 0x118   : > { %v1236_v52 = vadd.f32 %v1163_v47, %v1042_v20  ;;  %v1238_v24 = vadd.f32 %v1165_v16, %v1044_v29  ;;  %v722_v19 = vadd.f32 %v3978_v63, %v3964_v53  ;;  %v809_v53 = vadd.f32 %v3984_v8, %v3970_v57 }
 0x119   : > { %v1185_v43 = vsel %vm1179_vm3, %v1172_v41, %v1173_v9  ;;  %v1119_v42 = vsel %vm1114_vm2, %v1106_v48, %v1107_v59  ;;  %v1108_v41 = vrot.slane %v992_v14, 7 }
 0x11a   : > { %v1027_v0 = vpop.f32.mrf.mxu3  ;;  %v1229_v25 = vmul.f32 %v4016_v27, %v1185_v43  ;;  %v1166_v10 = vmul.f32 %v4047_v3, %v1119_v42  ;;  %v993_v43 = vadd.f32 %v4002_v28, %v722_v19  ;;  %v5322_v42 = vld [vmem:[#allocation16_spill] sm:$0xff] }
 0x11b   : > { %v1045_v2 = vadd.f32 %v1027_v0, %v806_v31  ;;  %v4091_v0 = vpop.permute.xlu2 %1205  ;;  %v1118_v38 = vsel %vm1114_vm2, %v1107_v59, %v1108_v41 }
 0x11c   : > { %v1081_v5 = vpop.f32.mrf.mxu0  ;;  %5318 = vst [vmem:[#allocation26_spill] sm:$0xff] %v4091_v0  ;;  %v1109_v20 = vrot.slane %v993_v43, 7 }
 0x11d   : > { %v1099_v46 = vadd.f32 %v1081_v5, %v896_v40  ;;  %v1245_v40 = vadd.f32 %v1237_v35, %v1229_v25  ;;  %v4085_v5 = vld [vmem:[%s5230_s4] ss:$0 sm:$0xff]  ;;  %v1239_v30 = vadd.f32 %v1166_v10, %v1045_v2  ;;  %v5324_v2 = vld [vmem:[#allocation21_spill] sm:$0xff] }
 0x11e   : > { %v1117_v35 = vsel %vm1114_vm2, %v1108_v41, %v1109_v20 }
 0x11f   : > { %v1174_v56 = vrot.slane %v1099_v46, 1  ;;  %v4089_v46 = vpop.permute.xlu1 %1145  ;;  %v4099_v17 = vadd.f32 %v4085_v5, %v1245_v40 }
 0x120   : > { %v1167_v8 = vmul.f32 %v4089_v46, %v1118_v38 }
 0x121   : > { %v1184_v26 = vsel %vm1179_vm3, %v1173_v9, %v1174_v56  ;;  %v1244_v9 = vadd.f32 %v1236_v52, %v1228_v62  ;;  %vm1265_vm4 = vcmp.gt.f32.partialorder %v4099_v17, 0.0 }
 0x122   : > { %v1030_v21 = vpop.f32.mrf.mxu3  ;;  %v1230_v1 = vmul.f32 %v4077_v37, %v1184_v26 }
 0x123   : > { %v4104_v63 = vadd.f32 %v4085_v5, %v1244_v9  ;;  %v1046_v18 = vadd.f32 %v1030_v21, %v809_v53  ;;  %v725_v21 = vadd.f32 %v3982_v4, %v3917_v36  ;;  %v1362_v53 = vld [vmem:[%s5242_s16] sm:$0xff] }
 0x124   : > { %v1084_v33 = vpop.f32.mrf.mxu0  ;;  %v1246_v48 = vadd.f32 %v1238_v24, %v1230_v1  ;;  %1413 = vmatpush.msra.mxu2 %v1362_v53  ;;  %1382 = vmatpush.msra.mxu1 %v1362_v53 }
 0x125   : > { %v1100_v39 = vadd.f32 %v1084_v33, %v899_v23  ;;  %v1273_v23 = vmin.f32 %v4099_v17, 0.0  ;;  %v1272_v25 = vmin.f32 %v4104_v63, 0.0  ;;  %v1240_v47 = vadd.f32 %v1167_v8, %v1046_v18  ;;  %v5321_v33 = vld [vmem:[#allocation13_spill] sm:$0xff]  ;;  %v5329_v8 = vld [vmem:[#allocation20_spill] sm:$0xff] }
 0x126   : > { %v4109_v28 = vadd.f32 %v4085_v5, %v1246_v48  ;;  %v812_v14 = vadd.f32 %v5322_v42, %v5321_v33  ;;  %v994_v1 = vadd.f32 %v5324_v2, %v725_v21  ;;  %v5328_v18 = vld [vmem:[#allocation17_spill] sm:$0xff]  ;;  %vm1264_vm6 = vcmp.gt.f32.partialorder %v4104_v63, 0.0 }
 0x127   : > { %v1175_v60 = vrot.slane %v1100_v39, 1  ;;  %v4119_v59 = vpop.permute.xlu1 %1210  ;;  %v5323_v39 = vld [vmem:[#allocation18_spill] sm:$0xff]  ;;  %v1282_v52 = vmul.f32 1.442695, %v1273_v23  ;;  %v1280_v40 = vmul.f32 1.442695, %v1272_v25 }
 0x128   : > { %5320 = vst [vmem:[#allocation28_spill] sm:$0xff] %v4119_v59  ;;  %v1274_v32 = vmin.f32 %v4109_v28, 0.0  ;;  %v905_v16 = vadd.f32 %v904_v58, %v5323_v39  ;;  %v1110_v48 = vrot.slane %v994_v1, 7  ;;  %v5327_v58 = vld [vmem:[#allocation14_spill] sm:$0xff]  ;;  %vm1266_vm7 = vcmp.gt.f32.partialorder %v4109_v28, 0.0 }
 0x129   : > { %v1183_v50 = vsel %vm1179_vm3, %v1174_v56, %v1175_v60  ;;  %3498 = vpow2.f32 %v1282_v52  ;;  %v815_v23 = vadd.f32 %v5328_v18, %v5327_v58 }
 0x12a   : > { %v1231_v61 = vmul.f32 %v4091_v0, %v1183_v50  ;;  %v1033_v44 = vpop.f32.mrf.mxu3  ;;  %v1284_v9 = vmul.f32 1.442695, %v1274_v32  ;;  %v1168_v50 = vmul.f32 %v4111_v22, %v1117_v35  ;;  %3500 = vpow2.f32 %v1280_v40  ;;  %v5330_v32 = vld [vmem:[#allocation15_spill] sm:$0xff] }
 0x12b   : > { %v1047_v24 = vadd.f32 %v1033_v44, %v812_v14  ;;  %v4144_v44 = vpop.permute.xlu2 %1155  ;;  %v1116_v21 = vsel %vm1114_vm2, %v1109_v20, %v1110_v48  ;;  %v1115_v35 = vsel %vm1114_vm2, %v1110_v48, %v1111_v7 }
 0x12c   : > { %v1247_v49 = vadd.f32 %v1239_v30, %v1231_v61  ;;  %v1087_v56 = vpop.f32.mrf.mxu0  ;;  %v4138_v30 = vpop.permute.xlu0 %1215  ;;  %5326 = vst [vmem:[#allocation16_spill] sm:$0xff] %v4144_v44  ;;  %3502 = vpow2.f32 %v1284_v9  ;;  %v1169_v1 = vmul.f32 %v4144_v44, %v1116_v21 }
 0x12d   : > { %v1101_v55 = vadd.f32 %v1087_v56, %v902_v11  ;;  %5325 = vst [vmem:[#allocation13_spill] sm:$0xff] %v4138_v30  ;;  %v907_v61 = vpop.f32.mrf.mxu1  ;;  %v1241_v56 = vadd.f32 %v1168_v50, %v1047_v24 }
 0x12e   : > { %v4117_v26 = vadd.f32 %v4085_v5, %v1247_v49  ;;  %v908_v25 = vadd.f32 %v907_v61, %v5329_v8 }
 0x12f   : > { %v1176_v57 = vrot.slane %v1101_v55, 1  ;;  %v3499_v42 = vpop.eup %3498  ;;  %v4156_v14 = vpop.permute.xlu1 %1160 }
 0x130   : > { %v1275_v36 = vmin.f32 %v4117_v26, 0.0  ;;  %5332 = vst [vmem:[#allocation18_spill] sm:$0xff] %v4156_v14  ;;  %v3501_v52 = vpop.eup %3500  ;;  %vm1267_vm8 = vcmp.gt.f32.partialorder %v4117_v26, 0.0 }
 0x131   : > { %v1182_v31 = vsel %vm1179_vm3, %v1175_v60, %v1176_v57  ;;  %v3249_v9 = vadd.f32 -1.0, %v3501_v52 }
 0x132   : > { %v1232_v62 = vmul.f32 %v4119_v59, %v1182_v31  ;;  %v1036_v29 = vpop.f32.mrf.mxu3  ;;  %v1286_v43 = vmul.f32 1.442695, %v1275_v36  ;;  %v3503_v36 = vpop.eup %3502 }
 0x133   : > { %v1048_v39 = vadd.f32 %v1036_v29, %v815_v23  ;;  %v4167_v24 = vpop.permute.xlu2 %1220 }
 0x134   : > { %v1248_v4 = vadd.f32 %v1240_v47, %v1232_v62  ;;  %v1090_v60 = vpop.f32.mrf.mxu0  ;;  %v5331_v47 = vld [vmem:[#allocation19_spill] sm:$0xff]  ;;  %3504 = vpow2.f32 %v1286_v43  ;;  %v4165_v45 = vpop.permute.xlu0 %1225  ;;  %5334 = vst [vmem:[#allocation14_spill] sm:$0xff] %v4167_v24 }
 0x135   : > { %v1102_v10 = vadd.f32 %v1090_v60, %v905_v16  ;;  %v818_v62 = vadd.f32 %v5331_v47, %v5330_v32  ;;  %v3250_v60 = vadd.f32 -1.0, %v3499_v42  ;;  %5333 = vst [vmem:[#allocation21_spill] sm:$0xff] %v4165_v45  ;;  %v1242_v7 = vadd.f32 %v1169_v1, %v1048_v39  ;;  %v1422_v32 = vld [vmem:[%s5243_s17] sm:$0xff] }
 0x136   : > { %v4135_v19 = vadd.f32 %v4085_v5, %v1248_v4  ;;  %v1170_v4 = vmul.f32 %v4156_v14, %v1115_v35  ;;  %1442 = vmatpush.msra.mxu3 %v1422_v32  ;;  %1465 = vmatpush.msrb.mxu1 %v1422_v32 }
 0x137   : > { %v1177_v41 = vrot.slane %v1102_v10, 1 }
 0x138   : > { %v1276_v11 = vmin.f32 %v4135_v19, 0.0  ;;  %vm1268_vm9 = vcmp.gt.f32.partialorder %v4135_v19, 0.0 }
 0x139   : > { %v1181_v49 = vsel %vm1179_vm3, %v1176_v57, %v1177_v41 }
 0x13a   : > { %v1288_v38 = vmul.f32 1.442695, %v1276_v11  ;;  %v1233_v55 = vmul.f32 %v4138_v30, %v1181_v49  ;;  %v1039_v31 = vpop.f32.mrf.mxu3  ;;  %v3505_v48 = vpop.eup %3504  ;;  %v3251_v49 = vadd.f32 -1.0, %v3503_v36 }
 0x13b   : > { %v1049_v2 = vadd.f32 %v1039_v31, %v818_v62 }
 0x13c   : > { %v1249_v57 = vadd.f32 %v1241_v56, %v1233_v55  ;;  %v1093_v33 = vpop.f32.mrf.mxu0  ;;  %3506 = vpow2.f32 %v1288_v38  ;;  %v4179_v38 = vsel %vm1265_vm4, %v4099_v17, %v3250_v60  ;;  %v4183_v55 = vsel %vm1264_vm6, %v4104_v63, %v3249_v9 }
 0x13d   : > { %v1103_v16 = vadd.f32 %v1093_v33, %v908_v25  ;;  %v1243_v43 = vadd.f32 %v1170_v4, %v1049_v2  ;;  %v1334_v17 = vmul.f32 %v4179_v38, %v4179_v38  ;;  %v4191_v23 = vsel %vm1266_vm7, %v4109_v28, %v3251_v49  ;;  %v3263_v28 = vld [vmem:[%s5233_s7 + $0xc] sm:$0xf] }
 0x13e   : > { %v1261_v20 = vadd.f32 %v4085_v5, %v1249_v57  ;;  %v1312_v63 = vsel %vm592_vm5, %v4183_v55, 0.0  ;;  %v1333_v31 = vmul.f32 %v4183_v55, %v4183_v55  ;;  %v1313_v62 = vsel %vm592_vm5, %v4179_v38, 0.0  ;;  %3264 = vmatpush.msk.msrb.mxu2 %vm638_vm0, %v3263_v28 }
 0x13f   : > { %v1178_v40 = vrot.slane %v1103_v16, 1  ;;  %v1335_v57 = vmul.f32 %v4191_v23, %v4191_v23  ;;  %v1342_v33 = vsel %vm592_vm5, %v1334_v17, 0.0  ;;  %v1315_v16 = vsel %vm592_vm5, %v4191_v23, 0.0 }
 0x140   : > { %v1277_v10 = vmin.f32 %v1261_v20, 0.0  ;;  %vm1269_vm10 = vcmp.gt.f32.partialorder %v1261_v20, 0.0  ;;  %v1314_v2 = vadd.f32 %v1313_v62, %v1312_v63 }
 0x141   : > { %v1180_v29 = vsel %vm1179_vm3, %v1177_v41, %v1178_v40  ;;  %v1187_v50 = vsel %vm1179_vm3, %v1178_v40, %v1171_v54  ;;  %v3252_v54 = vadd.f32 -1.0, %v3505_v48  ;;  %v1341_v40 = vsel %vm592_vm5, %v1333_v31, 0.0  ;;  %v3261_v48 = vld [vmem:[%s5233_s7 + $0x4] sm:$0xf] }
 0x142   : > { %v1290_v61 = vmul.f32 1.442695, %v1277_v10  ;;  %v1234_v11 = vmul.f32 %v4167_v24, %v1180_v29  ;;  %v1235_v53 = vmul.f32 %v4165_v45, %v1187_v50  ;;  %v3507_v56 = vpop.eup %3506  ;;  %v1343_v60 = vadd.f32 %v1342_v33, %v1341_v40  ;;  %3292 = vmatpush.msk.msrb.mxu0 %vm638_vm0, %v3261_v48  ;;  %v5339_v48 = vld [vmem:[#allocation10_spill] sm:$0xff] }
 0x143   : > { %v3253_v8 = vadd.f32 -1.0, %v3507_v56  ;;  %v4199_v21 = vsel %vm1267_vm8, %v4117_v26, %v3252_v54  ;;  %v1316_v10 = vadd.f32 %v1315_v16, %v1314_v2  ;;  %v5336_v16 = vld [vmem:[#allocation3_spill] sm:$0xff] }
 0x144   : > { %3508 = vpow2.f32 %v1290_v61  ;;  %v1250_v41 = vadd.f32 %v1242_v7, %v1234_v11  ;;  %v1251_v15 = vadd.f32 %v1243_v43, %v1235_v53  ;;  %v1336_v52 = vmul.f32 %v4199_v21, %v4199_v21 }
 0x145   : > { %v4215_v42 = vsel %vm1268_vm9, %v4135_v19, %v3253_v8  ;;  %v1344_v19 = vsel %vm592_vm5, %v1335_v57, 0.0  ;;  %v1317_v36 = vsel %vm592_vm5, %v4199_v21, 0.0 }
 0x146   : > { %v1262_v58 = vadd.f32 %v4085_v5, %v1250_v41  ;;  %v1263_v18 = vadd.f32 %v4085_v5, %v1251_v15  ;;  %v1337_v4 = vmul.f32 %v4215_v42, %v4215_v42  ;;  %v1346_v9 = vsel %vm592_vm5, %v1336_v52, 0.0  ;;  %v5335_v15 = vld [vmem:[#allocation5_spill] sm:$0xff] }
 0x147   : > { %v1319_v7 = vsel %vm592_vm5, %v4215_v42, 0.0  ;;  %v1345_v29 = vadd.f32 %v1344_v19, %v1343_v60  ;;  %v1318_v50 = vadd.f32 %v1317_v36, %v1316_v10  ;;  %3293 = vmatmul.msk.f32.vlgmr.msrb.gmra.mxu0 %vm613_vm1, %v5335_v15 }
 0x148   : > { %v1278_v25 = vmin.f32 %v1262_v58, 0.0  ;;  %v1279_v5 = vmin.f32 %v1263_v18, 0.0  ;;  %v1348_v43 = vsel %vm592_vm5, %v1337_v4, 0.0  ;;  %vm1270_vm11 = vcmp.gt.f32.partialorder %v1262_v58, 0.0 }
 0x149   : > { %v1347_v49 = vadd.f32 %v1346_v9, %v1345_v29  ;;  %v1320_v56 = vadd.f32 %v1319_v7, %v1318_v50  ;;  %vm1271_vm12 = vcmp.gt.f32.partialorder %v1263_v18, 0.0  ;;  %v5337_v9 = vld [vmem:[#allocation6_spill] sm:$0xff]  ;;  %v5338_v50 = vld [vmem:[#allocation8_spill] sm:$0xff] }
 0x14a   : > { %v3509_v47 = vpop.eup %3508  ;;  %v1292_v26 = vmul.f32 1.442695, %v1278_v25  ;;  %v1294_v39 = vmul.f32 1.442695, %v1279_v5 }
 0x14b   : > { %v3254_v35 = vadd.f32 -1.0, %v3509_v47  ;;  %v1349_v8 = vadd.f32 %v1348_v43, %v1347_v49  ;;  %v5341_v43 = vld [vmem:[#allocation9_spill] sm:$0xff]  ;;  %v3563_v49 = vmov 128.0  }
 0x14c   : > { %3510 = vpow2.f32 %v1292_v26 }
 0x14d   : > { %v4221_v1 = vsel %vm1269_vm10, %v1261_v20, %v3254_v35  ;;  %3512 = vpow2.f32 %v1294_v39 }
 0x14e   : > { %v1338_v20 = vmul.f32 %v4221_v1, %v4221_v1  ;;  %v1321_v11 = vsel %vm592_vm5, %v4221_v1, 0.0  ;;  %3514 = vrcp.f32 %v3563_v49 }
 0x14f   : > { %v1322_v25 = vadd.f32 %v1321_v11, %v1320_v56  ;;  %3294 = vmatmul.msk.f32.gmra.mxu0 %vm613_vm1, %v5336_v16  ;;  %v5342_v11 = vld [vmem:[#allocation4_spill] sm:$0xff]  ;;  %v1521_v56 = vld [vmem:[%s5233_s7] sm:$0xf] }
 0x150   : > { %v1350_v54 = vsel %vm592_vm5, %v1338_v20, 0.0  ;;  %3273 = vmatpush.msk.msrb.mxu3 %vm638_vm0, %v1521_v56 }
 0x151   : > { %v1351_v28 = vadd.f32 %v1350_v54, %v1349_v8  ;;  %v3282_v8 = vld [vmem:[%s5233_s7 + $0x10] sm:$0xf] }
 0x152   : > { %v3511_v61 = vpop.eup %3510 }
 0x153   : > { %v3513_v53 = vpop.eup %3512  ;;  %v3255_v41 = vadd.f32 -1.0, %v3511_v61  ;;  %v5340_v61 = vld [vmem:[#allocation11_spill] sm:$0xff] }
 0x154   : > { %v3256_v17 = vadd.f32 -1.0, %v3513_v53  ;;  %v5343_v53 = vld [vmem:[#allocation7_spill] sm:$0xff] }
 0x155   : > { %v4244_v63 = vsel %vm1270_vm11, %v1262_v58, %v3255_v41  ;;  %v3515_v41 = vpop.eup %3514 }
 0x156   : > { %v4246_v31 = vsel %vm1271_vm12, %v1263_v18, %v3256_v17  ;;  %v1323_v5 = vsel %vm592_vm5, %v4244_v63, 0.0  ;;  %v1339_v32 = vmul.f32 %v4244_v63, %v4244_v63  ;;  %v1388_v54 = vmul.f32 128.0, %v3515_v41 }
 0x157   : > { %v1324_v47 = vadd.f32 %v1323_v5, %v1322_v25  ;;  %v1340_v62 = vmul.f32 %v4246_v31, %v4246_v31  ;;  %v1325_v57 = vsel %vm592_vm5, %v4246_v31, 0.0  ;;  %3295 = vmatmul.msk.f32.gmra.mxu0 %vm613_vm1, %v5337_v9  ;;  %vm1392_vm13 = vweird.f32 %v3515_v41 }
 0x158   : > { %v1352_v26 = vsel %vm592_vm5, %v1339_v32, 0.0  ;;  %v1389_v17 = vsub.f32 1.0, %v1388_v54 }
 0x159   : > { %v1326_v58 = vadd.f32 %v1325_v57, %v1324_v47  ;;  %v1353_v33 = vadd.f32 %v1352_v26, %v1351_v28  ;;  %v1354_v18 = vsel %vm592_vm5, %v1340_v62, 0.0 }
 0x15a   : > { %v1390_v25 = vmul.f32 %v3515_v41, %v1389_v17  ;;  %v3542_v17 = vld [vmem:[%s3692_s26 + $0x20] sm:$0xff] }
 0x15b   : > { %v1327_v35 = vrot.slane %v1326_v58, 4  ;;  %v1355_v39 = vadd.f32 %v1354_v18, %v1353_v33  ;;  %v3262_v33 = vld [vmem:[%s5233_s7 + $0x8] sm:$0xf]  ;;  %v3301_v18 = vld [vmem:[%s5233_s7 + $0x14] sm:$0xf] }
 0x15c   : > { %v1391_v5 = vadd.f32 %v3515_v41, %v1390_v25  ;;  %v2026_v25 = vld [vmem:[%s5234_s8] sm:$0xff] }
 0x15d   : > { %v1328_v52 = vadd.f32 %v1327_v35, %v1326_v58  ;;  %v1356_v2 = vrot.slane %v1355_v39, 4 }
 0x15e   : > { %v4298_v32 = vsel %vm1392_vm13, %v3515_v41, %v1391_v5  ;;  %v3541_v41 = vld [vmem:[%s3692_s26 + $0x18] sm:$0xff]  ;;  %v3543_v5 = vld [vmem:[%s3692_s26 + $0x28] sm:$0xff] }
 0x15f   : > { %v1329_v40 = vrot.slane %v1328_v52, 2  ;;  %v1357_v19 = vadd.f32 %v1356_v2, %v1355_v39  ;;  %3296 = vmatmul.msk.f32.gmra.mxu0 %vm613_vm1, %v5338_v50  ;;  %5344 = vst [vmem:[#allocation17_spill] sm:$0xff] %v4298_v32  ;;  %v1824_v39 = vld [vmem:[%s3692_s26 + $0x18] sm:$0xff]  ;;  %v1826_v2 = vld [vmem:[%s3692_s26 + $0x28] sm:$0xff] }
 0x161   : > { %v1330_v36 = vadd.f32 %v1329_v40, %v1328_v52  ;;  %v1358_v4 = vrot.slane %v1357_v19, 2  ;;  %v3536_v52 = vld [vmem:[%s3692_s26 + $0x10] sm:$0xff] }
 0x162   : > { %v1827_v40 = vld [vmem:[%s3692_s26 + $0x30] sm:$0xff] }
 0x163   : > { %v1331_v60 = vrot.slane %v1330_v36, 1  ;;  %v1359_v10 = vadd.f32 %v1358_v4, %v1357_v19  ;;  %v4355_v19 = vld [vmem:[%s3692_s26 + $0x38] sm:$0xff] }
 0x164   : > { %v4362_v4 = vld [vmem:[%s3692_s26 + $0x38] sm:$0xff] }
 0x165   : > { %v1332_v7 = vadd.f32 %v1331_v60, %v1330_v36  ;;  %v1360_v20 = vrot.slane %v1359_v10, 1  ;;  %v3320_v36 = vld [vmem:[%s5233_s7 + $0x18] sm:$0xf]  ;;  %v1829_v60 = vld [vmem:[%s3692_s26 + $0x40] sm:$0xff] }
 0x167   : > { %3257 = vmatmul.msk.f32.vlgmr.msra.gmra.mxu1 %vm592_vm5, %v1332_v7  ;;  %v1361_v29 = vadd.f32 %v1360_v20, %v1359_v10  ;;  %3297 = vmatmul.msk.f32.gmra.mxu0 %vm613_vm1, %v5339_v48  ;;  %v3538_v10 = vld [vmem:[%s3692_s26 + $0x40] sm:$0xff]  ;;  %v3539_v7 = vld [vmem:[%s3692_s26 + $0x48] sm:$0xff] }
 0x168   : > { %3283 = vmatpush.msk.msra.mxu1 %vm638_vm0, %v3282_v8  ;;  %v3540_v20 = vld [vmem:[%s3692_s26 + $0x8] sm:$0xff] }
 0x169   : > { %3258 = vmatmul.msk.f32.vlgmr.msra.gmra.mxu2 %vm592_vm5, %v1361_v29  ;;  %v2027_v29 = vld [vmem:[%s5234_s8 + $0x8] sm:$0xff] }
 0x16a   : > { %3302 = vmatpush.msk.msra.mxu2 %vm638_vm0, %v3301_v18  ;;  %v3389_v18 = vld [vmem:[%s5234_s8 + $0x48] sm:$0xff] }
 0x16f   : > { %3298 = vmatmul.msk.f32.gmra.mxu0 %vm613_vm1, %v5340_v61 }
 0x171   : > { %3265 = vmatmul.msk.f32.vlgmr.msrb.gmra.mxu2 %vm613_vm1, %v5336_v16 }
 0x177   : > { %3299 = vmatmul.msk.f32.gmra.mxu0 %vm613_vm1, %v5341_v43 }
 0x179   : > { %3266 = vmatmul.msk.f32.gmra.mxu2 %vm613_vm1, %v5337_v9 }
 0x17f   : > { %3300 = vmatmul.msk.f32.gmra.mxu0 %vm613_vm1, %v5342_v11 }
 0x181   : > { %3267 = vmatmul.msk.f32.gmra.mxu2 %vm613_vm1, %v5338_v50 }
 0x189   : > { %3268 = vmatmul.msk.f32.gmra.mxu2 %vm613_vm1, %v5339_v48 }
 0x191   : > { %3269 = vmatmul.msk.f32.gmra.mxu2 %vm613_vm1, %v5340_v61 }
 0x199   : > { %3270 = vmatmul.msk.f32.gmra.mxu2 %vm613_vm1, %v5341_v43  ;;  %v3369_v43 = vld [vmem:[%s5234_s8 + $0x28] sm:$0xff] }
 0x1a1   : > { %3271 = vmatmul.msk.f32.gmra.mxu2 %vm613_vm1, %v5342_v11  ;;  %v3564_v11 = vmov 0.0  }
 0x1a2   : > { %594 = vst.msk [vmem:[#allocation2 + $0x8] sm:$0xff] %vm592_vm5, %v3564_v11 }
 0x1a3   : > { %595 = vst.msk [vmem:[#allocation2 + $0x50] sm:$0xff] %vm592_vm5, %v3564_v11 }
 0x1a9   : > { %3272 = vmatmul.msk.f32.gmra.mxu2 %vm613_vm1, %v5343_v53  ;;  %v3368_v53 = vld [vmem:[%s5234_s8 + $0x20] sm:$0xff]  ;;  %v2018_v49 = vld [vmem:[#allocation2 + $0x8] sm:$0xff] }
 0x1b1   : > { %3303 = vmatmul.msk.f32.vlgmr.msra.gmra.mxu2 %vm613_vm1, %v5336_v16 }
 0x1b9   : > { %3304 = vmatmul.msk.f32.gmra.mxu2 %vm613_vm1, %v5337_v9 }
 0x1c1   : > { %3305 = vmatmul.msk.f32.gmra.mxu2 %vm613_vm1, %v5338_v50 }
 0x1c9   : > { %3306 = vmatmul.msk.f32.gmra.mxu2 %vm613_vm1, %v5339_v48 }
 0x1d1   : > { %3307 = vmatmul.msk.f32.gmra.mxu2 %vm613_vm1, %v5340_v61 }
 0x1d9   : > { %3308 = vmatmul.msk.f32.gmra.mxu2 %vm613_vm1, %v4362_v4 }
 0x1e1   : > { %3309 = vmatmul.msk.f32.gmra.mxu2 %vm613_vm1, %v3538_v10 }
 0x1e4   : > { %v1384_v28 = vpop.f32.mrf.mxu1 }
 0x1e5   : > { %v1394_v47 = vmul.f32 %v4298_v32, %v1384_v28 }
 0x1e7   : > { %3259 = vmatmul.msk.f32.vlgmr.msra.gmra.mxu3 %vm1423_vm14, %v1394_v47  ;;  %v1419_v57 = vmul.f32 %v1394_v47, %v1394_v47  ;;  %v3544_v47 = vld [vmem:[%s3692_s26 + $0x30] sm:$0xff] }
 0x1e8   : > { %3311 = vmatpush.msk.msra.mxu3 %vm638_vm0, %v3262_v33 }
 0x1e9   : > { %3310 = vmatmul.msk.f32.gmra.mxu2 %vm613_vm1, %v3539_v7 }
 0x1ec   : > { %v1415_v62 = vpop.f32.mrf.mxu2 }
 0x1ed   : > { %v1418_v26 = vmul.f32 %v1415_v62, %v4298_v32  ;;  %v3359_v62 = vld [vmem:[%s5234_s8 + $0x18] sm:$0xff] }
 0x1ef   : > { %v1420_v58 = vsub.f32 %v1418_v26, %v1419_v57  ;;  %3274 = vmatmul.msk.f32.vlgmr.msrb.gmra.mxu3 %vm613_vm1, %v5335_v15  ;;  %v3330_v15 = vld [vmem:[%s5233_s7 + $0x1c] sm:$0xf]  ;;  %v3358_v57 = vld [vmem:[%s5234_s8 + $0x10] sm:$0xff] }
 0x1f0   : > { %3331 = vmatpush.msk.msra.mxu0 %vm638_vm0, %v3330_v15  ;;  %2066 = vmatpush.msrb.mxu3 %v2027_v29 }
 0x1f1   : > { %v1421_v35 = vmax.f32 %v1420_v58, 0.0  ;;  %3332 = vmatmul.msk.f32.vlgmr.msra.gmra.mxu0 %vm613_vm1, %v1824_v39 }
 0x1f2   : > { %2170 = vmatpush.msrb.mxu0 %v3369_v43  ;;  %2067 = vmatpush.msrb.mxu3 %v2026_v25  ;;  %v1480_v43 = vld [vmem:[%s5231_s5] sm:$0x1] }
 0x1f3   : > { %3260 = vmatmul.msk.f32.vlgmr.msrb.gmra.mxu1 %vm1423_vm14, %v1421_v35  ;;  %v4461_v35 = vpop.f32.mrf.mxu0 }
 0x1f4   : > { %3321 = vmatpush.msk.msrb.mxu1 %vm638_vm0, %v3320_v36  ;;  %2171 = vmatpush.msrb.mxu0 %v3368_v53  ;;  %5346 = vst [vmem:[#allocation20_spill] sm:$0xff] %v4461_v35 }
 0x1f7   : > { %3275 = vmatmul.msk.f32.gmra.mxu3 %vm613_vm1, %v5336_v16  ;;  %v1825_v16 = vld [vmem:[%s3692_s26 + $0x20] sm:$0xff] }
 0x1f9   : > { %3333 = vmatmul.msk.f32.gmra.mxu0 %vm613_vm1, %v1825_v16 }
 0x1fb   : > { %3284 = vmatmul.msk.f32.vlgmr.msra.gmra.mxu1 %vm613_vm1, %v3536_v52  ;;  %v4476_v36 = vpop.f32.mrf.mxu0 }
 0x1fc   : > { %2118 = vmatpush.msra.mxu1 %v3359_v62 }
 0x1fe   : > { %2119 = vmatpush.msra.mxu1 %v3358_v57 }
 0x1ff   : > { %3276 = vmatmul.msk.f32.gmra.mxu3 %vm613_vm1, %v5337_v9 }
 0x201   : > { %3334 = vmatmul.msk.f32.gmra.mxu0 %vm613_vm1, %v1826_v2 }
 0x203   : > { %3285 = vmatmul.msk.f32.gmra.mxu1 %vm613_vm1, %v5337_v9  ;;  %v1830_v9 = vld [vmem:[%s3692_s26 + $0x48] sm:$0xff] }
 0x207   : > { %3277 = vmatmul.msk.f32.gmra.mxu3 %vm613_vm1, %v5338_v50 }
 0x209   : > { %3335 = vmatmul.msk.f32.gmra.mxu0 %vm613_vm1, %v1827_v40 }
 0x20b   : > { %3286 = vmatmul.msk.f32.gmra.mxu1 %vm613_vm1, %v5338_v50  ;;  %v3340_v50 = vld [vmem:[%s5233_s7 + $0x20] sm:$0xf] }
 0x20c   : > { %3341 = vmatpush.msk.msrb.mxu2 %vm638_vm0, %v3340_v50  ;;  %v4483_v50 = vpop.f32.mrf.mxu0 }
 0x20d   : > { %3342 = vmatmul.msk.f32.vlgmr.msrb.gmra.mxu2 %vm613_vm1, %v1824_v39 }
 0x20f   : > { %3278 = vmatmul.msk.f32.gmra.mxu3 %vm613_vm1, %v5339_v48 }
 0x211   : > { %3336 = vmatmul.msk.f32.gmra.mxu0 %vm613_vm1, %v4355_v19 }
 0x213   : > { %3287 = vmatmul.msk.f32.gmra.mxu1 %vm613_vm1, %v5339_v48  ;;  %v5345_v48 = vld [vmem:[#allocation12_spill] sm:$0xff] }
 0x214   : > { %v4495_v62 = vpop.f32.mrf.mxu0 }
 0x215   : > { %3343 = vmatmul.msk.f32.gmra.mxu2 %vm613_vm1, %v1825_v16 }
 0x217   : > { %3279 = vmatmul.msk.f32.gmra.mxu3 %vm613_vm1, %v5340_v61 }
 0x219   : > { %3337 = vmatmul.msk.f32.gmra.mxu0 %vm613_vm1, %v1829_v60 }
 0x21b   : > { %3288 = vmatmul.msk.f32.gmra.mxu1 %vm613_vm1, %v5340_v61  ;;  %v4397_v61 = vpop.f32.mrf.mxu2 }
 0x21d   : > { %3344 = vmatmul.msk.f32.gmra.mxu2 %vm613_vm1, %v1826_v2 }
 0x21f   : > { %3280 = vmatmul.msk.f32.gmra.mxu3 %vm613_vm1, %v4362_v4 }
 0x221   : > { %3338 = vmatmul.msk.f32.gmra.mxu0 %vm613_vm1, %v1830_v9 }
 0x223   : > { %3289 = vmatmul.msk.f32.gmra.mxu1 %vm613_vm1, %v4362_v4  ;;  %v4411_v56 = vpop.f32.mrf.mxu2 }
 0x225   : > { %3345 = vmatmul.msk.f32.gmra.mxu2 %vm613_vm1, %v1827_v40 }
 0x227   : > { %3281 = vmatmul.msk.f32.gmra.mxu3 %vm613_vm1, %v3538_v10 }
 0x229   : > { %3339 = vmatmul.msk.f32.gmra.mxu0 %vm613_vm1, %v5345_v48 }
 0x22b   : > { %3290 = vmatmul.msk.f32.gmra.mxu1 %vm613_vm1, %v3538_v10  ;;  %v4417_v54 = vpop.f32.mrf.mxu2 }
 0x22d   : > { %3346 = vmatmul.msk.f32.gmra.mxu2 %vm613_vm1, %v4355_v19 }
 0x22f   : > { %3312 = vmatmul.msk.f32.vlgmr.msra.gmra.mxu3 %vm613_vm1, %v3540_v20 }
 0x230   : > { %2306 = vmatpush.msra.mxu3 %v3389_v18 }
 0x231   : > { %3370 = vmatmul.msk.f32.vlgmr.msrb.gmra.mxu0 %vm592_vm5, %v2018_v49 }
 0x233   : > { %3291 = vmatmul.msk.f32.gmra.mxu1 %vm613_vm1, %v3539_v7  ;;  %v4423_v8 = vpop.f32.mrf.mxu2 }
 0x235   : > { %3347 = vmatmul.msk.f32.gmra.mxu2 %vm613_vm1, %v1829_v60 }
 0x237   : > { %3313 = vmatmul.msk.f32.gmra.mxu3 %vm613_vm1, %v3536_v52 }
 0x23b   : > { %3322 = vmatmul.msk.f32.vlgmr.msrb.gmra.mxu1 %vm613_vm1, %v1824_v39  ;;  %v4433_v28 = vpop.f32.mrf.mxu2 }
 0x23d   : > { %3348 = vmatmul.msk.f32.gmra.mxu2 %vm613_vm1, %v1830_v9 }
 0x23f   : > { %3314 = vmatmul.msk.f32.gmra.mxu3 %vm613_vm1, %v3541_v41 }
 0x243   : > { %3323 = vmatmul.msk.f32.gmra.mxu1 %vm613_vm1, %v1825_v16  ;;  %v4448_v26 = vpop.f32.mrf.mxu2  ;;  %v3545_v16 = vld [vmem:[%s3692_s26 + $0x50] sm:$0xff] }
 0x245   : > { %3349 = vmatmul.msk.f32.gmra.mxu2 %vm613_vm1, %v5345_v48 }
 0x247   : > { %3315 = vmatmul.msk.f32.gmra.mxu3 %vm613_vm1, %v3542_v17 }
 0x24b   : > { %3324 = vmatmul.msk.f32.gmra.mxu1 %vm613_vm1, %v1826_v2  ;;  %v4453_v58 = vpop.f32.mrf.mxu2 }
 0x24f   : > { %3316 = vmatmul.msk.f32.gmra.mxu3 %vm613_vm1, %v3543_v5 }
 0x253   : > { %3325 = vmatmul.msk.f32.gmra.mxu1 %vm613_vm1, %v1827_v40  ;;  %v4468_v2 = vpop.f32.mrf.mxu2  ;;  %v3379_v40 = vld [vmem:[%s5234_s8 + $0x38] sm:$0xff] }
 0x254   : > { %2254 = vmatpush.msra.mxu2 %v3379_v40 }
 0x257   : > { %3317 = vmatmul.msk.f32.gmra.mxu3 %vm613_vm1, %v3544_v47 }
 0x25b   : > { %3326 = vmatmul.msk.f32.gmra.mxu1 %vm613_vm1, %v4355_v19  ;;  %v3378_v19 = vld [vmem:[%s5234_s8 + $0x30] sm:$0xff]  ;;  %v4481_v7 = vpop.f32.mrf.mxu2 }
 0x25c   : > { %2255 = vmatpush.msra.mxu2 %v3378_v19  ;;  %5347 = vst [vmem:[#allocation15_spill] sm:$0xff] %v4481_v7 }
 0x25f   : > { %3318 = vmatmul.msk.f32.gmra.mxu3 %vm613_vm1, %v4362_v4 }
 0x263   : > { %3327 = vmatmul.msk.f32.gmra.mxu1 %vm613_vm1, %v1829_v60  ;;  %v4493_v5 = vpop.f32.mrf.mxu2 }
 0x264   : > { %5348 = vst [vmem:[#allocation19_spill] sm:$0xff] %v4493_v5  ;;  %v4780_v5 = vld [vmem:[#allocation2 + $0x50] sm:$0xff] }
 0x267   : > { %3319 = vmatmul.msk.f32.gmra.mxu3 %vm613_vm1, %v3538_v10 }
 0x26a   : > { %v1444_v33 = vpop.f32.mrf.mxu3 }
 0x26b   : > { %3328 = vmatmul.msk.f32.gmra.mxu1 %vm613_vm1, %v1830_v9 }
 0x26f   : > { %3350 = vmatmul.msk.f32.vlgmr.msrb.gmra.mxu3 %vm592_vm5, %v2018_v49 }
 0x270   : > { %v1467_v15 = vpop.f32.mrf.mxu1 }
 0x271   : > { %v1468_v39 = vadd.f32 1e-05, %v1467_v15 }
 0x272   : > { %v4464_v52 = vpop.f32.mrf.mxu3 }
 0x273   : > { %3516 = vrsqrt.f32 %v1468_v39  ;;  %3329 = vmatmul.msk.f32.gmra.mxu1 %vm613_vm1, %v3545_v16  ;;  %vm1476_vm4 = vweird.f32 %v1468_v39 }
 0x279   : > { %v3517_v4 = vpop.eup %3516 }
 0x27a   : > { %v1471_v60 = vmul.f32 %v3517_v4, %v1468_v39  ;;  %v4479_v9 = vpop.f32.mrf.mxu3  ;;  %vm1477_vm15 = vweird.f32 %v3517_v4 }
 0x27b   : > { %3360 = vmatmul.msk.f32.vlgmr.msra.gmra.mxu1 %vm592_vm5, %v2018_v49  ;;  %vm1478_vm6 = vmor %vm1476_vm4, %vm1477_vm15  ;;  %v1482_v49 = vld [vmem:[%s5232_s6] sm:$0x1]  ;;  %v1624_v35 = vadd.f32 %v4479_v9, %v4411_v56 }
 0x27c   : > { %v1472_v10 = vmul.f32 %v3517_v4, %v1471_v60 }
 0x27e   : > { %v1473_v20 = vmul.f32 0.5, %v1472_v10 }
 0x280   : > { %v1474_v29 = vsub.f32 1.5, %v1473_v20  ;;  %v4526_v20 = vpop.f32.mrf.mxu2 }
 0x281   : > { %5355 = vst [vmem:[#allocation9_spill] sm:$0xff] %v4526_v20 }
 0x282   : > { %v1475_v48 = vmul.f32 %v3517_v4, %v1474_v29  ;;  %v4491_v41 = vpop.f32.mrf.mxu3  ;;  %v4532_v29 = vpop.f32.mrf.mxu1 }
 0x283   : > { %5357 = vst [vmem:[#allocation7_spill] sm:$0xff] %v4532_v29 }
 0x284   : > { %v1479_v11 = vsel %vm1478_vm6, %v3517_v4, %v1475_v48 }
 0x285   : > { %v1481_v53 = vmul.f32 %v1480_v43, %v1479_v11 }
 0x287   : > { %v1483_v17 = vmul.f32 %v1481_v53, %v1444_v33  ;;  %v1485_v25 = vperm.slane %v1481_v53, 0 }
 0x288   : > { %v4560_v53 = vpop.f32.mrf.mxu2 }
 0x289   : > { %v1484_v47 = vsub.f32 %v1482_v49, %v1483_v17  ;;  %v1486_v18 = vmul.f32 %v1485_v25, %v4183_v55  ;;  %v1487_v15 = vmul.f32 %v1485_v25, %v4179_v38  ;;  %v1488_v39 = vmul.f32 %v1485_v25, %v4191_v23  ;;  %5359 = vst [vmem:[#allocation29_spill] sm:$0xff] %v4560_v53 }
 0x28a   : > { %v1489_v16 = vmul.f32 %v1485_v25, %v4199_v21  ;;  %v1490_v4 = vmul.f32 %v1485_v25, %v4215_v42  ;;  %v1491_v10 = vmul.f32 %v1485_v25, %v4221_v1  ;;  %v1492_v55 = vmul.f32 %v1485_v25, %v4244_v63  ;;  %v4516_v23 = vpop.f32.mrf.mxu3  ;;  %v3388_v21 = vld [vmem:[%s5234_s8 + $0x40] sm:$0xff]  ;;  %v4562_v49 = vpop.f32.mrf.mxu1 }
 0x28b   : > { %v1495_v57 = vperm.slane %v1484_v47, 0  ;;  %v1493_v1 = vmul.f32 %v1485_v25, %v4246_v31  ;;  %2307 = vmatpush.msra.mxu3 %v3388_v21  ;;  %v4542_v31 = vpop.f32.mrf.mxu0 }
 0x28d   : > { %v4501_v40 = vadd.f32 %v1495_v57, %v1486_v18  ;;  %v4503_v19 = vadd.f32 %v1495_v57, %v1487_v15  ;;  %v4505_v33 = vadd.f32 %v1495_v57, %v1488_v39  ;;  %v4508_v60 = vadd.f32 %v1495_v57, %v1489_v16  ;;  %v3409_v16 = vld [vmem:[%s5234_s8 + $0x68] sm:$0xff] }
 0x28e   : > { %v4513_v38 = vadd.f32 %v1495_v57, %v1490_v4  ;;  %v4523_v42 = vadd.f32 %v1495_v57, %v1491_v10  ;;  %v4530_v63 = vadd.f32 %v1495_v57, %v1492_v55  ;;  %v4536_v48 = vadd.f32 %v1495_v57, %v1493_v1  ;;  %2442 = vmatpush.msra.mxu0 %v3409_v16  ;;  %v3399_v4 = vld [vmem:[%s5234_s8 + $0x58] sm:$0xff]  ;;  %v3398_v10 = vld [vmem:[%s5234_s8 + $0x50] sm:$0xff]  ;;  %v3408_v55 = vld [vmem:[%s5234_s8 + $0x60] sm:$0xff] }
 0x28f   : > { %5349 = vst [vmem:[#allocation5_spill] sm:$0xff] %v4501_v40  ;;  %2358 = vmatpush.msrb.mxu1 %v3399_v4  ;;  %v3429_v4 = vld [vmem:[%s5234_s8 + $0x88] sm:$0xff] }
 0x290   : > { %5350 = vst [vmem:[#allocation3_spill] sm:$0xff] %v4503_v19  ;;  %v4578_v57 = vpop.f32.mrf.mxu2  ;;  %2443 = vmatpush.msra.mxu0 %v3408_v55  ;;  %2546 = vmatpush.msrb.mxu3 %v3429_v4  ;;  %v3419_v55 = vld [vmem:[%s5234_s8 + $0x78] sm:$0xff] }
 0x291   : > { %5351 = vst [vmem:[#allocation6_spill] sm:$0xff] %v4505_v33  ;;  %2359 = vmatpush.msrb.mxu1 %v3398_v10  ;;  %2494 = vmatpush.msrb.mxu2 %v3419_v55 }
 0x292   : > { %5352 = vst [vmem:[#allocation8_spill] sm:$0xff] %v4508_v60  ;;  %v4558_v11 = vpop.f32.mrf.mxu3  ;;  %v4580_v18 = vpop.f32.mrf.mxu1 }
 0x293   : > { %1505 = vst.msk [vmem:[#allocation2 + $0x10] sm:$0xff] %vm592_vm5, %v4501_v40  ;;  %v4566_v25 = vpop.f32.mrf.mxu0 }
 0x294   : > { %5353 = vst [vmem:[#allocation10_spill] sm:$0xff] %v4513_v38 }
 0x295   : > { %1506 = vst.msk [vmem:[#allocation2 + $0x18] sm:$0xff] %vm592_vm5, %v4503_v19 }
 0x296   : > { %5354 = vst [vmem:[#allocation11_spill] sm:$0xff] %v4523_v42 }
 0x297   : > { %1507 = vst.msk [vmem:[#allocation2 + $0x20] sm:$0xff] %vm592_vm5, %v4505_v33 }
 0x298   : > { %5356 = vst [vmem:[#allocation4_spill] sm:$0xff] %v4530_v63  ;;  %v4614_v16 = vpop.f32.mrf.mxu2 }
 0x299   : > { %1508 = vst.msk [vmem:[#allocation2 + $0x28] sm:$0xff] %vm592_vm5, %v4508_v60 }
 0x29a   : > { %5358 = vst [vmem:[#allocation12_spill] sm:$0xff] %v4536_v48  ;;  %v4546_v43 = vld [vmem:[#allocation2 + $0x10] sm:$0xff]  ;;  %v4576_v47 = vpop.f32.mrf.mxu3 }
 0x29b   : > { %1509 = vst.msk [vmem:[#allocation2 + $0x30] sm:$0xff] %vm592_vm5, %v4513_v38  ;;  %3351 = vmatmul.msk.f32.gmra.mxu3 %vm592_vm5, %v4546_v43  ;;  %3361 = vmatmul.msk.f32.gmra.mxu1 %vm592_vm5, %v4546_v43  ;;  %v4592_v39 = vpop.f32.mrf.mxu0 }
 0x29c   : > { %1510 = vst.msk [vmem:[#allocation2 + $0x38] sm:$0xff] %vm592_vm5, %v4523_v42  ;;  %3371 = vmatmul.msk.f32.gmra.mxu0 %vm592_vm5, %v4546_v43  ;;  %3380 = vmatmul.msk.f32.vlgmr.msra.gmra.mxu2 %vm592_vm5, %v4546_v43  ;;  %v4564_v17 = vld [vmem:[#allocation2 + $0x18] sm:$0xff] }
 0x29d   : > { %1511 = vst.msk [vmem:[#allocation2 + $0x40] sm:$0xff] %vm592_vm5, %v4530_v63  ;;  %v3418_v63 = vld [vmem:[%s5234_s8 + $0x70] sm:$0xff] }
 0x29e   : > { %1512 = vst.msk [vmem:[#allocation2 + $0x48] sm:$0xff] %vm592_vm5, %v4536_v48  ;;  %v4582_v15 = vld [vmem:[#allocation2 + $0x20] sm:$0xff]  ;;  %v4616_v48 = vpop.f32.mrf.mxu1  ;;  %2495 = vmatpush.msrb.mxu2 %v3418_v63 }
 0x29f   : > { %5360 = vst [vmem:[#allocation30_spill] sm:$0xff] %v4578_v57 }
 0x2a0   : > { %v4608_v1 = vld [vmem:[#allocation2 + $0x28] sm:$0xff]  ;;  %5361 = vst [vmem:[#allocation31_spill] sm:$0xff] %v4614_v16  ;;  %v4645_v38 = vpop.f32.mrf.mxu2 }
 0x2a1   : > { %5363 = vst [vmem:[#allocation33_spill] sm:$0xff] %v4645_v38  ;;  %v3428_v38 = vld [vmem:[%s5234_s8 + $0x80] sm:$0xff] }
 0x2a2   : > { %v4606_v21 = vpop.f32.mrf.mxu3  ;;  %v4633_v42 = vld [vmem:[#allocation2 + $0x30] sm:$0xff]  ;;  %2547 = vmatpush.msrb.mxu3 %v3428_v38 }
 0x2a3   : > { %3352 = vmatmul.msk.f32.gmra.mxu3 %vm592_vm5, %v4564_v17  ;;  %3362 = vmatmul.msk.f32.gmra.mxu1 %vm592_vm5, %v4564_v17  ;;  %v4625_v10 = vpop.f32.mrf.mxu0  ;;  %v4651_v63 = vld [vmem:[#allocation2 + $0x38] sm:$0xff] }
 0x2a4   : > { %3372 = vmatmul.msk.f32.gmra.mxu0 %vm592_vm5, %v4564_v17  ;;  %3381 = vmatmul.msk.f32.gmra.mxu2 %vm592_vm5, %v4564_v17  ;;  %5362 = vst [vmem:[#allocation32_spill] sm:$0xff] %v4625_v10  ;;  %v4667_v32 = vld [vmem:[#allocation2 + $0x40] sm:$0xff] }
 0x2a5   : > { %v4685_v59 = vld [vmem:[#allocation2 + $0x48] sm:$0xff] }
 0x2a6   : > { %v4647_v55 = vpop.f32.mrf.mxu1 }
 0x2a8   : > { %v4663_v19 = vpop.f32.mrf.mxu2 }
 0x2a9   : > { %5366 = vst [vmem:[#allocation36_spill] sm:$0xff] %v4663_v19 }
 0x2aa   : > { %v4639_v4 = vpop.f32.mrf.mxu3 }
 0x2ab   : > { %3353 = vmatmul.msk.f32.gmra.mxu3 %vm592_vm5, %v4582_v15  ;;  %3363 = vmatmul.msk.f32.gmra.mxu1 %vm592_vm5, %v4582_v15  ;;  %v4649_v60 = vpop.f32.mrf.mxu0 }
 0x2ac   : > { %3373 = vmatmul.msk.f32.gmra.mxu0 %vm592_vm5, %v4582_v15  ;;  %3382 = vmatmul.msk.f32.gmra.mxu2 %vm592_vm5, %v4582_v15  ;;  %5364 = vst [vmem:[#allocation34_spill] sm:$0xff] %v4649_v60  ;;  %v1621_v60 = vadd.f32 %v4464_v52, %v4397_v61 }
 0x2ae   : > { %v4665_v40 = vpop.f32.mrf.mxu1 }
 0x2b0   : > { %v4681_v30 = vpop.f32.mrf.mxu2 }
 0x2b1   : > { %5368 = vst [vmem:[#allocation38_spill] sm:$0xff] %v4681_v30 }
 0x2b2   : > { %v4661_v33 = vpop.f32.mrf.mxu3 }
 0x2b3   : > { %3354 = vmatmul.msk.f32.gmra.mxu3 %vm592_vm5, %v4608_v1  ;;  %3364 = vmatmul.msk.f32.gmra.mxu1 %vm592_vm5, %v4608_v1  ;;  %5365 = vst [vmem:[#allocation35_spill] sm:$0xff] %v4661_v33  ;;  %v4669_v45 = vpop.f32.mrf.mxu0 }
 0x2b4   : > { %3374 = vmatmul.msk.f32.gmra.mxu0 %vm592_vm5, %v4608_v1  ;;  %3383 = vmatmul.msk.f32.gmra.mxu2 %vm592_vm5, %v4608_v1 }
 0x2b6   : > { %v4683_v19 = vpop.f32.mrf.mxu1 }
 0x2ba   : > { %v4679_v24 = vpop.f32.mrf.mxu3 }
 0x2bb   : > { %3355 = vmatmul.msk.f32.gmra.mxu3 %vm592_vm5, %v4633_v42  ;;  %3365 = vmatmul.msk.f32.gmra.mxu1 %vm592_vm5, %v4633_v42  ;;  %5367 = vst [vmem:[#allocation37_spill] sm:$0xff] %v4679_v24  ;;  %v4698_v0 = vpop.f32.mrf.mxu0 }
 0x2bc   : > { %3375 = vmatmul.msk.f32.gmra.mxu0 %vm592_vm5, %v4633_v42  ;;  %3384 = vmatmul.msk.f32.gmra.mxu2 %vm592_vm5, %v4633_v42 }
 0x2be   : > { %v4708_v37 = vpop.f32.mrf.mxu1 }
 0x2bf   : > { %5371 = vst [vmem:[#allocation41_spill] sm:$0xff] %v4708_v37 }
 0x2c2   : > { %v4700_v16 = vpop.f32.mrf.mxu3 }
 0x2c3   : > { %3356 = vmatmul.msk.f32.gmra.mxu3 %vm592_vm5, %v4651_v63  ;;  %3366 = vmatmul.msk.f32.gmra.mxu1 %vm592_vm5, %v4651_v63  ;;  %5369 = vst [vmem:[#allocation39_spill] sm:$0xff] %v4700_v16  ;;  %v4714_v57 = vpop.f32.mrf.mxu0 }
 0x2c4   : > { %3376 = vmatmul.msk.f32.gmra.mxu0 %vm592_vm5, %v4651_v63  ;;  %3385 = vmatmul.msk.f32.gmra.mxu2 %vm592_vm5, %v4651_v63 }
 0x2c6   : > { %v1878_v53 = vpop.f32.mrf.mxu1 }
 0x2ca   : > { %v4720_v38 = vpop.f32.mrf.mxu3 }
 0x2cb   : > { %3357 = vmatmul.msk.f32.gmra.mxu3 %vm592_vm5, %v4667_v32  ;;  %3367 = vmatmul.msk.f32.gmra.mxu1 %vm592_vm5, %v4667_v32  ;;  %5372 = vst [vmem:[#allocation42_spill] sm:$0xff] %v4720_v38  ;;  %v4728_v51 = vpop.f32.mrf.mxu0 }
 0x2cc   : > { %3377 = vmatmul.msk.f32.gmra.mxu0 %vm592_vm5, %v4667_v32  ;;  %3386 = vmatmul.msk.f32.gmra.mxu2 %vm592_vm5, %v4667_v32 }
 0x2d2   : > { %v4738_v38 = vpop.f32.mrf.mxu3 }
 0x2d3   : > { %3390 = vmatmul.msk.f32.vlgmr.msra.gmra.mxu3 %vm592_vm5, %v4546_v43  ;;  %3400 = vmatmul.msk.f32.vlgmr.msrb.gmra.mxu1 %vm592_vm5, %v4546_v43  ;;  %v4706_v43 = vpop.f32.mrf.mxu2  ;;  %5374 = vst [vmem:[#allocation44_spill] sm:$0xff] %v4738_v38  ;;  %v4742_v20 = vpop.f32.mrf.mxu0 }
 0x2d4   : > { %3387 = vmatmul.msk.f32.gmra.mxu2 %vm592_vm5, %v4685_v59  ;;  %3410 = vmatmul.msk.f32.vlgmr.msra.gmra.mxu0 %vm592_vm5, %v4564_v17  ;;  %5370 = vst [vmem:[#allocation40_spill] sm:$0xff] %v4706_v43 }
 0x2da   : > { %v4752_v43 = vpop.f32.mrf.mxu3 }
 0x2db   : > { %3391 = vmatmul.msk.f32.gmra.mxu3 %vm592_vm5, %v4564_v17  ;;  %3401 = vmatmul.msk.f32.gmra.mxu1 %vm592_vm5, %v4564_v17  ;;  %v4726_v27 = vpop.f32.mrf.mxu2  ;;  %5376 = vst [vmem:[#allocation46_spill] sm:$0xff] %v4752_v43  ;;  %v4764_v14 = vpop.f32.mrf.mxu0 }
 0x2dc   : > { %3411 = vmatmul.msk.f32.gmra.mxu0 %vm592_vm5, %v4582_v15  ;;  %3420 = vmatmul.msk.f32.vlgmr.msrb.gmra.mxu2 %vm592_vm5, %v4564_v17  ;;  %5373 = vst [vmem:[#allocation43_spill] sm:$0xff] %v4726_v27  ;;  %v1881_v27 = vpop.f32.mrf.mxu1 }
 0x2e2   : > { %v4766_v30 = vpop.f32.mrf.mxu3 }
 0x2e3   : > { %3392 = vmatmul.msk.f32.gmra.mxu3 %vm592_vm5, %v4582_v15  ;;  %3402 = vmatmul.msk.f32.gmra.mxu1 %vm592_vm5, %v4582_v15  ;;  %v4740_v16 = vpop.f32.mrf.mxu2  ;;  %5378 = vst [vmem:[#allocation48_spill] sm:$0xff] %v4766_v30  ;;  %v4778_v24 = vpop.f32.mrf.mxu0 }
 0x2e4   : > { %3412 = vmatmul.msk.f32.gmra.mxu0 %vm592_vm5, %v4608_v1  ;;  %3421 = vmatmul.msk.f32.gmra.mxu2 %vm592_vm5, %v4582_v15  ;;  %5375 = vst [vmem:[#allocation45_spill] sm:$0xff] %v4740_v16  ;;  %v1884_v16 = vpop.f32.mrf.mxu1 }
 0x2e5   : > { %5380 = vst [vmem:[#allocation50_spill] sm:$0xff] %v4778_v24 }
 0x2ea   : > { %v4786_v30 = vpop.f32.mrf.mxu3 }
 0x2eb   : > { %3393 = vmatmul.msk.f32.gmra.mxu3 %vm592_vm5, %v4608_v1  ;;  %3403 = vmatmul.msk.f32.gmra.mxu1 %vm592_vm5, %v4608_v1  ;;  %v4754_v38 = vpop.f32.mrf.mxu2  ;;  %5381 = vst [vmem:[#allocation51_spill] sm:$0xff] %v4786_v30  ;;  %v4794_v7 = vpop.f32.mrf.mxu0 }
 0x2ec   : > { %3413 = vmatmul.msk.f32.gmra.mxu0 %vm592_vm5, %v4633_v42  ;;  %3422 = vmatmul.msk.f32.gmra.mxu2 %vm592_vm5, %v4608_v1  ;;  %5377 = vst [vmem:[#allocation47_spill] sm:$0xff] %v4754_v38  ;;  %v1887_v38 = vpop.f32.mrf.mxu1 }
 0x2ed   : > { %5383 = vst [vmem:[#allocation53_spill] sm:$0xff] %v4794_v7 }
 0x2f2   : > { %v2069_v44 = vpop.f32.mrf.mxu3 }
 0x2f3   : > { %3394 = vmatmul.msk.f32.gmra.mxu3 %vm592_vm5, %v4633_v42  ;;  %3404 = vmatmul.msk.f32.gmra.mxu1 %vm592_vm5, %v4633_v42  ;;  %v4768_v43 = vpop.f32.mrf.mxu2 }
 0x2f4   : > { %3414 = vmatmul.msk.f32.gmra.mxu0 %vm592_vm5, %v4651_v63  ;;  %3423 = vmatmul.msk.f32.gmra.mxu2 %vm592_vm5, %v4633_v42  ;;  %5379 = vst [vmem:[#allocation49_spill] sm:$0xff] %v4768_v43  ;;  %v1890_v33 = vpop.f32.mrf.mxu1 }
 0x2fb   : > { %3395 = vmatmul.msk.f32.gmra.mxu3 %vm592_vm5, %v4651_v63  ;;  %3405 = vmatmul.msk.f32.gmra.mxu1 %vm592_vm5, %v4651_v63  ;;  %v4792_v43 = vpop.f32.mrf.mxu2 }
 0x2fc   : > { %3415 = vmatmul.msk.f32.gmra.mxu0 %vm592_vm5, %v4667_v32  ;;  %3424 = vmatmul.msk.f32.gmra.mxu2 %vm592_vm5, %v4651_v63  ;;  %5382 = vst [vmem:[#allocation52_spill] sm:$0xff] %v4792_v43  ;;  %v1893_v30 = vpop.f32.mrf.mxu1  ;;  %v1902_v43 = vadd.f32 %v1878_v53, %v1621_v60 }
 0x2fe   : > { %v2093_v7 = vadd.f32 %v2069_v44, %v1902_v43  ;;  %v1627_v44 = vadd.f32 %v4491_v41, %v4417_v54  ;;  %v1633_v43 = vadd.f32 %v4558_v11, %v4433_v28 }
 0x303   : > { %3396 = vmatmul.msk.f32.gmra.mxu3 %vm592_vm5, %v4667_v32  ;;  %3406 = vmatmul.msk.f32.gmra.mxu1 %vm592_vm5, %v4667_v32  ;;  %v4800_v6 = vpop.f32.mrf.mxu2 }
 0x304   : > { %3416 = vmatmul.msk.f32.gmra.mxu0 %vm592_vm5, %v4685_v59  ;;  %3425 = vmatmul.msk.f32.gmra.mxu2 %vm592_vm5, %v4667_v32  ;;  %5384 = vst [vmem:[#allocation54_spill] sm:$0xff] %v4800_v6  ;;  %v4812_v6 = vpop.f32.mrf.mxu1 }
 0x30b   : > { %3397 = vmatmul.msk.f32.gmra.mxu3 %vm592_vm5, %v4685_v59  ;;  %3407 = vmatmul.msk.f32.gmra.mxu1 %vm592_vm5, %v4685_v59 }
 0x30c   : > { %3417 = vmatmul.msk.f32.gmra.mxu0 %vm592_vm5, %v4780_v5  ;;  %3426 = vmatmul.msk.f32.gmra.mxu2 %vm592_vm5, %v4685_v59  ;;  %v4822_v56 = vpop.f32.mrf.mxu1 }
 0x313   : > { %3430 = vmatmul.msk.f32.vlgmr.msrb.gmra.mxu3 %vm592_vm5, %v4564_v17 }
 0x314   : > { %3427 = vmatmul.msk.f32.gmra.mxu2 %vm592_vm5, %v4780_v5  ;;  %v4830_v54 = vpop.f32.mrf.mxu1 }
 0x319   : > { %v4802_v24 = vpop.f32.mrf.mxu0 }
 0x31a   : > { %5385 = vst [vmem:[#allocation55_spill] sm:$0xff] %v4802_v24  ;;  %v1903_v24 = vadd.f32 %v1881_v27, %v1624_v35 }
 0x31b   : > { %3431 = vmatmul.msk.f32.gmra.mxu3 %vm592_vm5, %v4582_v15 }
 0x31e   : > { %v2072_v22 = vpop.f32.mrf.mxu3 }
 0x31f   : > { %v2257_v10 = vpop.f32.mrf.mxu2  ;;  %v2094_v61 = vadd.f32 %v2072_v22, %v1903_v24  ;;  %v1630_v22 = vadd.f32 %v4516_v23, %v4423_v8  ;;  %v2124_v8 = vpop.f32.mrf.mxu1 }
 0x320   : > { %v2281_v17 = vadd.f32 %v2257_v10, %v2093_v7  ;;  %v1904_v7 = vadd.f32 %v1884_v16, %v1627_v44 }
 0x321   : > { %v4808_v37 = vpop.f32.mrf.mxu0  ;;  %v1905_v24 = vadd.f32 %v1887_v38, %v1630_v22 }
 0x323   : > { %3432 = vmatmul.msk.f32.gmra.mxu3 %vm592_vm5, %v4608_v1 }
 0x326   : > { %v2075_v52 = vpop.f32.mrf.mxu3 }
 0x327   : > { %v2260_v29 = vpop.f32.mrf.mxu2  ;;  %v2095_v9 = vadd.f32 %v2075_v52, %v1904_v7  ;;  %v1636_v7 = vadd.f32 %v4576_v47, %v4448_v26 }
 0x328   : > { %v2282_v15 = vadd.f32 %v2260_v29, %v2094_v61  ;;  %v1906_v61 = vadd.f32 %v1890_v33, %v1633_v43 }
 0x329   : > { %v4816_v60 = vpop.f32.mrf.mxu0 }
 0x32b   : > { %3433 = vmatmul.msk.f32.gmra.mxu3 %vm592_vm5, %v4633_v42 }
 0x32e   : > { %v2078_v53 = vpop.f32.mrf.mxu3 }
 0x32f   : > { %v2263_v10 = vpop.f32.mrf.mxu2  ;;  %v2096_v35 = vadd.f32 %v2078_v53, %v1905_v24 }
 0x330   : > { %v2283_v1 = vadd.f32 %v2263_v10, %v2095_v9  ;;  %v1907_v9 = vadd.f32 %v1893_v30, %v1636_v7 }
 0x331   : > { %v4824_v27 = vpop.f32.mrf.mxu0 }
 0x332   : > { %5386 = vst [vmem:[#allocation56_spill] sm:$0xff] %v4824_v27 }
 0x333   : > { %3434 = vmatmul.msk.f32.gmra.mxu3 %vm592_vm5, %v4651_v63 }
 0x336   : > { %v2081_v41 = vpop.f32.mrf.mxu3 }
 0x337   : > { %v2266_v42 = vpop.f32.mrf.mxu2  ;;  %v2097_v23 = vadd.f32 %v2081_v41, %v1906_v61 }
 0x338   : > { %v2284_v29 = vadd.f32 %v2266_v42, %v2096_v35 }
 0x339   : > { %v4832_v16 = vpop.f32.mrf.mxu0 }
 0x33a   : > { %5387 = vst [vmem:[#allocation57_spill] sm:$0xff] %v4832_v16 }
 0x33b   : > { %3435 = vmatmul.msk.f32.gmra.mxu3 %vm592_vm5, %v4667_v32  ;;  %v2127_v32 = vpop.f32.mrf.mxu1 }
 0x33e   : > { %v2084_v52 = vpop.f32.mrf.mxu3 }
 0x33f   : > { %v2269_v63 = vpop.f32.mrf.mxu2  ;;  %v2098_v53 = vadd.f32 %v2084_v52, %v1907_v9 }
 0x340   : > { %v2285_v38 = vadd.f32 %v2269_v63, %v2097_v23 }
 0x341   : > { %v4838_v44 = vpop.f32.mrf.mxu0 }
 0x342   : > { %5388 = vst [vmem:[#allocation58_spill] sm:$0xff] %v4838_v44 }
 0x343   : > { %3436 = vmatmul.msk.f32.gmra.mxu3 %vm592_vm5, %v4685_v59  ;;  %v2130_v47 = vpop.f32.mrf.mxu1 }
 0x346   : > { %v4844_v28 = vpop.f32.mrf.mxu3 }
 0x347   : > { %v2272_v11 = vpop.f32.mrf.mxu2 }
 0x348   : > { %v4846_v33 = vadd.f32 %v2272_v11, %v2098_v53 }
 0x349   : > { %v4848_v10 = vpop.f32.mrf.mxu0 }
 0x34a   : > { %5389 = vst [vmem:[#allocation59_spill] sm:$0xff] %v4848_v10 }
 0x34b   : > { %3437 = vmatmul.msk.f32.gmra.mxu3 %vm592_vm5, %v4780_v5  ;;  %v2133_v43 = vpop.f32.mrf.mxu1  ;;  %v1714_v5 = vadd.f32 %v4476_v36, %v4562_v49 }
 0x34e   : > { %v4852_v22 = vpop.f32.mrf.mxu3 }
 0x34f   : > { %v4854_v24 = vpop.f32.mrf.mxu2 }
 0x351   : > { %v2445_v26 = vpop.f32.mrf.mxu0 }
 0x352   : > { %v4860_v35 = vadd.f32 %v2445_v26, %v2281_v17  ;;  %v1957_v17 = vadd.f32 %v4669_v45, %v1714_v5  ;;  %v1717_v26 = vadd.f32 %v4483_v50, %v4580_v18  ;;  %v1720_v50 = vadd.f32 %v4495_v62, %v4616_v48 }
 0x354   : > { %v5288_v61 = vrot.slane %v4860_v35, 7  ;;  %v1958_v27 = vadd.f32 %v4698_v0, %v1717_v26 }
 0x356   : > { %v4856_v59 = vpop.f32.mrf.mxu3 }
 0x357   : > { %v4858_v30 = vpop.f32.mrf.mxu2 }
 0x359   : > { %v2448_v41 = vpop.f32.mrf.mxu0 }
 0x35a   : > { %v2470_v42 = vadd.f32 %v2448_v41, %v2282_v15  ;;  %v2146_v15 = vadd.f32 %v2124_v8, %v1957_v17  ;;  %v2136_v41 = vpop.f32.mrf.mxu1  ;;  %v2147_v8 = vadd.f32 %v2127_v32, %v1958_v27  ;;  %v1959_v27 = vadd.f32 %v4714_v57, %v1720_v50 }
 0x35c   : > { %v2582_v23 = vrot.slane %v2470_v42, 7  ;;  %v2148_v48 = vadd.f32 %v2130_v47, %v1959_v27 }
 0x35e   : > { %v2312_v52 = vpop.f32.mrf.mxu3  ;;  %v2595_v63 = vsel %vm1114_vm2, %v5288_v61, %v2582_v23 }
 0x35f   : > { %v4869_v7 = vpop.f32.mrf.mxu2  ;;  %v2334_v42 = vadd.f32 %v2312_v52, %v2146_v15  ;;  %v2598_v61 = vmul.f32 %v2595_v63, %v4027_v13 }
 0x361   : > { %v2451_v9 = vpop.f32.mrf.mxu0 }
 0x362   : > { %v2471_v53 = vadd.f32 %v2451_v9, %v2283_v1  ;;  %v2139_v63 = vpop.f32.mrf.mxu1 }
 0x364   : > { %v2583_v11 = vrot.slane %v2471_v53, 7 }
 0x366   : > { %v2315_v36 = vpop.f32.mrf.mxu3  ;;  %v2594_v49 = vsel %vm1114_vm2, %v2582_v23, %v2583_v11 }
 0x367   : > { %v2500_v10 = vpop.f32.mrf.mxu2  ;;  %v2335_v18 = vadd.f32 %v2315_v36, %v2147_v8  ;;  %v2599_v0 = vmul.f32 %v2594_v49, %v4011_v12 }
 0x368   : > { %v2522_v44 = vadd.f32 %v2500_v10, %v2334_v42  ;;  %v1723_v10 = vadd.f32 %v4542_v31, %v4647_v55  ;;  %v1726_v55 = vadd.f32 %v4566_v25, %v4665_v40 }
 0x369   : > { %v2454_v16 = vpop.f32.mrf.mxu0 }
 0x36a   : > { %v4878_v45 = vadd.f32 %v2598_v61, %v2522_v44  ;;  %v2472_v1 = vadd.f32 %v2454_v16, %v2284_v29  ;;  %v1960_v62 = vadd.f32 %v4728_v51, %v1723_v10  ;;  %v1639_v51 = vadd.f32 %v4606_v21, %v4453_v58  ;;  %v5391_v10 = vld [vmem:[#allocation20_spill] sm:$0xff] }
 0x36b   : > { %v1961_v42 = vadd.f32 %v4742_v20, %v1726_v55  ;;  %v1729_v58 = vadd.f32 %v4592_v39, %v4683_v19  ;;  %v5390_v39 = vld [vmem:[#allocation7_spill] sm:$0xff] }
 0x36c   : > { %v2584_v5 = vrot.slane %v2472_v1, 7  ;;  %v2149_v61 = vadd.f32 %v2133_v43, %v1960_v62  ;;  %v1908_v36 = vadd.f32 %v4812_v6, %v1639_v51  ;;  %v1642_v6 = vadd.f32 %v4639_v4, %v4468_v2  ;;  %v5392_v2 = vld [vmem:[#allocation41_spill] sm:$0xff]  ;;  %v5393_v4 = vld [vmem:[#allocation32_spill] sm:$0xff]  ;;  %v5394_v62 = vld [vmem:[#allocation27_spill] sm:$0xff] }
 0x36d   : > { %v2150_v40 = vadd.f32 %v2136_v41, %v1961_v42 }
 0x36e   : > { %v2318_v52 = vpop.f32.mrf.mxu3  ;;  %v2593_v23 = vsel %vm1114_vm2, %v2583_v11, %v2584_v5  ;;  %v2099_v25 = vadd.f32 %v4844_v28, %v1908_v36  ;;  %v5398_v36 = vld [vmem:[#allocation22_spill] sm:$0xff] }
 0x36f   : > { %v2503_v13 = vpop.f32.mrf.mxu2  ;;  %v2336_v17 = vadd.f32 %v2318_v52, %v2148_v48  ;;  %v2600_v57 = vmul.f32 %v2593_v23, %v4047_v3  ;;  %v1909_v52 = vadd.f32 %v4822_v56, %v1642_v6 }
 0x370   : > { %v2523_v9 = vadd.f32 %v2503_v13, %v2335_v18  ;;  %v1962_v18 = vadd.f32 %v4764_v14, %v1729_v58  ;;  %v1711_v13 = vadd.f32 %v5391_v10, %v5390_v39  ;;  %v5406_v39 = vld [vmem:[#allocation53_spill] sm:$0xff] }
 0x371   : > { %v2457_v44 = vpop.f32.mrf.mxu0 }
 0x372   : > { %v4888_v29 = vadd.f32 %v2599_v0, %v2523_v9  ;;  %v2473_v16 = vadd.f32 %v2457_v44, %v2285_v38  ;;  %v2142_v38 = vpop.f32.mrf.mxu1  ;;  %v2100_v9 = vadd.f32 %v4852_v22, %v1909_v52  ;;  %v1732_v44 = vadd.f32 %v5393_v4, %v5392_v2  ;;  %v5405_v52 = vld [vmem:[#allocation18_spill] sm:$0xff]  ;;  %v5409_v4 = vld [vmem:[#allocation9_spill] sm:$0xff] }
 0x374   : > { %v2585_v32 = vrot.slane %v2473_v16, 7  ;;  %v2288_v14 = vadd.f32 %v4858_v30, %v2100_v9  ;;  %v5397_v30 = vrot.slane %v4860_v35, 7 }
 0x376   : > { %v2321_v53 = vpop.f32.mrf.mxu3  ;;  %v2592_v31 = vsel %vm1114_vm2, %v2584_v5, %v2585_v32  ;;  %v2287_v5 = vadd.f32 %v4854_v24, %v2099_v25  ;;  %v2151_v24 = vadd.f32 %v2139_v63, %v1962_v18 }
 0x377   : > { %v2337_v12 = vadd.f32 %v2321_v53, %v2149_v61  ;;  %v2506_v15 = vpop.f32.mrf.mxu2  ;;  %v2601_v20 = vmul.f32 %v2592_v31, %v4089_v46  ;;  %v5396_v53 = vld [vmem:[#allocation50_spill] sm:$0xff] }
 0x378   : > { %v2524_v11 = vadd.f32 %v2506_v15, %v2336_v17  ;;  %v1963_v31 = vadd.f32 %v5396_v53, %v1732_v44  ;;  %v5410_v44 = vld [vmem:[#allocation39_spill] sm:$0xff] }
 0x379   : > { %v2460_v26 = vpop.f32.mrf.mxu0 }
 0x37a   : > { %v4898_v47 = vadd.f32 %v2600_v57, %v2524_v11  ;;  %v2474_v43 = vadd.f32 %v2460_v26, %v4846_v33  ;;  %v2361_v23 = vpop.f32.mrf.mxu1  ;;  %v2152_v15 = vadd.f32 %v2142_v38, %v1963_v31  ;;  %v5399_v38 = vld [vmem:[#allocation16_spill] sm:$0xff] }
 0x37b   : > { %v5412_v31 = vld [vmem:[#allocation24_spill] sm:$0xff] }
 0x37c   : > { %v2586_v49 = vrot.slane %v2474_v43, 7 }
 0x37e   : > { %v2324_v1 = vpop.f32.mrf.mxu3  ;;  %v2591_v3 = vsel %vm1114_vm2, %v2585_v32, %v2586_v49  ;;  %v5395_v32 = vld [vmem:[#allocation34_spill] sm:$0xff] }
 0x37f   : > { %v2338_v21 = vadd.f32 %v2324_v1, %v2150_v40  ;;  %v2509_v8 = vpop.f32.mrf.mxu2  ;;  %v2602_v48 = vmul.f32 %v2591_v3, %v5394_v62  ;;  %v1956_v61 = vadd.f32 %v5395_v32, %v1711_v13  ;;  %v5401_v3 = vld [vmem:[#allocation35_spill] sm:$0xff]  ;;  %v5407_v13 = vld [vmem:[#allocation40_spill] sm:$0xff] }
 0x380   : > { %v2525_v33 = vadd.f32 %v2509_v8, %v2337_v12  ;;  %v5402_v8 = vld [vmem:[#allocation19_spill] sm:$0xff] }
 0x381   : > { %v2463_v50 = vpop.f32.mrf.mxu0  ;;  %v2145_v55 = vadd.f32 %v4830_v54, %v1956_v61 }
 0x382   : > { %v4912_v41 = vadd.f32 %v2601_v20, %v2525_v33  ;;  %v2475_v28 = vadd.f32 %v2463_v50, %v2287_v5  ;;  %v2364_v57 = vpop.f32.mrf.mxu1  ;;  %v5403_v5 = vld [vmem:[#allocation37_spill] sm:$0xff]  ;;  %v5404_v20 = vld [vmem:[#allocation38_spill] sm:$0xff] }
 0x383   : > { %v2333_v11 = vadd.f32 %v4856_v59, %v2145_v55  ;;  %v5400_v59 = vld [vmem:[#allocation15_spill] sm:$0xff]  ;;  %v1804_v33 = vadd.f32 %v5403_v5, %v5402_v8 }
 0x384   : > { %v2587_v19 = vrot.slane %v2475_v28, 7  ;;  %v1801_v58 = vadd.f32 %v5401_v3, %v5400_v59  ;;  %v5419_v5 = vld [vmem:[#allocation47_spill] sm:$0xff] }
 0x385   : > { %v2521_v42 = vadd.f32 %v4869_v7, %v2333_v11 }
 0x386   : > { %v2327_v46 = vpop.f32.mrf.mxu3  ;;  %v2590_v0 = vsel %vm1114_vm2, %v2586_v49, %v2587_v19  ;;  %v2010_v50 = vadd.f32 %v5404_v20, %v1801_v58 }
 0x387   : > { %v2339_v27 = vadd.f32 %v2327_v46, %v2151_v24  ;;  %v2512_v16 = vpop.f32.mrf.mxu2  ;;  %v2603_v1 = vmul.f32 %v2590_v0, %v5399_v38  ;;  %v2011_v24 = vadd.f32 %v5407_v13, %v1804_v33  ;;  %v5408_v46 = vld [vmem:[#allocation55_spill] sm:$0xff]  ;;  %v5417_v38 = vld [vmem:[#allocation30_spill] sm:$0xff] }
 0x388   : > { %v2526_v56 = vadd.f32 %v2512_v16, %v2338_v21  ;;  %v2197_v10 = vadd.f32 %v5406_v39, %v2010_v50  ;;  %v5420_v50 = vld [vmem:[#allocation56_spill] sm:$0xff] }
 0x389   : > { %v2466_v17 = vpop.f32.mrf.mxu0  ;;  %v2198_v0 = vadd.f32 %v5408_v46, %v2011_v24 }
 0x38a   : > { %v4926_v63 = vadd.f32 %v2602_v48, %v2526_v56  ;;  %v2476_v22 = vadd.f32 %v2466_v17, %v2288_v14  ;;  %v2367_v28 = vpop.f32.mrf.mxu1  ;;  %v2385_v2 = vadd.f32 %v2361_v23, %v2197_v10  ;;  %v5411_v48 = vld [vmem:[#allocation43_spill] sm:$0xff] }
 0x38b   : > { %v2386_v16 = vadd.f32 %v2364_v57, %v2198_v0  ;;  %v5424_v0 = vld [vmem:[#allocation49_spill] sm:$0xff] }
 0x38c   : > { %v2588_v12 = vrot.slane %v2476_v22, 7 }
 0x38e   : > { %v2596_v26 = vsel %vm1114_vm2, %v2588_v12, %v5397_v30  ;;  %v2330_v51 = vpop.f32.mrf.mxu3  ;;  %v2589_v43 = vsel %vm1114_vm2, %v2587_v19, %v2588_v12  ;;  %v5413_v12 = vld [vmem:[#allocation29_spill] sm:$0xff] }
 0x38f   : > { %v2597_v49 = vmul.f32 %v2596_v26, %v5398_v36  ;;  %v2340_v40 = vadd.f32 %v2330_v51, %v2152_v15  ;;  %v2515_v54 = vpop.f32.mrf.mxu2  ;;  %v2604_v19 = vmul.f32 %v2589_v43, %v5405_v52  ;;  %v5414_v15 = vld [vmem:[#allocation42_spill] sm:$0xff]  ;;  %v5415_v43 = vld [vmem:[#allocation45_spill] sm:$0xff] }
 0x390   : > { %v2527_v25 = vadd.f32 %v2515_v54, %v2339_v27  ;;  %v1807_v27 = vadd.f32 %v5410_v44, %v5409_v4  ;;  %v1810_v11 = vadd.f32 %v5414_v15, %v5413_v12  ;;  %v5416_v54 = vld [vmem:[#allocation23_spill] sm:$0xff]  ;;  %v5423_v52 = vld [vmem:[#allocation46_spill] sm:$0xff]  ;;  %v5425_v44 = vld [vmem:[#allocation57_spill] sm:$0xff] }
 0x391   : > { %v2629_v35 = vadd.f32 %v2597_v49, %v2521_v42 }
 0x392   : > { %v4942_v21 = vadd.f32 %v2603_v1, %v2527_v25  ;;  %v2012_v32 = vadd.f32 %v5411_v48, %v1807_v27  ;;  %v2370_v22 = vpop.f32.mrf.mxu1  ;;  %v2013_v42 = vadd.f32 %v5415_v43, %v1810_v11  ;;  %v5418_v1 = vld [vmem:[#allocation44_spill] sm:$0xff] }
 0x393   : > { %v1813_v59 = vadd.f32 %v5418_v1, %v5417_v38  ;;  %v5433_v38 = vld [vmem:[#allocation51_spill] sm:$0xff] }
 0x394   : > { %v2199_v53 = vadd.f32 %v4808_v37, %v2012_v32  ;;  %v2200_v49 = vadd.f32 %v4816_v60, %v2013_v42  ;;  %v5427_v32 = vld [vmem:[#allocation33_spill] sm:$0xff] }
 0x395   : > { %v2014_v33 = vadd.f32 %v5419_v5, %v1813_v59 }
 0x396   : > { %v2549_v6 = vpop.f32.mrf.mxu3  ;;  %v2387_v57 = vadd.f32 %v2367_v28, %v2199_v53  ;;  %v2388_v3 = vadd.f32 %v2370_v22, %v2200_v49  ;;  %v5421_v28 = vld [vmem:[#allocation25_spill] sm:$0xff] }
 0x397   : > { %v2518_v7 = vpop.f32.mrf.mxu2  ;;  %v4955_v14 = vadd.f32 %v2549_v6, %v2385_v2  ;;  %v2201_v6 = vadd.f32 %v5420_v50, %v2014_v33 }
 0x398   : > { %v2528_v18 = vadd.f32 %v2518_v7, %v2340_v40  ;;  %v4982_v7 = vld [vmem:[%s5242_s16 + $0x8] sm:$0xff] }
 0x399   : > { %v2605_v61 = vrot.slane %v4955_v14, 1  ;;  %2774 = vmatpush.msra.mxu1 %v4982_v7 }
 0x39a   : > { %v4950_v9 = vadd.f32 %v2604_v19, %v2528_v18  ;;  %v2373_v40 = vpop.f32.mrf.mxu1 }
 0x39b   : > { %v2389_v39 = vadd.f32 %v2373_v40, %v2201_v6  ;;  %v5431_v40 = vld [vmem:[#allocation28_spill] sm:$0xff]  ;;  %v5434_v6 = vld [vmem:[#allocation54_spill] sm:$0xff] }
 0x39e   : > { %v2552_v56 = vpop.f32.mrf.mxu3 }
 0x39f   : > { %v2574_v62 = vadd.f32 %v2552_v56, %v2386_v16  ;;  %v4994_v16 = vld [vmem:[%s5235_s9] ss:$0 sm:$0xff] }
 0x3a1   : > { %v2606_v17 = vrot.slane %v2574_v62, 1  ;;  %v5426_v62 = vld [vmem:[#allocation26_spill] sm:$0xff] }
 0x3a2   : > { %v2376_v10 = vpop.f32.mrf.mxu1 }
 0x3a3   : > { %v2619_v23 = vsel %vm1179_vm3, %v2605_v61, %v2606_v17 }
 0x3a4   : > { %v2621_v55 = vmul.f32 %v2619_v23, %v5412_v31 }
 0x3a6   : > { %v2637_v30 = vadd.f32 %v2629_v35, %v2621_v55  ;;  %v2555_v26 = vpop.f32.mrf.mxu3 }
 0x3a7   : > { %v2575_v51 = vadd.f32 %v2555_v26, %v2387_v57  ;;  %v5429_v57 = vld [vmem:[#allocation52_spill] sm:$0xff] }
 0x3a8   : > { %v5006_v55 = vadd.f32 %v4994_v16, %v2637_v30 }
 0x3a9   : > { %v2607_v36 = vrot.slane %v2575_v51, 1 }
 0x3aa   : > { %v2379_v15 = vpop.f32.mrf.mxu1 }
 0x3ab   : > { %v2618_v37 = vsel %vm1179_vm3, %v2606_v17, %v2607_v36  ;;  %v5428_v17 = vld [vmem:[#allocation48_spill] sm:$0xff] }
 0x3ac   : > { %v2622_v25 = vmul.f32 %v2618_v37, %v5416_v54 }
 0x3ae   : > { %v2638_v58 = vadd.f32 %v4878_v45, %v2622_v25  ;;  %v2558_v35 = vpop.f32.mrf.mxu3  ;;  %v5422_v45 = vld [vmem:[#allocation31_spill] sm:$0xff]  ;;  %v5432_v25 = vld [vmem:[#allocation36_spill] sm:$0xff] }
 0x3af   : > { %v2576_v8 = vadd.f32 %v2558_v35, %v2388_v3  ;;  %v1816_v19 = vadd.f32 %v5423_v52, %v5422_v45  ;;  %v1822_v1 = vadd.f32 %v5433_v38, %v5432_v25 }
 0x3b0   : > { %v5002_v53 = vadd.f32 %v4994_v16, %v2638_v58 }
 0x3b1   : > { %v2608_v20 = vrot.slane %v2576_v8, 1  ;;  %v2015_v2 = vadd.f32 %v5424_v0, %v1816_v19  ;;  %v5435_v19 = vld [vmem:[#allocation59_spill] sm:$0xff] }
 0x3b2   : > { %v2666_v51 = vmin.f32 %v5002_v53, 0.0  ;;  %vm2658_vm2 = vcmp.gt.f32.partialorder %v5002_v53, 0.0 }
 0x3b3   : > { %v2617_v60 = vsel %vm1179_vm3, %v2607_v36, %v2608_v20  ;;  %v2202_v27 = vadd.f32 %v5425_v44, %v2015_v2  ;;  %v5430_v36 = vld [vmem:[#allocation58_spill] sm:$0xff] }
 0x3b4   : > { %v2623_v18 = vmul.f32 %v2617_v60, %v5421_v28  ;;  %v2675_v3 = vmul.f32 1.442695, %v2666_v51  ;;  %v2017_v60 = vadd.f32 %v5434_v6, %v1822_v1 }
 0x3b5   : > { %v2390_v22 = vadd.f32 %v2376_v10, %v2202_v27  ;;  %v2755_v27 = vld [vmem:[%s5242_s16] sm:$0xff] }
 0x3b6   : > { %v2639_v13 = vadd.f32 %v4888_v29, %v2623_v18  ;;  %v2561_v24 = vpop.f32.mrf.mxu3  ;;  %v1819_v29 = vadd.f32 %v5428_v17, %v5427_v32  ;;  %3518 = vpow2.f32 %v2675_v3  ;;  %v2382_v18 = vpop.f32.mrf.mxu1  ;;  %2775 = vmatpush.msra.mxu1 %v2755_v27 }
 0x3b7   : > { %v2577_v46 = vadd.f32 %v2561_v24, %v2389_v39  ;;  %v2204_v39 = vadd.f32 %v5435_v19, %v2017_v60 }
 0x3b8   : > { %v5009_v11 = vadd.f32 %v4994_v16, %v2639_v13  ;;  %v2016_v26 = vadd.f32 %v5429_v57, %v1819_v29  ;;  %v5436_v13 = vld [vmem:[#allocation13_spill] sm:$0xff]  ;;  %2798 = vmatpush.msrb.mxu1 %v4982_v7 }
 0x3b9   : > { %v2609_v4 = vrot.slane %v2577_v46, 1  ;;  %v2392_v46 = vadd.f32 %v2382_v18, %v2204_v39 }
 0x3ba   : > { %v2203_v49 = vadd.f32 %v5430_v36, %v2016_v26  ;;  %v2667_v37 = vmin.f32 %v5009_v11, 0.0  ;;  %2799 = vmatpush.msrb.mxu1 %v2755_v27  ;;  %v5438_v26 = vld [vmem:[#allocation21_spill] sm:$0xff]  ;;  %vm2659_vm7 = vcmp.gt.f32.partialorder %v5009_v11, 0.0 }
 0x3bb   : > { %v2616_v56 = vsel %vm1179_vm3, %v2608_v20, %v2609_v4 }
 0x3bc   : > { %v2624_v48 = vmul.f32 %v2616_v56, %v5426_v62  ;;  %v2391_v59 = vadd.f32 %v2379_v15, %v2203_v49  ;;  %v2677_v20 = vmul.f32 1.442695, %v2667_v37  ;;  %v5437_v15 = vld [vmem:[#allocation14_spill] sm:$0xff] }
 0x3be   : > { %v2640_v23 = vadd.f32 %v4898_v47, %v2624_v48  ;;  %v2564_v31 = vpop.f32.mrf.mxu3  ;;  %v2665_v47 = vmin.f32 %v5006_v55, 0.0 }
 0x3bf   : > { %v2578_v12 = vadd.f32 %v2564_v31, %v2390_v22 }
 0x3c0   : > { %v5014_v42 = vadd.f32 %v4994_v16, %v2640_v23  ;;  %v2673_v5 = vmul.f32 1.442695, %v2665_v47 }
 0x3c1   : > { %v2610_v43 = vrot.slane %v2578_v12, 1 }
 0x3c2   : > { %v2668_v58 = vmin.f32 %v5014_v42, 0.0  ;;  %3520 = vpow2.f32 %v2673_v5  ;;  %vm2660_vm8 = vcmp.gt.f32.partialorder %v5014_v42, 0.0 }
 0x3c3   : > { %v2615_v30 = vsel %vm1179_vm3, %v2609_v4, %v2610_v43  ;;  %3522 = vpow2.f32 %v2677_v20  ;;  %v3519_v4 = vpop.eup %3518 }
 0x3c4   : > { %v2625_v54 = vmul.f32 %v2615_v30, %v5431_v40  ;;  %v2679_v45 = vmul.f32 1.442695, %v2668_v58  ;;  %v3439_v17 = vadd.f32 -1.0, %v3519_v4 }
 0x3c6   : > { %v2641_v35 = vadd.f32 %v4912_v41, %v2625_v54  ;;  %v2567_v8 = vpop.f32.mrf.mxu3  ;;  %3524 = vpow2.f32 %v2679_v45  ;;  %v5051_v36 = vsel %vm2658_vm2, %v5002_v53, %v3439_v17 }
 0x3c7   : > { %v2579_v33 = vadd.f32 %v2567_v8, %v2391_v59  ;;  %v2727_v53 = vmul.f32 %v5051_v36, %v5051_v36  ;;  %v2706_v38 = vsel %vm592_vm5, %v5051_v36, 0.0 }
 0x3c8   : > { %v5027_v50 = vadd.f32 %v4994_v16, %v2641_v35  ;;  %v3521_v62 = vpop.eup %3520 }
 0x3c9   : > { %v2611_v28 = vrot.slane %v2579_v33, 1  ;;  %v3523_v32 = vpop.eup %3522  ;;  %v3438_v31 = vadd.f32 -1.0, %v3521_v62  ;;  %v2735_v59 = vsel %vm592_vm5, %v2727_v53, 0.0 }
 0x3ca   : > { %v2669_v52 = vmin.f32 %v5027_v50, 0.0  ;;  %v3440_v7 = vadd.f32 -1.0, %v3523_v32  ;;  %vm2661_vm9 = vcmp.gt.f32.partialorder %v5027_v50, 0.0 }
 0x3cb   : > { %v2614_v41 = vsel %vm1179_vm3, %v2610_v43, %v2611_v28 }
 0x3cc   : > { %v2681_v10 = vmul.f32 1.442695, %v2669_v52  ;;  %v2626_v24 = vmul.f32 %v2614_v41, %v5436_v13  ;;  %v3525_v23 = vpop.eup %3524  ;;  %v5065_v37 = vsel %vm2659_vm7, %v5009_v11, %v3440_v7 }
 0x3cd   : > { %v2728_v11 = vmul.f32 %v5065_v37, %v5065_v37 }
 0x3ce   : > { %v2642_v0 = vadd.f32 %v4926_v63, %v2626_v24  ;;  %v2570_v2 = vpop.f32.mrf.mxu3  ;;  %3526 = vpow2.f32 %v2681_v10 }
 0x3cf   : > { %v2580_v44 = vadd.f32 %v2570_v2, %v2392_v46  ;;  %v2737_v6 = vsel %vm592_vm5, %v2728_v11, 0.0  ;;  %v3547_v11 = vld [vmem:[%s3692_s26 + $0x18] sm:$0xff] }
 0x3d0   : > { %v2654_v56 = vadd.f32 %v4994_v16, %v2642_v0 }
 0x3d1   : > { %v2612_v48 = vrot.slane %v2580_v44, 1 }
 0x3d2   : > { %v2670_v29 = vmin.f32 %v2654_v56, 0.0  ;;  %vm2662_vm10 = vcmp.gt.f32.partialorder %v2654_v56, 0.0 }
 0x3d3   : > { %v2613_v63 = vsel %vm1179_vm3, %v2611_v28, %v2612_v48  ;;  %v2620_v22 = vsel %vm1179_vm3, %v2612_v48, %v2605_v61  ;;  %vm2657_vm3 = vcmp.gt.f32.partialorder %v5006_v55, 0.0  ;;  %v3441_v61 = vadd.f32 -1.0, %v3525_v23 }
 0x3d4   : > { %v2683_v12 = vmul.f32 1.442695, %v2670_v29  ;;  %v2627_v57 = vmul.f32 %v2613_v63, %v5437_v15  ;;  %v2628_v51 = vmul.f32 %v2620_v22, %v5438_v26  ;;  %v3527_v43 = vpop.eup %3526  ;;  %v5057_v49 = vsel %vm2657_vm3, %v5006_v55, %v3438_v31 }
 0x3d5   : > { %v2705_v55 = vsel %vm592_vm5, %v5057_v49, 0.0  ;;  %v2726_v40 = vmul.f32 %v5057_v49, %v5057_v49  ;;  %v5073_v54 = vsel %vm2660_vm8, %v5014_v42, %v3441_v61  ;;  %v2708_v42 = vsel %vm592_vm5, %v5065_v37, 0.0 }
 0x3d6   : > { %3528 = vpow2.f32 %v2683_v12  ;;  %v2643_v14 = vadd.f32 %v4942_v21, %v2627_v57  ;;  %v2644_v34 = vadd.f32 %v4950_v9, %v2628_v51  ;;  %v3442_v21 = vadd.f32 -1.0, %v3527_v43 }
 0x3d7   : > { %v2729_v8 = vmul.f32 %v5073_v54, %v5073_v54  ;;  %v2707_v5 = vadd.f32 %v2706_v38, %v2705_v55  ;;  %v2734_v20 = vsel %vm592_vm5, %v2726_v40, 0.0  ;;  %v2808_v55 = vld [vmem:[%s5243_s17] sm:$0xff]  ;;  %v3546_v38 = vld [vmem:[%s3692_s26 + $0x10] sm:$0xff] }
 0x3d8   : > { %v2655_v47 = vadd.f32 %v4994_v16, %v2643_v14  ;;  %v2656_v30 = vadd.f32 %v4994_v16, %v2644_v34  ;;  %v5082_v3 = vsel %vm2661_vm9, %v5027_v50, %v3442_v21  ;;  %v2710_v50 = vsel %vm592_vm5, %v5073_v54, 0.0 }
 0x3d9   : > { %v2730_v60 = vmul.f32 %v5082_v3, %v5082_v3  ;;  %v2736_v28 = vadd.f32 %v2735_v59, %v2734_v20  ;;  %v2709_v18 = vadd.f32 %v2708_v42, %v2707_v5  ;;  %v2739_v45 = vsel %vm592_vm5, %v2729_v8, 0.0  ;;  %v5439_v59 = vld [vmem:[#allocation17_spill] sm:$0xff]  ;;  %v3548_v42 = vld [vmem:[%s3692_s26 + $0x20] sm:$0xff] }
 0x3da   : > { %v2671_v9 = vmin.f32 %v2655_v47, 0.0  ;;  %v2672_v16 = vmin.f32 %v2656_v30, 0.0  ;;  %v2712_v52 = vsel %vm592_vm5, %v5082_v3, 0.0  ;;  %vm2663_vm11 = vcmp.gt.f32.partialorder %v2655_v47, 0.0  ;;  %v2891_v8 = vld [vmem:[%s5239_s13] sm:$0xff] }
 0x3db   : > { %v2738_v39 = vadd.f32 %v2737_v6, %v2736_v28  ;;  %v2711_v41 = vadd.f32 %v2710_v50, %v2709_v18  ;;  %v2741_v13 = vsel %vm592_vm5, %v2730_v60, 0.0  ;;  %vm2664_vm12 = vcmp.gt.f32.partialorder %v2656_v30, 0.0  ;;  %v3549_v50 = vld [vmem:[%s3692_s26 + $0x28] sm:$0xff]  ;;  %v3550_v18 = vld [vmem:[%s3692_s26 + $0x30] sm:$0xff] }
 0x3dc   : > { %v3529_v25 = vpop.eup %3528  ;;  %v2685_v1 = vmul.f32 1.442695, %v2671_v9  ;;  %v2687_v35 = vmul.f32 1.442695, %v2672_v16 }
 0x3dd   : > { %v3443_v58 = vadd.f32 -1.0, %v3529_v25  ;;  %v2740_v0 = vadd.f32 %v2739_v45, %v2738_v39  ;;  %v2713_v2 = vadd.f32 %v2712_v52, %v2711_v41  ;;  %v2890_v25 = vld [vmem:[%s5238_s12] sm:$0xf]  ;;  %v5440_v45 = vld [vmem:[#allocation5_spill] sm:$0xff]  ;;  %v3551_v52 = vld [vmem:[%s3692_s26 + $0x38] sm:$0xff] }
 0x3de   : > { %3530 = vpow2.f32 %v2685_v1  ;;  %3458 = vmatpush.msk.msrb.mxu0 %vm638_vm0, %v2890_v25  ;;  %v3552_v39 = vld [vmem:[%s3692_s26 + $0x40] sm:$0xff]  ;;  %v5442_v41 = vld [vmem:[#allocation6_spill] sm:$0xff] }
 0x3df   : > { %v5088_v33 = vsel %vm2662_vm10, %v2654_v56, %v3443_v58  ;;  %3532 = vpow2.f32 %v2687_v35  ;;  %v2742_v56 = vadd.f32 %v2741_v13, %v2740_v0  ;;  %3459 = vmatmul.msk.f32.vlgmr.msrb.gmra.mxu0 %vm613_vm1, %v3546_v38  ;;  %v2892_v35 = vld [vmem:[%s5239_s13 + $0x8] sm:$0xff]  ;;  %v5445_v0 = vld [vmem:[#allocation11_spill] sm:$0xff] }
 0x3e0   : > { %v2731_v19 = vmul.f32 %v5088_v33, %v5088_v33  ;;  %v2714_v24 = vsel %vm592_vm5, %v5088_v33, 0.0  ;;  %v5443_v13 = vld [vmem:[#allocation8_spill] sm:$0xff] }
 0x3e1   : > { %v2715_v62 = vadd.f32 %v2714_v24, %v2713_v2  ;;  %v3003_v24 = vld [vmem:[%s5240_s14 + $0x8] sm:$0xff] }
 0x3e2   : > { %v2743_v44 = vsel %vm592_vm5, %v2731_v19, 0.0  ;;  %v5441_v19 = vld [vmem:[#allocation3_spill] sm:$0xff]  ;;  %3042 = vmatpush.msra.mxu2 %v3003_v24  ;;  %v5446_v2 = vld [vmem:[#allocation4_spill] sm:$0xff] }
 0x3e3   : > { %v2744_v63 = vadd.f32 %v2743_v44, %v2742_v56  ;;  %v3002_v44 = vld [vmem:[%s5240_s14] sm:$0xff] }
 0x3e4   : > { %v3531_v10 = vpop.eup %3530  ;;  %3043 = vmatpush.msra.mxu2 %v3002_v44 }
 0x3e5   : > { %v3533_v46 = vpop.eup %3532  ;;  %v3444_v4 = vadd.f32 -1.0, %v3531_v10  ;;  %v3553_v10 = vld [vmem:[%s3692_s26 + $0x48] sm:$0xff]  ;;  %s5205_s26 = scalar_lea.vmem %s5244_s18, %s3477_s23 }
 0x3e6   : > { %v3445_v27 = vadd.f32 -1.0, %v3533_v46  ;;  %v5444_v46 = vld [vmem:[#allocation10_spill] sm:$0xff] }
 0x3e7   : > { %v5105_v48 = vsel %vm2663_vm11, %v2655_v47, %v3444_v4  ;;  %3460 = vmatmul.msk.f32.gmra.mxu0 %vm613_vm1, %v3547_v11  ;;  %v5447_v4 = vld [vmem:[#allocation12_spill] sm:$0xff] }
 0x3e8   : > { %v5107_v32 = vsel %vm2664_vm12, %v2656_v30, %v3445_v27  ;;  %v2716_v17 = vsel %vm592_vm5, %v5105_v48, 0.0  ;;  %v2732_v29 = vmul.f32 %v5105_v48, %v5105_v48 }
 0x3e9   : > { %v2717_v22 = vadd.f32 %v2716_v17, %v2715_v62  ;;  %v2733_v23 = vmul.f32 %v5107_v32, %v5107_v32  ;;  %v2718_v31 = vsel %vm592_vm5, %v5107_v32, 0.0 }
 0x3ea   : > { %v2745_v12 = vsel %vm592_vm5, %v2732_v29, 0.0 }
 0x3eb   : > { %v2719_v15 = vadd.f32 %v2718_v31, %v2717_v22  ;;  %v2746_v57 = vadd.f32 %v2745_v12, %v2744_v63  ;;  %v2747_v26 = vsel %vm592_vm5, %v2733_v23, 0.0  ;;  %v2865_v12 = vld [vmem:[%s5236_s10] sm:$0x1] }
 0x3ed   : > { %v2720_v51 = vrot.slane %v2719_v15, 4  ;;  %v2748_v7 = vadd.f32 %v2747_v26, %v2746_v57  ;;  %v2867_v26 = vld [vmem:[%s5237_s11] sm:$0x1] }
 0x3ef   : > { %v2721_v43 = vadd.f32 %v2720_v51, %v2719_v15  ;;  %v2749_v14 = vrot.slane %v2748_v7, 4  ;;  %3461 = vmatmul.msk.f32.gmra.mxu0 %vm613_vm1, %v3548_v42 }
 0x3f1   : > { %v2722_v34 = vrot.slane %v2721_v43, 2  ;;  %v2750_v61 = vadd.f32 %v2749_v14, %v2748_v7 }
 0x3f3   : > { %v2723_v47 = vadd.f32 %v2722_v34, %v2721_v43  ;;  %v2751_v30 = vrot.slane %v2750_v61, 2 }
 0x3f5   : > { %v2724_v53 = vrot.slane %v2723_v47, 1  ;;  %v2752_v9 = vadd.f32 %v2751_v30, %v2750_v61 }
 0x3f7   : > { %v2725_v21 = vadd.f32 %v2724_v53, %v2723_v47  ;;  %v2753_v40 = vrot.slane %v2752_v9, 1  ;;  %3462 = vmatmul.msk.f32.gmra.mxu0 %vm613_vm1, %v3549_v50 }
 0x3f9   : > { %3446 = vmatmul.msk.f32.vlgmr.msra.gmra.mxu1 %vm592_vm5, %v2725_v21  ;;  %v2754_v16 = vadd.f32 %v2753_v40, %v2752_v9 }
 0x3fa   : > { %2827 = vmatpush.msra.mxu1 %v2808_v55 }
 0x3ff   : > { %3463 = vmatmul.msk.f32.gmra.mxu0 %vm613_vm1, %v3550_v18 }
 0x401   : > { %3447 = vmatmul.msk.f32.vlgmr.msrb.gmra.mxu1 %vm592_vm5, %v2754_v16 }
 0x402   : > { %2850 = vmatpush.msrb.mxu1 %v2808_v55 }
 0x407   : > { %3464 = vmatmul.msk.f32.gmra.mxu0 %vm613_vm1, %v3551_v52 }
 0x40f   : > { %3465 = vmatmul.msk.f32.gmra.mxu0 %vm613_vm1, %v3552_v39 }
 0x417   : > { %3466 = vmatmul.msk.f32.gmra.mxu0 %vm613_vm1, %v3553_v10 }
 0x476   : > { %v2777_v1 = vpop.f32.mrf.mxu1 }
 0x477   : > { %v2780_v58 = vmul.f32 %v2777_v1, %v5439_v59 }
 0x479   : > { %3448 = vmatmul.msk.f32.vlgmr.msra.gmra.mxu1 %vm1423_vm14, %v2780_v58  ;;  %v2805_v20 = vmul.f32 %v2780_v58, %v2780_v58 }
 0x47a   : > { %2931 = vmatpush.msra.mxu1 %v2892_v35 }
 0x47c   : > { %2932 = vmatpush.msra.mxu1 %v2891_v8 }
 0x47e   : > { %v2801_v5 = vpop.f32.mrf.mxu1 }
 0x47f   : > { %v2804_v6 = vmul.f32 %v2801_v5, %v5439_v59 }
 0x481   : > { %v2806_v60 = vsub.f32 %v2804_v6, %v2805_v20 }
 0x483   : > { %v2807_v28 = vmax.f32 %v2806_v60, 0.0 }
 0x485   : > { %3449 = vmatmul.msk.f32.vlgmr.msrb.gmra.mxu1 %vm1423_vm14, %v2807_v28 }
 0x48d   : > { %3450 = vmatmul.msk.f32.vlgmr.msra.gmra.mxu1 %vm592_vm5, %v5440_v45 }
 0x495   : > { %3451 = vmatmul.msk.f32.gmra.mxu1 %vm592_vm5, %v5441_v19 }
 0x49d   : > { %3452 = vmatmul.msk.f32.gmra.mxu1 %vm592_vm5, %v5442_v41 }
 0x4a5   : > { %3453 = vmatmul.msk.f32.gmra.mxu1 %vm592_vm5, %v5443_v13 }
 0x4ad   : > { %3454 = vmatmul.msk.f32.gmra.mxu1 %vm592_vm5, %v5444_v46 }
 0x4b5   : > { %3455 = vmatmul.msk.f32.gmra.mxu1 %vm592_vm5, %v5445_v0 }
 0x4bd   : > { %3456 = vmatmul.msk.f32.gmra.mxu1 %vm592_vm5, %v5446_v2 }
 0x4c5   : > { %3457 = vmatmul.msk.f32.gmra.mxu1 %vm592_vm5, %v5447_v4 }
 0x4f6   : > { %v2829_v27 = vpop.f32.mrf.mxu1 }
 0x502   : > { %v2852_v56 = vpop.f32.mrf.mxu1 }
 0x503   : > { %v2853_v62 = vadd.f32 1e-05, %v2852_v56 }
 0x505   : > { %3534 = vrsqrt.f32 %v2853_v62  ;;  %vm2861_vm1 = vweird.f32 %v2853_v62 }
 0x50a   : > { %v2934_v11 = vpop.f32.mrf.mxu1 }
 0x50b   : > { %v3535_v17 = vpop.eup %3534 }
 0x50c   : > { %v2856_v29 = vmul.f32 %v3535_v17, %v2853_v62  ;;  %vm2862_vm0 = vweird.f32 %v3535_v17 }
 0x50d   : > { %vm2863_vm13 = vmor %vm2861_vm1, %vm2862_vm0 }
 0x50e   : > { %v2857_v63 = vmul.f32 %v3535_v17, %v2856_v29 }
 0x510   : > { %v2858_v22 = vmul.f32 0.5, %v2857_v63 }
 0x512   : > { %v2859_v23 = vsub.f32 1.5, %v2858_v22  ;;  %v2937_v59 = vpop.f32.mrf.mxu1 }
 0x514   : > { %v2860_v31 = vmul.f32 %v3535_v17, %v2859_v23 }
 0x516   : > { %v2864_v15 = vsel %vm2863_vm13, %v3535_v17, %v2860_v31 }
 0x517   : > { %v2866_v57 = vmul.f32 %v2865_v12, %v2864_v15 }
 0x519   : > { %v2868_v51 = vmul.f32 %v2866_v57, %v2829_v27  ;;  %v2870_v7 = vperm.slane %v2866_v57, 0 }
 0x51a   : > { %v2940_v8 = vpop.f32.mrf.mxu1 }
 0x51b   : > { %v2869_v43 = vsub.f32 %v2867_v26, %v2868_v51  ;;  %v2871_v34 = vmul.f32 %v2870_v7, %v5057_v49  ;;  %v2872_v47 = vmul.f32 %v2870_v7, %v5051_v36  ;;  %v2873_v53 = vmul.f32 %v2870_v7, %v5065_v37 }
 0x51c   : > { %v2874_v9 = vmul.f32 %v2870_v7, %v5073_v54  ;;  %v2875_v49 = vmul.f32 %v2870_v7, %v5082_v3  ;;  %v2876_v36 = vmul.f32 %v2870_v7, %v5088_v33  ;;  %v2877_v37 = vmul.f32 %v2870_v7, %v5105_v48  ;;  %v2978_v3 = vpop.f32.mrf.mxu0  ;;  %v3497_v33 = vld [vmem:[%s5241_s15] ss:$0 sm:$0xff] }
 0x51d   : > { %v2880_v14 = vperm.slane %v2869_v43, 0  ;;  %v2878_v54 = vmul.f32 %v2870_v7, %v5107_v32  ;;  %v2979_v58 = vadd.f32 %v2978_v3, %v2934_v11 }
 0x51f   : > { %v2882_v61 = vadd.f32 %v2880_v14, %v2871_v34  ;;  %v2883_v30 = vadd.f32 %v2880_v14, %v2872_v47  ;;  %v2884_v21 = vadd.f32 %v2880_v14, %v2873_v53  ;;  %v2885_v55 = vadd.f32 %v2880_v14, %v2874_v9 }
 0x520   : > { %v2886_v40 = vadd.f32 %v2880_v14, %v2875_v49  ;;  %v2887_v16 = vadd.f32 %v2880_v14, %v2876_v36  ;;  %v2888_v25 = vadd.f32 %v2880_v14, %v2877_v37  ;;  %v2889_v38 = vadd.f32 %v2880_v14, %v2878_v54 }
 0x521   : > { %3467 = vmatmul.msk.f32.vlgmr.msra.gmra.mxu2 %vm592_vm5, %v2882_v61 }
 0x522   : > { %v2943_v28 = vpop.f32.mrf.mxu1 }
 0x524   : > { %v2981_v1 = vpop.f32.mrf.mxu0 }
 0x525   : > { %v2982_v5 = vadd.f32 %v2981_v1, %v2937_v59 }
 0x529   : > { %3468 = vmatmul.msk.f32.gmra.mxu2 %vm592_vm5, %v2883_v30 }
 0x52a   : > { %v2946_v41 = vpop.f32.mrf.mxu1 }
 0x52c   : > { %v2984_v48 = vpop.f32.mrf.mxu0 }
 0x52d   : > { %v2985_v18 = vadd.f32 %v2984_v48, %v2940_v8 }
 0x531   : > { %3469 = vmatmul.msk.f32.gmra.mxu2 %vm592_vm5, %v2884_v21 }
 0x532   : > { %v2949_v4 = vpop.f32.mrf.mxu1 }
 0x534   : > { %v2987_v50 = vpop.f32.mrf.mxu0 }
 0x535   : > { %v2988_v10 = vadd.f32 %v2987_v50, %v2943_v28 }
 0x539   : > { %3470 = vmatmul.msk.f32.gmra.mxu2 %vm592_vm5, %v2885_v55 }
 0x53a   : > { %v2952_v63 = vpop.f32.mrf.mxu1 }
 0x53c   : > { %v2990_v39 = vpop.f32.mrf.mxu0 }
 0x53d   : > { %v2991_v0 = vadd.f32 %v2990_v39, %v2946_v41 }
 0x541   : > { %3471 = vmatmul.msk.f32.gmra.mxu2 %vm592_vm5, %v2886_v40 }
 0x542   : > { %v2955_v26 = vpop.f32.mrf.mxu1 }
 0x544   : > { %v2993_v2 = vpop.f32.mrf.mxu0 }
 0x545   : > { %v2994_v62 = vadd.f32 %v2993_v2, %v2949_v4 }
 0x549   : > { %3472 = vmatmul.msk.f32.gmra.mxu2 %vm592_vm5, %v2887_v16 }
 0x54c   : > { %v2996_v22 = vpop.f32.mrf.mxu0 }
 0x54d   : > { %v2997_v31 = vadd.f32 %v2996_v22, %v2952_v63 }
 0x551   : > { %3473 = vmatmul.msk.f32.gmra.mxu2 %vm592_vm5, %v2888_v25 }
 0x554   : > { %v2999_v51 = vpop.f32.mrf.mxu0 }
 0x555   : > { %v3000_v7 = vadd.f32 %v2999_v51, %v2955_v26 }
 0x559   : > { %3474 = vmatmul.msk.f32.gmra.mxu2 %vm592_vm5, %v2889_v38 }
 0x5a4   : > { %v3045_v35 = vpop.f32.mrf.mxu2 }
 0x5a5   : > { %v3069_v42 = vadd.f32 %v3045_v35, %v2979_v58 }
 0x5a7   : > { %v3081_v32 = vadd.f32 %v3497_v33, %v3069_v42 }
 0x5a9   : > { %3089 = vst.msk [vmem:[%s5205_s26] sm:$0xff] %vm1423_vm14, %v3081_v32 }
 0x5ac   : > { %v3048_v20 = vpop.f32.mrf.mxu2 }
 0x5ad   : > { %v3070_v6 = vadd.f32 %v3048_v20, %v2982_v5 }
 0x5af   : > { %v3082_v60 = vadd.f32 %v3497_v33, %v3070_v6 }
 0x5b1   : > { %3090 = vst.msk [vmem:[%s5205_s26 + $0x8] sm:$0xff] %vm1423_vm14, %v3082_v60 }
 0x5b4   : > { %v3051_v45 = vpop.f32.mrf.mxu2 }
 0x5b5   : > { %v3071_v52 = vadd.f32 %v3051_v45, %v2985_v18 }
 0x5b7   : > { %v3083_v19 = vadd.f32 %v3497_v33, %v3071_v52 }
 0x5b9   : > { %3091 = vst.msk [vmem:[%s5205_s26 + $0x10] sm:$0xff] %vm1423_vm14, %v3083_v19 }
 0x5bc   : > { %v3054_v13 = vpop.f32.mrf.mxu2 }
 0x5bd   : > { %v3072_v24 = vadd.f32 %v3054_v13, %v2988_v10 }
 0x5bf   : > { %v3084_v46 = vadd.f32 %v3497_v33, %v3072_v24 }
 0x5c1   : > { %3092 = vst.msk [vmem:[%s5205_s26 + $0x18] sm:$0xff] %vm1423_vm14, %v3084_v46 }
 0x5c4   : > { %v3057_v44 = vpop.f32.mrf.mxu2 }
 0x5c5   : > { %v3073_v27 = vadd.f32 %v3057_v44, %v2991_v0 }
 0x5c7   : > { %v3085_v56 = vadd.f32 %v3497_v33, %v3073_v27 }
 0x5c9   : > { %3093 = vst.msk [vmem:[%s5205_s26 + $0x20] sm:$0xff] %vm1423_vm14, %v3085_v56 }
 0x5cc   : > { %v3060_v17 = vpop.f32.mrf.mxu2 }
 0x5cd   : > { %v3074_v29 = vadd.f32 %v3060_v17, %v2994_v62 }
 0x5cf   : > { %v3086_v23 = vadd.f32 %v3497_v33, %v3074_v29 }
 0x5d1   : > { %3094 = vst.msk [vmem:[%s5205_s26 + $0x28] sm:$0xff] %vm1423_vm14, %v3086_v23 }
 0x5d4   : > { %v3063_v12 = vpop.f32.mrf.mxu2 }
 0x5d5   : > { %v3075_v15 = vadd.f32 %v3063_v12, %v2997_v31 }
 0x5d7   : > { %v3087_v57 = vadd.f32 %v3497_v33, %v3075_v15 }
 0x5d9   : > { %3095 = vst.msk [vmem:[%s5205_s26 + $0x30] sm:$0xff] %vm1423_vm14, %v3087_v57 }
 0x5dc   : > { %v3066_v43 = vpop.f32.mrf.mxu2 }
 0x5dd   : > { %v3076_v14 = vadd.f32 %v3066_v43, %v3000_v7 }
 0x5df   : > { %v3088_v34 = vadd.f32 %v3497_v33, %v3076_v14 }
 0x5e1   : > { %3096 = vst.msk [vmem:[%s5205_s26 + $0x38] sm:$0xff] %vm1423_vm14, %v3088_v34 }
 0x5e2 PF: > { %s28_s27 = sadd.s32 1, %s3560_s27  }
 0x5e3   : > { %p25_p4 = scmp.ge.s32.totalorder %s28_s27, 4  }
 0x5e5   :  { %27 = sbr.rel (!%p25_p4) target bundleno = 4 (0x4), region = 146 }

</bundles_post_ra>
